<compile_context>
chip_gen: v7x
topology: tpu7x:2x2x1
jax: 0.10.0
libtpu: 0.0.40
codegen_flags: <defaults>
</compile_context>

<pallas_src>
import math

import numpy as np
import jax
import jax.numpy as jnp
from jax.experimental import pallas as pl
from jax.experimental.pallas import tpu as pltpu

# ----------------------------- model configuration -----------------------------
HIDDEN = 32            # decoder hidden size
N_HARM = 16            # number of harmonic amplitudes
N_BANDS = 8            # number of noise bands
N_PROJ = 1 + N_HARM + N_BANDS
BLOCK_SIZE = 16        # model.block_size (audio frames per control frame)
SAMPLING_RATE = 16000  # model.sampling_rate
MEAN_LOUDNESS = -4.5   # registered buffer (synthetic deterministic value)
STD_LOUDNESS = 2.25    # registered buffer (synthetic deterministic value)
LN_EPS = 1e-5
LEAKY_SLOPE = 0.01     # torch.nn.LeakyReLU default
LOG10 = math.log(10.0)


# ----------------------------- parameter construction ---------------------------
class _KeyGen:
    def __init__(self, seed):
        self._key = jax.random.PRNGKey(seed)

    def __call__(self):
        self._key, sub = jax.random.split(self._key)
        return sub


def _pack_slab(params):
    """Pack parameters into a single [R, 128] f32 slab.

    Matrices (rows > 1) get their own 8-row-aligned band at lane offset 0 (so MXU
    operands are simple lane-0 slices).  Row vectors ([1, c]: biases, LN gammas/betas)
    are shelf-packed side by side along lanes (32-lane aligned) to shrink the slab.
    Returns (slab, layout) with layout[name] = (row_off, col_off, rows, cols).
    """
    layout = {}
    shelves = []          # [row_off, lane_cursor] for 8-row vector shelves
    row_off = 0
    for name, arr in params.items():
        r, c = arr.shape
        if r == 1:
            w = -(-c // 32) * 32
            placed = False
            for sh in shelves:
                if sh[1] + w <= 128:
                    layout[name] = (sh[0], sh[1], r, c)
                    sh[1] += w
                    placed = True
                    break
            if not placed:
                shelves.append([row_off, w])
                layout[name] = (row_off, 0, r, c)
                row_off += 8
        else:
            layout[name] = (row_off, 0, r, c)
            row_off += -(-r // 8) * 8
    slab = np.zeros((max(row_off, 8), 128), np.float32)
    for name, arr in params.items():
        ro, co, r, c = layout[name]
        slab[ro:ro + r, co:co + c] = np.asarray(arr)
    return jnp.asarray(slab), layout


def build_params(seed=0):
    """Deterministic synthetic decoder parameters, packed into a single f32 VMEM slab.

    GRU gate weights are pre-fused along lanes: hidden-side [H, 3H] (one dot / step),
    input-side [H, 3H] per source (two dots total).  Output projections are pre-fused
    into one [H, 1 + N_HARM + N_BANDS] matrix.
    """
    kg = _KeyGen(seed)
    params = {}

    def uniform(shape, scale):
        return jax.random.uniform(kg(), shape, jnp.float32, -scale, scale)

    def linear(wname, bname, d_in, d_out, fan_in=None):
        s = 1.0 / math.sqrt(fan_in if fan_in is not None else d_in)
        params[wname] = uniform((d_in, d_out), s)
        params[bname] = uniform((1, d_out), s)

    def add_ln(prefix, i):
        params[f"{prefix}_g{i}"] = jnp.ones((1, HIDDEN), jnp.float32)
        params[f"{prefix}_be{i}"] = jnp.zeros((1, HIDDEN), jnp.float32)

    def add_scalar_mlp(prefix):
        # 3 x [Linear -> LayerNorm -> LeakyReLU], scalar (1-feature) input
        linear(f"{prefix}_w1", f"{prefix}_b1", 1, HIDDEN)
        add_ln(prefix, 1)
        for i in (2, 3):
            linear(f"{prefix}_w{i}", f"{prefix}_b{i}", HIDDEN, HIDDEN)
            add_ln(prefix, i)

    add_scalar_mlp("mp")   # in_mlp pitch
    add_scalar_mlp("ml")   # in_mlp loudness

    # GRU (PyTorch gate order r, z, n), fused along lanes.
    s_in = 1.0 / math.sqrt(2 * HIDDEN)
    s_h = 1.0 / math.sqrt(HIDDEN)
    params["w_i_p"] = jnp.concatenate(
        [uniform((HIDDEN, HIDDEN), s_in) for _ in range(3)], axis=1)   # [H, 3H]
    params["w_i_l"] = jnp.concatenate(
        [uniform((HIDDEN, HIDDEN), s_in) for _ in range(3)], axis=1)   # [H, 3H]
    params["b_i"] = jnp.concatenate(
        [uniform((1, HIDDEN), s_in) for _ in range(3)], axis=1)        # [1, 3H]
    params["w_h"] = jnp.concatenate(
        [uniform((HIDDEN, HIDDEN), s_h) for _ in range(3)], axis=1)    # [H, 3H]
    params["b_h"] = jnp.concatenate(
        [uniform((1, HIDDEN), s_h) for _ in range(3)], axis=1)         # [1, 3H]

    # out_mlp on [gru_out, pitch, loudness]; first-layer weight split per source.
    s_o = 1.0 / math.sqrt(HIDDEN + 2)
    params["mo_w1_h"] = uniform((HIDDEN, HIDDEN), s_o)
    params["mo_w1_p"] = uniform((1, HIDDEN), s_o)
    params["mo_w1_l"] = uniform((1, HIDDEN), s_o)
    params["mo_b1"] = uniform((1, HIDDEN), s_o)
    add_ln("mo", 1)
    for i in (2, 3):
        linear(f"mo_w{i}", f"mo_b{i}", HIDDEN, HIDDEN)
        add_ln("mo", i)

    # fused projections: [total amplitude | harmonic amplitudes | noise band gains]
    params["w_proj"] = jnp.concatenate(
        [uniform((HIDDEN, 1), s_h),
         uniform((HIDDEN, N_HARM), s_h),
         uniform((HIDDEN, N_BANDS), s_h)], axis=1)                     # [H, 25]
    params["b_proj"] = jnp.concatenate(
        [uniform((1, 1), s_h),
         uniform((1, N_HARM), s_h),
         uniform((1, N_BANDS), s_h)], axis=1)                          # [1, 25]

    return _pack_slab(params)


# ------------------------- audio synthesis helpers (XLA glue) --------------------
def _impulse_basis(n_bands, block_size):
    """Linear map equal to DDSP amp_to_impulse_response (zero-phase irfft of the band
    amplitudes, centre + hann window, zero-pad to block_size), as [n_bands, block_size].
    The torch version uses torch.fft.irfft; imaginary parts are zero, so it is linear."""
    fsz = 2 * (n_bands - 1)
    n = np.arange(fsz)
    k = np.arange(n_bands)
    w = np.ones(n_bands)
    w[1:n_bands - 1] = 2.0
    basis = (w[:, None] * np.cos(2.0 * np.pi * k[:, None] * n[None, :] / fsz)) / fsz
    basis = np.roll(basis, fsz // 2, axis=-1)
    basis = basis * (0.5 - 0.5 * np.cos(2.0 * np.pi * n / fsz))      # hann window
    basis = np.pad(basis, ((0, 0), (0, block_size - fsz)))
    basis = np.roll(basis, -(fsz // 2), axis=-1)
    return jnp.asarray(basis, jnp.float32)


def _block_convolve(signal, kernel):
    """Equivalent to DDSP fft_convolve(signal, kernel) (zero-pad, circular FFT conv, keep
    the second half): per-block causal convolution truncated to the block length."""
    n = signal.shape[-1]
    d = jnp.arange(n)[:, None] - jnp.arange(n)[None, :]              # t - j
    k_shift = jnp.take(kernel, jnp.clip(d, 0, n - 1), axis=-1)       # [..., t, j] = k[t-j]
    k_shift = jnp.where(d >= 0, k_shift, 0.0)
    return jnp.einsum("btij,btj->bti", k_shift, signal)


# ----------------------------------- decoder ------------------------------------
def make_decoder(layout):
    """Builds a jitted (pitch, loudness, slab, noise_key) -> audio callable."""

    @jax.jit
    def run(pitch, loudness, slab, noise_key):
        # ---- forward() glue: block-rate down-sampling (strided slicing) ----
        p_blk = pitch[:, ::BLOCK_SIZE, :]        # [B, T, 1]   (Hz)
        l_blk = loudness[:, ::BLOCK_SIZE, :]     # [B, T, 1]   (raw; normalized in-kernel)
        B, T, _ = p_blk.shape
        BP = -(-B // 8) * 8                      # pad batch to a sublane tile
        TBP = T * BP

        # single (TBP, 2) input: col 0 = pitch, col 1 = loudness (one DMA stream)
        pl_blk = jnp.concatenate([p_blk, l_blk], axis=-1)            # [B, T, 2]
        pl_blk = jnp.pad(pl_blk, ((0, BP - B), (0, 0), (0, 0)))      # [BP, T, 2]
        pl_flat = jnp.transpose(pl_blk, (1, 0, 2)).reshape(TBP, 2)   # row = t*BP + b

        # ---------------- Pallas kernel: full block-rate decoder, ONE grid step ----------
        def decoder_kernel(in_ref, slab_ref, out_ref, gates_ref, h_all_ref):
            def W(name):
                ro, co, r, c = layout[name]
                return slab_ref[ro:ro + r, co:co + c]    # static slice of the weight slab

            def ln_lrelu(x, prefix, i):
                mu = jnp.mean(x, axis=-1, keepdims=True)
                var = jnp.mean(jnp.square(x - mu), axis=-1, keepdims=True)
                x = (x - mu) * jax.lax.rsqrt(var + LN_EPS)
                x = x * W(f"{prefix}_g{i}") + W(f"{prefix}_be{i}")
                return jnp.where(x >= 0.0, x, LEAKY_SLOPE * x)

            def lin(v, wname, bname):
                return jnp.dot(v, W(wname), preferred_element_type=jnp.float32) + W(bname)

            def scalar_mlp(s, prefix):
                # first Linear has K=1 -> VPU broadcast multiply-add instead of the MXU
                x = s * W(f"{prefix}_w1") + W(f"{prefix}_b1")
                x = ln_lrelu(x, prefix, 1)
                for i in (2, 3):
                    x = ln_lrelu(lin(x, f"{prefix}_w{i}", f"{prefix}_b{i}"), prefix, i)
                return x

            def scale_fn(x):
                # 2*sigmoid(x)**log(10) + 1e-7  ==  2*exp(-log(10)*softplus(-x)) + 1e-7
                sp = jnp.maximum(-x, 0.0) + jnp.log1p(jnp.exp(-jnp.abs(x)))
                return 2.0 * jnp.exp(-LOG10 * sp) + 1e-7

            pitch_k = in_ref[:, 0:1]                                      # [T*BP, 1]
            loud_k = (in_ref[:, 1:2] - MEAN_LOUDNESS) / STD_LOUDNESS      # normalization

            # ---- time-parallel pre-stage: input MLPs + fused GRU input-side gates ----
            hp = scalar_mlp(pitch_k, "mp")                                # [T*BP, H]
            hl = scalar_mlp(loud_k, "ml")                                 # [T*BP, H]
            gates_ref[...] = (
                jnp.dot(hp, W("w_i_p"), preferred_element_type=jnp.float32)
                + jnp.dot(hl, W("w_i_l"), preferred_element_type=jnp.float32)
                + W("b_i"))                                               # [T*BP, 3H]

            # ---- sequential GRU; one fused [H,3H] dot per step, h carried in vregs ----
            w_h = W("w_h")                                                # [H, 3H]
            b_h = W("b_h")                                                # [1, 3H]

            def gru_step(t, h):
                row = pl.multiple_of(t * BP, 8)
                xg = gates_ref[pl.ds(row, BP), :]                         # [BP, 3H]
                hg = jnp.dot(h, w_h, preferred_element_type=jnp.float32) + b_h
                r = jax.nn.sigmoid(xg[:, 0:HIDDEN] + hg[:, 0:HIDDEN])
                z = jax.nn.sigmoid(xg[:, HIDDEN:2 * HIDDEN] + hg[:, HIDDEN:2 * HIDDEN])
                n = jnp.tanh(xg[:, 2 * HIDDEN:3 * HIDDEN]
                             + r * hg[:, 2 * HIDDEN:3 * HIDDEN])
                h = (1.0 - z) * n + z * h
                h_all_ref[pl.ds(row, BP), :] = h
                return h

            # TODO(synk): persistent realtime GRU cache (model.cache_gru) across calls is
            # not carried over; the hidden state is zero-initialized per invocation.
            jax.lax.fori_loop(0, T, gru_step,
                              jnp.zeros((BP, HIDDEN), jnp.float32),
                              unroll=min(T, 8))        # bounded unroll: no vreg-spill blowup

            # ---- time-parallel post-stage: out_mlp + fused projections + scale_fn ----
            x = (jnp.dot(h_all_ref[...], W("mo_w1_h"), preferred_element_type=jnp.float32)
                 + pitch_k * W("mo_w1_p") + loud_k * W("mo_w1_l") + W("mo_b1"))
            x = ln_lrelu(x, "mo", 1)
            for i in (2, 3):
                x = ln_lrelu(lin(x, f"mo_w{i}", f"mo_b{i}"), "mo", i)

            proj = lin(x, "w_proj", "b_proj")                           # [T*BP, 25]
            total_amp = scale_fn(proj[:, 0:1])                          # [T*BP, 1]
            amps = scale_fn(proj[:, 1:1 + N_HARM])                      # [T*BP, N_HARM]
            harm_idx = (jax.lax.broadcasted_iota(jnp.int32, amps.shape, 1)
                        + 1).astype(jnp.float32)
            alias = (pitch_k * harm_idx < 0.5 * SAMPLING_RATE).astype(jnp.float32) + 1e-4
            amps = amps * alias                                         # remove_above_nyquist
            amps = amps / jnp.sum(amps, axis=-1, keepdims=True)
            amps = amps * total_amp
            noise_g = scale_fn(proj[:, 1 + N_HARM:1 + N_HARM + N_BANDS] - 5.0)

            # lane-dense output slab: direct lane-slice stores, no concatenate
            out_ref[:, :N_HARM] = amps
            out_ref[:, N_HARM:] = noise_g

        controls = pl.pallas_call(
            decoder_kernel,
            out_shape=jax.ShapeDtypeStruct((TBP, N_HARM + N_BANDS), jnp.float32),
            grid_spec=pltpu.PrefetchScalarGridSpec(
                num_scalar_prefetch=0,
                grid=(1,),                                   # single step: no grid overhead
                in_specs=[pl.BlockSpec((TBP, 2), lambda i: (0, 0)),
                          pl.BlockSpec(slab.shape, lambda i: (0, 0))],
                out_specs=pl.BlockSpec((TBP, N_HARM + N_BANDS), lambda i: (0, 0)),
                scratch_shapes=[pltpu.VMEM((TBP, 3 * HIDDEN), jnp.float32),  # fused x-gates
                                pltpu.VMEM((TBP, HIDDEN), jnp.float32)],     # GRU outputs
            ),
            compiler_params=pltpu.CompilerParams(
                dimension_semantics=("arbitrary",)),
        )(pl_flat, slab)

        # ---- unpack: [T*BP, 24] -> batch-major block-rate controls ----
        controls = controls.reshape(T, BP, N_HARM + N_BANDS)[:, :B, :]
        amps_blk = jnp.transpose(controls[..., :N_HARM], (1, 0, 2))     # [B, T, N_HARM]
        noise_blk = jnp.transpose(controls[..., N_HARM:], (1, 0, 2))    # [B, T, N_BANDS]

        # ---- realtime_forward_audio synthesis (XLA glue) ----
        # harmonic oscillator bank (nearest-neighbour upsample to audio rate)
        # TODO(synk): persistent oscillator phase (model.phase) across calls is not carried.
        amps_up = jnp.repeat(amps_blk, BLOCK_SIZE, axis=1)              # [B, N, N_HARM]
        pitch_up = jnp.repeat(p_blk, BLOCK_SIZE, axis=1)                # [B, N, 1]
        omega = jnp.cumsum(2.0 * math.pi * pitch_up / SAMPLING_RATE, axis=1)
        omega = jnp.mod(omega, 2.0 * math.pi)       # wrap fundamental phase (k integer)
        k_idx = jnp.arange(1, N_HARM + 1, dtype=jnp.float32)
        harmonic = jnp.sum(jnp.sin(omega * k_idx) * amps_up, axis=-1, keepdims=True)

        # filtered-noise synthesis
        # TODO(synk): FFT-based noise shaping (amp_to_impulse_response / fft_convolve) has
        # no Pallas equivalent; it runs as algebraically equivalent XLA glue outside the
        # kernel (cosine-basis irfft matrix + per-block causal convolution).
        impulse = jnp.einsum("btk,kn->btn", noise_blk,
                             _impulse_basis(N_BANDS, BLOCK_SIZE))       # [B, T, BLOCK_SIZE]
        noise = jax.random.uniform(noise_key, (B, T, BLOCK_SIZE),
                                   jnp.float32, -1.0, 1.0)
        noise = _block_convolve(noise, impulse).reshape(B, T * BLOCK_SIZE, 1)

        return harmonic + noise                                         # [B, N, 1]

    return run


# ------------------------------------ main --------------------------------------
if __name__ == "__main__":
    B, N = 2, 128                   # N audio-rate frames -> T = N // BLOCK_SIZE = 8 blocks
    kp, kl, kn = jax.random.split(jax.random.PRNGKey(0), 3)
    pitch = jax.random.uniform(kp, (B, N, 1), jnp.float32, 100.0, 400.0)
    loudness = jax.random.uniform(kl, (B, N, 1), jnp.float32, -8.0, 0.0)

    slab, layout = build_params(seed=0)
    decoder = make_decoder(layout)

    audio = decoder(pitch, loudness, slab, kn)
    jax.block_until_ready(audio)

    assert audio.shape == (B, N, 1)
    assert bool(jnp.all(jnp.isfinite(audio)))
    print("KERNEL_OK")
</pallas_src>

<mosaic_0001>
module attributes {stable_mosaic.version = 11 : i64} {
  func.func @decoder_kernel(%arg0: i32, %arg1: memref<64x2xf32, #tpu.memory_space<vmem>>, %arg2: memref<432x128xf32, #tpu.memory_space<vmem>>, %arg3: memref<64x24xf32, #tpu.memory_space<vmem>>, %arg4: memref<64x96xf32, #tpu.memory_space<vmem>>, %arg5: memref<64x32xf32, #tpu.memory_space<vmem>>) attributes {dimension_semantics = [#tpu.dimension_semantics<arbitrary>], iteration_bounds = array<i64: 1>, scalar_prefetch = 0 : i64, scratch_operands = 2 : i64, tpu.core_type = #tpu.core_type<tc>, window_params = [{pipeline_mode = #tpu.pipeline_mode<synchronous>, transform_indices = @transform_0, window_bounds = array<i64: 64, 2>}, {pipeline_mode = #tpu.pipeline_mode<synchronous>, transform_indices = @transform_1, window_bounds = array<i64: 432, 128>}, {pipeline_mode = #tpu.pipeline_mode<synchronous>, transform_indices = @transform_2, window_bounds = array<i64: 64, 24>}]} {
    %c0 = arith.constant 0 : index
    %c0_0 = arith.constant 0 : index
    %0 = vector.load %arg1[%c0, %c0_0] : memref<64x2xf32, #tpu.memory_space<vmem>>, vector<64x1xf32>
    %c0_1 = arith.constant 0 : index
    %c1 = arith.constant 1 : index
    %1 = vector.load %arg1[%c0_1, %c1] : memref<64x2xf32, #tpu.memory_space<vmem>>, vector<64x1xf32>
    %cst = arith.constant -4.500000e+00 : f32
    %2 = vector.broadcast %cst : f32 to vector<64x1xf32>
    %3 = arith.subf %1, %2 : vector<64x1xf32>
    %cst_2 = arith.constant 2.250000e+00 : f32
    %4 = vector.broadcast %cst_2 : f32 to vector<64x1xf32>
    %5 = arith.divf %3, %4 : vector<64x1xf32>
    %c0_3 = arith.constant 0 : index
    %c0_4 = arith.constant 0 : index
    %6 = vector.load %arg2[%c0_3, %c0_4] : memref<432x128xf32, #tpu.memory_space<vmem>>, vector<1x32xf32>
    %7 = vector.broadcast %0 : vector<64x1xf32> to vector<64x32xf32>
    %8 = vector.broadcast %6 : vector<1x32xf32> to vector<64x32xf32>
    %9 = arith.mulf %7, %8 : vector<64x32xf32>
    %c0_5 = arith.constant 0 : index
    %c32 = arith.constant 32 : index
    %10 = vector.load %arg2[%c0_5, %c32] : memref<432x128xf32, #tpu.memory_space<vmem>>, vector<1x32xf32>
    %11 = vector.broadcast %10 : vector<1x32xf32> to vector<64x32xf32>
    %12 = arith.addf %9, %11 : vector<64x32xf32>
    %cst_6 = arith.constant dense<0.000000e+00> : vector<64xf32>
    %13 = vector.multi_reduction <add>, %12, %cst_6 [1] : vector<64x32xf32> to vector<64xf32>
    %14 = vector.shape_cast %13 : vector<64xf32> to vector<64x1xf32>
    %cst_7 = arith.constant 3.200000e+01 : f32
    %15 = vector.broadcast %cst_7 : f32 to vector<64x1xf32>
    %16 = arith.divf %14, %15 : vector<64x1xf32>
    %17 = vector.broadcast %16 : vector<64x1xf32> to vector<64x32xf32>
    %18 = arith.subf %12, %17 : vector<64x32xf32>
    %19 = arith.mulf %18, %18 : vector<64x32xf32>
    %cst_8 = arith.constant dense<0.000000e+00> : vector<64xf32>
    %20 = vector.multi_reduction <add>, %19, %cst_8 [1] : vector<64x32xf32> to vector<64xf32>
    %21 = vector.shape_cast %20 : vector<64xf32> to vector<64x1xf32>
    %cst_9 = arith.constant 3.200000e+01 : f32
    %22 = vector.broadcast %cst_9 : f32 to vector<64x1xf32>
    %23 = arith.divf %21, %22 : vector<64x1xf32>
    %24 = vector.broadcast %16 : vector<64x1xf32> to vector<64x32xf32>
    %25 = arith.subf %12, %24 : vector<64x32xf32>
    %cst_10 = arith.constant 9.99999974E-6 : f32
    %26 = vector.broadcast %cst_10 : f32 to vector<64x1xf32>
    %27 = arith.addf %23, %26 : vector<64x1xf32>
    %28 = math.rsqrt %27 : vector<64x1xf32>
    %29 = vector.broadcast %28 : vector<64x1xf32> to vector<64x32xf32>
    %30 = arith.mulf %25, %29 : vector<64x32xf32>
    %c0_11 = arith.constant 0 : index
    %c64 = arith.constant 64 : index
    %31 = vector.load %arg2[%c0_11, %c64] : memref<432x128xf32, #tpu.memory_space<vmem>>, vector<1x32xf32>
    %32 = vector.broadcast %31 : vector<1x32xf32> to vector<64x32xf32>
    %33 = arith.mulf %30, %32 : vector<64x32xf32>
    %c0_12 = arith.constant 0 : index
    %c96 = arith.constant 96 : index
    %34 = vector.load %arg2[%c0_12, %c96] : memref<432x128xf32, #tpu.memory_space<vmem>>, vector<1x32xf32>
    %35 = vector.broadcast %34 : vector<1x32xf32> to vector<64x32xf32>
    %36 = arith.addf %33, %35 : vector<64x32xf32>
    %cst_13 = arith.constant 0.000000e+00 : f32
    %37 = vector.broadcast %cst_13 : f32 to vector<64x32xf32>
    %38 = arith.cmpf oge, %36, %37 : vector<64x32xf32>
    %cst_14 = arith.constant 0.00999999977 : f32
    %39 = vector.broadcast %cst_14 : f32 to vector<64x32xf32>
    %40 = arith.mulf %39, %36 : vector<64x32xf32>
    %41 = arith.select %38, %36, %40 : vector<64x32xi1>, vector<64x32xf32>
    %c8 = arith.constant 8 : index
    %c0_15 = arith.constant 0 : index
    %42 = vector.load %arg2[%c8, %c0_15] : memref<432x128xf32, #tpu.memory_space<vmem>>, vector<32x32xf32>
    %cst_16 = arith.constant dense<0.000000e+00> : vector<64x32xf32>
    %43 = tpu.matmul %41, %42, %cst_16 {dimension_numbers = #tpu.dot_dimension_numbers<[1], [0], [0], [1], [0, 0, 1, 1], [], []>} : vector<64x32xf32>, vector<32x32xf32>, vector<64x32xf32> -> vector<64x32xf32>
    %c40 = arith.constant 40 : index
    %c0_17 = arith.constant 0 : index
    %44 = vector.load %arg2[%c40, %c0_17] : memref<432x128xf32, #tpu.memory_space<vmem>>, vector<1x32xf32>
    %45 = vector.broadcast %44 : vector<1x32xf32> to vector<64x32xf32>
    %46 = arith.addf %43, %45 : vector<64x32xf32>
    %cst_18 = arith.constant dense<0.000000e+00> : vector<64xf32>
    %47 = vector.multi_reduction <add>, %46, %cst_18 [1] : vector<64x32xf32> to vector<64xf32>
    %48 = vector.shape_cast %47 : vector<64xf32> to vector<64x1xf32>
    %cst_19 = arith.constant 3.200000e+01 : f32
    %49 = vector.broadcast %cst_19 : f32 to vector<64x1xf32>
    %50 = arith.divf %48, %49 : vector<64x1xf32>
    %51 = vector.broadcast %50 : vector<64x1xf32> to vector<64x32xf32>
    %52 = arith.subf %46, %51 : vector<64x32xf32>
    %53 = arith.mulf %52, %52 : vector<64x32xf32>
    %cst_20 = arith.constant dense<0.000000e+00> : vector<64xf32>
    %54 = vector.multi_reduction <add>, %53, %cst_20 [1] : vector<64x32xf32> to vector<64xf32>
    %55 = vector.shape_cast %54 : vector<64xf32> to vector<64x1xf32>
    %cst_21 = arith.constant 3.200000e+01 : f32
    %56 = vector.broadcast %cst_21 : f32 to vector<64x1xf32>
    %57 = arith.divf %55, %56 : vector<64x1xf32>
    %58 = vector.broadcast %50 : vector<64x1xf32> to vector<64x32xf32>
    %59 = arith.subf %46, %58 : vector<64x32xf32>
    %cst_22 = arith.constant 9.99999974E-6 : f32
    %60 = vector.broadcast %cst_22 : f32 to vector<64x1xf32>
    %61 = arith.addf %57, %60 : vector<64x1xf32>
    %62 = math.rsqrt %61 : vector<64x1xf32>
    %63 = vector.broadcast %62 : vector<64x1xf32> to vector<64x32xf32>
    %64 = arith.mulf %59, %63 : vector<64x32xf32>
    %c40_23 = arith.constant 40 : index
    %c32_24 = arith.constant 32 : index
    %65 = vector.load %arg2[%c40_23, %c32_24] : memref<432x128xf32, #tpu.memory_space<vmem>>, vector<1x32xf32>
    %66 = vector.broadcast %65 : vector<1x32xf32> to vector<64x32xf32>
    %67 = arith.mulf %64, %66 : vector<64x32xf32>
    %c40_25 = arith.constant 40 : index
    %c64_26 = arith.constant 64 : index
    %68 = vector.load %arg2[%c40_25, %c64_26] : memref<432x128xf32, #tpu.memory_space<vmem>>, vector<1x32xf32>
    %69 = vector.broadcast %68 : vector<1x32xf32> to vector<64x32xf32>
    %70 = arith.addf %67, %69 : vector<64x32xf32>
    %cst_27 = arith.constant 0.000000e+00 : f32
    %71 = vector.broadcast %cst_27 : f32 to vector<64x32xf32>
    %72 = arith.cmpf oge, %70, %71 : vector<64x32xf32>
    %cst_28 = arith.constant 0.00999999977 : f32
    %73 = vector.broadcast %cst_28 : f32 to vector<64x32xf32>
    %74 = arith.mulf %73, %70 : vector<64x32xf32>
    %75 = arith.select %72, %70, %74 : vector<64x32xi1>, vector<64x32xf32>
    %c48 = arith.constant 48 : index
    %c0_29 = arith.constant 0 : index
    %76 = vector.load %arg2[%c48, %c0_29] : memref<432x128xf32, #tpu.memory_space<vmem>>, vector<32x32xf32>
    %cst_30 = arith.constant dense<0.000000e+00> : vector<64x32xf32>
    %77 = tpu.matmul %75, %76, %cst_30 {dimension_numbers = #tpu.dot_dimension_numbers<[1], [0], [0], [1], [0, 0, 1, 1], [], []>} : vector<64x32xf32>, vector<32x32xf32>, vector<64x32xf32> -> vector<64x32xf32>
    %c40_31 = arith.constant 40 : index
    %c96_32 = arith.constant 96 : index
    %78 = vector.load %arg2[%c40_31, %c96_32] : memref<432x128xf32, #tpu.memory_space<vmem>>, vector<1x32xf32>
    %79 = vector.broadcast %78 : vector<1x32xf32> to vector<64x32xf32>
    %80 = arith.addf %77, %79 : vector<64x32xf32>
    %cst_33 = arith.constant dense<0.000000e+00> : vector<64xf32>
    %81 = vector.multi_reduction <add>, %80, %cst_33 [1] : vector<64x32xf32> to vector<64xf32>
    %82 = vector.shape_cast %81 : vector<64xf32> to vector<64x1xf32>
    %cst_34 = arith.constant 3.200000e+01 : f32
    %83 = vector.broadcast %cst_34 : f32 to vector<64x1xf32>
    %84 = arith.divf %82, %83 : vector<64x1xf32>
    %85 = vector.broadcast %84 : vector<64x1xf32> to vector<64x32xf32>
    %86 = arith.subf %80, %85 : vector<64x32xf32>
    %87 = arith.mulf %86, %86 : vector<64x32xf32>
    %cst_35 = arith.constant dense<0.000000e+00> : vector<64xf32>
    %88 = vector.multi_reduction <add>, %87, %cst_35 [1] : vector<64x32xf32> to vector<64xf32>
    %89 = vector.shape_cast %88 : vector<64xf32> to vector<64x1xf32>
    %cst_36 = arith.constant 3.200000e+01 : f32
    %90 = vector.broadcast %cst_36 : f32 to vector<64x1xf32>
    %91 = arith.divf %89, %90 : vector<64x1xf32>
    %92 = vector.broadcast %84 : vector<64x1xf32> to vector<64x32xf32>
    %93 = arith.subf %80, %92 : vector<64x32xf32>
    %cst_37 = arith.constant 9.99999974E-6 : f32
    %94 = vector.broadcast %cst_37 : f32 to vector<64x1xf32>
    %95 = arith.addf %91, %94 : vector<64x1xf32>
    %96 = math.rsqrt %95 : vector<64x1xf32>
    %97 = vector.broadcast %96 : vector<64x1xf32> to vector<64x32xf32>
    %98 = arith.mulf %93, %97 : vector<64x32xf32>
    %c80 = arith.constant 80 : index
    %c0_38 = arith.constant 0 : index
    %99 = vector.load %arg2[%c80, %c0_38] : memref<432x128xf32, #tpu.memory_space<vmem>>, vector<1x32xf32>
    %100 = vector.broadcast %99 : vector<1x32xf32> to vector<64x32xf32>
    %101 = arith.mulf %98, %100 : vector<64x32xf32>
    %c80_39 = arith.constant 80 : index
    %c32_40 = arith.constant 32 : index
    %102 = vector.load %arg2[%c80_39, %c32_40] : memref<432x128xf32, #tpu.memory_space<vmem>>, vector<1x32xf32>
    %103 = vector.broadcast %102 : vector<1x32xf32> to vector<64x32xf32>
    %104 = arith.addf %101, %103 : vector<64x32xf32>
    %cst_41 = arith.constant 0.000000e+00 : f32
    %105 = vector.broadcast %cst_41 : f32 to vector<64x32xf32>
    %106 = arith.cmpf oge, %104, %105 : vector<64x32xf32>
    %cst_42 = arith.constant 0.00999999977 : f32
    %107 = vector.broadcast %cst_42 : f32 to vector<64x32xf32>
    %108 = arith.mulf %107, %104 : vector<64x32xf32>
    %109 = arith.select %106, %104, %108 : vector<64x32xi1>, vector<64x32xf32>
    %c80_43 = arith.constant 80 : index
    %c64_44 = arith.constant 64 : index
    %110 = vector.load %arg2[%c80_43, %c64_44] : memref<432x128xf32, #tpu.memory_space<vmem>>, vector<1x32xf32>
    %111 = vector.broadcast %5 : vector<64x1xf32> to vector<64x32xf32>
    %112 = vector.broadcast %110 : vector<1x32xf32> to vector<64x32xf32>
    %113 = arith.mulf %111, %112 : vector<64x32xf32>
    %c80_45 = arith.constant 80 : index
    %c96_46 = arith.constant 96 : index
    %114 = vector.load %arg2[%c80_45, %c96_46] : memref<432x128xf32, #tpu.memory_space<vmem>>, vector<1x32xf32>
    %115 = vector.broadcast %114 : vector<1x32xf32> to vector<64x32xf32>
    %116 = arith.addf %113, %115 : vector<64x32xf32>
    %cst_47 = arith.constant dense<0.000000e+00> : vector<64xf32>
    %117 = vector.multi_reduction <add>, %116, %cst_47 [1] : vector<64x32xf32> to vector<64xf32>
    %118 = vector.shape_cast %117 : vector<64xf32> to vector<64x1xf32>
    %cst_48 = arith.constant 3.200000e+01 : f32
    %119 = vector.broadcast %cst_48 : f32 to vector<64x1xf32>
    %120 = arith.divf %118, %119 : vector<64x1xf32>
    %121 = vector.broadcast %120 : vector<64x1xf32> to vector<64x32xf32>
    %122 = arith.subf %116, %121 : vector<64x32xf32>
    %123 = arith.mulf %122, %122 : vector<64x32xf32>
    %cst_49 = arith.constant dense<0.000000e+00> : vector<64xf32>
    %124 = vector.multi_reduction <add>, %123, %cst_49 [1] : vector<64x32xf32> to vector<64xf32>
    %125 = vector.shape_cast %124 : vector<64xf32> to vector<64x1xf32>
    %cst_50 = arith.constant 3.200000e+01 : f32
    %126 = vector.broadcast %cst_50 : f32 to vector<64x1xf32>
    %127 = arith.divf %125, %126 : vector<64x1xf32>
    %128 = vector.broadcast %120 : vector<64x1xf32> to vector<64x32xf32>
    %129 = arith.subf %116, %128 : vector<64x32xf32>
    %cst_51 = arith.constant 9.99999974E-6 : f32
    %130 = vector.broadcast %cst_51 : f32 to vector<64x1xf32>
    %131 = arith.addf %127, %130 : vector<64x1xf32>
    %132 = math.rsqrt %131 : vector<64x1xf32>
    %133 = vector.broadcast %132 : vector<64x1xf32> to vector<64x32xf32>
    %134 = arith.mulf %129, %133 : vector<64x32xf32>
    %c88 = arith.constant 88 : index
    %c0_52 = arith.constant 0 : index
    %135 = vector.load %arg2[%c88, %c0_52] : memref<432x128xf32, #tpu.memory_space<vmem>>, vector<1x32xf32>
    %136 = vector.broadcast %135 : vector<1x32xf32> to vector<64x32xf32>
    %137 = arith.mulf %134, %136 : vector<64x32xf32>
    %c88_53 = arith.constant 88 : index
    %c32_54 = arith.constant 32 : index
    %138 = vector.load %arg2[%c88_53, %c32_54] : memref<432x128xf32, #tpu.memory_space<vmem>>, vector<1x32xf32>
    %139 = vector.broadcast %138 : vector<1x32xf32> to vector<64x32xf32>
    %140 = arith.addf %137, %139 : vector<64x32xf32>
    %cst_55 = arith.constant 0.000000e+00 : f32
    %141 = vector.broadcast %cst_55 : f32 to vector<64x32xf32>
    %142 = arith.cmpf oge, %140, %141 : vector<64x32xf32>
    %cst_56 = arith.constant 0.00999999977 : f32
    %143 = vector.broadcast %cst_56 : f32 to vector<64x32xf32>
    %144 = arith.mulf %143, %140 : vector<64x32xf32>
    %145 = arith.select %142, %140, %144 : vector<64x32xi1>, vector<64x32xf32>
    %c96_57 = arith.constant 96 : index
    %c0_58 = arith.constant 0 : index
    %146 = vector.load %arg2[%c96_57, %c0_58] : memref<432x128xf32, #tpu.memory_space<vmem>>, vector<32x32xf32>
    %cst_59 = arith.constant dense<0.000000e+00> : vector<64x32xf32>
    %147 = tpu.matmul %145, %146, %cst_59 {dimension_numbers = #tpu.dot_dimension_numbers<[1], [0], [0], [1], [0, 0, 1, 1], [], []>} : vector<64x32xf32>, vector<32x32xf32>, vector<64x32xf32> -> vector<64x32xf32>
    %c88_60 = arith.constant 88 : index
    %c64_61 = arith.constant 64 : index
    %148 = vector.load %arg2[%c88_60, %c64_61] : memref<432x128xf32, #tpu.memory_space<vmem>>, vector<1x32xf32>
    %149 = vector.broadcast %148 : vector<1x32xf32> to vector<64x32xf32>
    %150 = arith.addf %147, %149 : vector<64x32xf32>
    %cst_62 = arith.constant dense<0.000000e+00> : vector<64xf32>
    %151 = vector.multi_reduction <add>, %150, %cst_62 [1] : vector<64x32xf32> to vector<64xf32>
    %152 = vector.shape_cast %151 : vector<64xf32> to vector<64x1xf32>
    %cst_63 = arith.constant 3.200000e+01 : f32
    %153 = vector.broadcast %cst_63 : f32 to vector<64x1xf32>
    %154 = arith.divf %152, %153 : vector<64x1xf32>
    %155 = vector.broadcast %154 : vector<64x1xf32> to vector<64x32xf32>
    %156 = arith.subf %150, %155 : vector<64x32xf32>
    %157 = arith.mulf %156, %156 : vector<64x32xf32>
    %cst_64 = arith.constant dense<0.000000e+00> : vector<64xf32>
    %158 = vector.multi_reduction <add>, %157, %cst_64 [1] : vector<64x32xf32> to vector<64xf32>
    %159 = vector.shape_cast %158 : vector<64xf32> to vector<64x1xf32>
    %cst_65 = arith.constant 3.200000e+01 : f32
    %160 = vector.broadcast %cst_65 : f32 to vector<64x1xf32>
    %161 = arith.divf %159, %160 : vector<64x1xf32>
    %162 = vector.broadcast %154 : vector<64x1xf32> to vector<64x32xf32>
    %163 = arith.subf %150, %162 : vector<64x32xf32>
    %cst_66 = arith.constant 9.99999974E-6 : f32
    %164 = vector.broadcast %cst_66 : f32 to vector<64x1xf32>
    %165 = arith.addf %161, %164 : vector<64x1xf32>
    %166 = math.rsqrt %165 : vector<64x1xf32>
    %167 = vector.broadcast %166 : vector<64x1xf32> to vector<64x32xf32>
    %168 = arith.mulf %163, %167 : vector<64x32xf32>
    %c88_67 = arith.constant 88 : index
    %c96_68 = arith.constant 96 : index
    %169 = vector.load %arg2[%c88_67, %c96_68] : memref<432x128xf32, #tpu.memory_space<vmem>>, vector<1x32xf32>
    %170 = vector.broadcast %169 : vector<1x32xf32> to vector<64x32xf32>
    %171 = arith.mulf %168, %170 : vector<64x32xf32>
    %c128 = arith.constant 128 : index
    %c0_69 = arith.constant 0 : index
    %172 = vector.load %arg2[%c128, %c0_69] : memref<432x128xf32, #tpu.memory_space<vmem>>, vector<1x32xf32>
    %173 = vector.broadcast %172 : vector<1x32xf32> to vector<64x32xf32>
    %174 = arith.addf %171, %173 : vector<64x32xf32>
    %cst_70 = arith.constant 0.000000e+00 : f32
    %175 = vector.broadcast %cst_70 : f32 to vector<64x32xf32>
    %176 = arith.cmpf oge, %174, %175 : vector<64x32xf32>
    %cst_71 = arith.constant 0.00999999977 : f32
    %177 = vector.broadcast %cst_71 : f32 to vector<64x32xf32>
    %178 = arith.mulf %177, %174 : vector<64x32xf32>
    %179 = arith.select %176, %174, %178 : vector<64x32xi1>, vector<64x32xf32>
    %c136 = arith.constant 136 : index
    %c0_72 = arith.constant 0 : index
    %180 = vector.load %arg2[%c136, %c0_72] : memref<432x128xf32, #tpu.memory_space<vmem>>, vector<32x32xf32>
    %cst_73 = arith.constant dense<0.000000e+00> : vector<64x32xf32>
    %181 = tpu.matmul %179, %180, %cst_73 {dimension_numbers = #tpu.dot_dimension_numbers<[1], [0], [0], [1], [0, 0, 1, 1], [], []>} : vector<64x32xf32>, vector<32x32xf32>, vector<64x32xf32> -> vector<64x32xf32>
    %c128_74 = arith.constant 128 : index
    %c32_75 = arith.constant 32 : index
    %182 = vector.load %arg2[%c128_74, %c32_75] : memref<432x128xf32, #tpu.memory_space<vmem>>, vector<1x32xf32>
    %183 = vector.broadcast %182 : vector<1x32xf32> to vector<64x32xf32>
    %184 = arith.addf %181, %183 : vector<64x32xf32>
    %cst_76 = arith.constant dense<0.000000e+00> : vector<64xf32>
    %185 = vector.multi_reduction <add>, %184, %cst_76 [1] : vector<64x32xf32> to vector<64xf32>
    %186 = vector.shape_cast %185 : vector<64xf32> to vector<64x1xf32>
    %cst_77 = arith.constant 3.200000e+01 : f32
    %187 = vector.broadcast %cst_77 : f32 to vector<64x1xf32>
    %188 = arith.divf %186, %187 : vector<64x1xf32>
    %189 = vector.broadcast %188 : vector<64x1xf32> to vector<64x32xf32>
    %190 = arith.subf %184, %189 : vector<64x32xf32>
    %191 = arith.mulf %190, %190 : vector<64x32xf32>
    %cst_78 = arith.constant dense<0.000000e+00> : vector<64xf32>
    %192 = vector.multi_reduction <add>, %191, %cst_78 [1] : vector<64x32xf32> to vector<64xf32>
    %193 = vector.shape_cast %192 : vector<64xf32> to vector<64x1xf32>
    %cst_79 = arith.constant 3.200000e+01 : f32
    %194 = vector.broadcast %cst_79 : f32 to vector<64x1xf32>
    %195 = arith.divf %193, %194 : vector<64x1xf32>
    %196 = vector.broadcast %188 : vector<64x1xf32> to vector<64x32xf32>
    %197 = arith.subf %184, %196 : vector<64x32xf32>
    %cst_80 = arith.constant 9.99999974E-6 : f32
    %198 = vector.broadcast %cst_80 : f32 to vector<64x1xf32>
    %199 = arith.addf %195, %198 : vector<64x1xf32>
    %200 = math.rsqrt %199 : vector<64x1xf32>
    %201 = vector.broadcast %200 : vector<64x1xf32> to vector<64x32xf32>
    %202 = arith.mulf %197, %201 : vector<64x32xf32>
    %c128_81 = arith.constant 128 : index
    %c64_82 = arith.constant 64 : index
    %203 = vector.load %arg2[%c128_81, %c64_82] : memref<432x128xf32, #tpu.memory_space<vmem>>, vector<1x32xf32>
    %204 = vector.broadcast %203 : vector<1x32xf32> to vector<64x32xf32>
    %205 = arith.mulf %202, %204 : vector<64x32xf32>
    %c128_83 = arith.constant 128 : index
    %c96_84 = arith.constant 96 : index
    %206 = vector.load %arg2[%c128_83, %c96_84] : memref<432x128xf32, #tpu.memory_space<vmem>>, vector<1x32xf32>
    %207 = vector.broadcast %206 : vector<1x32xf32> to vector<64x32xf32>
    %208 = arith.addf %205, %207 : vector<64x32xf32>
    %cst_85 = arith.constant 0.000000e+00 : f32
    %209 = vector.broadcast %cst_85 : f32 to vector<64x32xf32>
    %210 = arith.cmpf oge, %208, %209 : vector<64x32xf32>
    %cst_86 = arith.constant 0.00999999977 : f32
    %211 = vector.broadcast %cst_86 : f32 to vector<64x32xf32>
    %212 = arith.mulf %211, %208 : vector<64x32xf32>
    %213 = arith.select %210, %208, %212 : vector<64x32xi1>, vector<64x32xf32>
    %c168 = arith.constant 168 : index
    %c0_87 = arith.constant 0 : index
    %214 = vector.load %arg2[%c168, %c0_87] : memref<432x128xf32, #tpu.memory_space<vmem>>, vector<32x96xf32>
    %cst_88 = arith.constant dense<0.000000e+00> : vector<64x96xf32>
    %215 = tpu.matmul %109, %214, %cst_88 {dimension_numbers = #tpu.dot_dimension_numbers<[1], [0], [0], [1], [0, 0, 1, 1], [], []>} : vector<64x32xf32>, vector<32x96xf32>, vector<64x96xf32> -> vector<64x96xf32>
    %c200 = arith.constant 200 : index
    %c0_89 = arith.constant 0 : index
    %216 = vector.load %arg2[%c200, %c0_89] : memref<432x128xf32, #tpu.memory_space<vmem>>, vector<32x96xf32>
    %cst_90 = arith.constant dense<0.000000e+00> : vector<64x96xf32>
    %217 = tpu.matmul %213, %216, %cst_90 {dimension_numbers = #tpu.dot_dimension_numbers<[1], [0], [0], [1], [0, 0, 1, 1], [], []>} : vector<64x32xf32>, vector<32x96xf32>, vector<64x96xf32> -> vector<64x96xf32>
    %218 = arith.addf %215, %217 : vector<64x96xf32>
    %c232 = arith.constant 232 : index
    %c0_91 = arith.constant 0 : index
    %219 = vector.load %arg2[%c232, %c0_91] : memref<432x128xf32, #tpu.memory_space<vmem>>, vector<1x96xf32>
    %220 = vector.broadcast %219 : vector<1x96xf32> to vector<64x96xf32>
    %221 = arith.addf %218, %220 : vector<64x96xf32>
    %c0_92 = arith.constant 0 : index
    %c0_93 = arith.constant 0 : index
    %222 = vector.load %arg4[%c0_92, %c0_93] : memref<64x96xf32, #tpu.memory_space<vmem>>, vector<64x96xf32>
    tpu.vector_store %arg4[%c0_92, %c0_93], %221 {strides = array<i32>} : memref<64x96xf32, #tpu.memory_space<vmem>>, vector<64x96xf32>,
    %c240 = arith.constant 240 : index
    %c0_94 = arith.constant 0 : index
    %223 = vector.load %arg2[%c240, %c0_94] : memref<432x128xf32, #tpu.memory_space<vmem>>, vector<32x96xf32>
    %c272 = arith.constant 272 : index
    %c0_95 = arith.constant 0 : index
    %224 = vector.load %arg2[%c272, %c0_95] : memref<432x128xf32, #tpu.memory_space<vmem>>, vector<1x96xf32>
    %cst_96 = arith.constant 0.000000e+00 : f32
    %225 = vector.broadcast %cst_96 : f32 to vector<8x32xf32>
    %c0_i32 = arith.constant 0 : i32
    %c8_i32 = arith.constant 8 : i32
    %226 = arith.muli %c0_i32, %c8_i32 : i32
    %227 = tpu.assume_multiple %226, 8 : i32
    %228 = arith.index_cast %227 : i32 to index
    %c0_97 = arith.constant 0 : index
    %229 = vector.load %arg4[%228, %c0_97] : memref<64x96xf32, #tpu.memory_space<vmem>>, vector<8x96xf32>
    %cst_98 = arith.constant dense<0.000000e+00> : vector<8x96xf32>
    %230 = tpu.matmul %225, %223, %cst_98 {dimension_numbers = #tpu.dot_dimension_numbers<[1], [0], [0], [1], [0, 0, 1, 1], [], []>} : vector<8x32xf32>, vector<32x96xf32>, vector<8x96xf32> -> vector<8x96xf32>
    %231 = vector.broadcast %224 : vector<1x96xf32> to vector<8x96xf32>
    %232 = arith.addf %230, %231 : vector<8x96xf32>
    %233 = vector.extract_strided_slice %229 {offsets = [0, 0], sizes = [8, 32], strides = [1, 1]} : vector<8x96xf32> to vector<8x32xf32>
    %234 = vector.extract_strided_slice %232 {offsets = [0, 0], sizes = [8, 32], strides = [1, 1]} : vector<8x96xf32> to vector<8x32xf32>
    %235 = arith.addf %233, %234 : vector<8x32xf32>
    %236 = arith.negf %235 : vector<8x32xf32>
    %237 = math.exp %236 : vector<8x32xf32>
    %cst_99 = arith.constant 1.000000e+00 : f32
    %238 = vector.broadcast %cst_99 : f32 to vector<8x32xf32>
    %239 = arith.addf %238, %237 : vector<8x32xf32>
    %240 = arith.divf %238, %239 : vector<8x32xf32>
    %241 = vector.extract_strided_slice %229 {offsets = [0, 32], sizes = [8, 32], strides = [1, 1]} : vector<8x96xf32> to vector<8x32xf32>
    %242 = vector.extract_strided_slice %232 {offsets = [0, 32], sizes = [8, 32], strides = [1, 1]} : vector<8x96xf32> to vector<8x32xf32>
    %243 = arith.addf %241, %242 : vector<8x32xf32>
    %244 = arith.negf %243 : vector<8x32xf32>
    %245 = math.exp %244 : vector<8x32xf32>
    %cst_100 = arith.constant 1.000000e+00 : f32
    %246 = vector.broadcast %cst_100 : f32 to vector<8x32xf32>
    %247 = arith.addf %246, %245 : vector<8x32xf32>
    %248 = arith.divf %246, %247 : vector<8x32xf32>
    %249 = vector.extract_strided_slice %229 {offsets = [0, 64], sizes = [8, 32], strides = [1, 1]} : vector<8x96xf32> to vector<8x32xf32>
    %250 = vector.extract_strided_slice %232 {offsets = [0, 64], sizes = [8, 32], strides = [1, 1]} : vector<8x96xf32> to vector<8x32xf32>
    %251 = arith.mulf %240, %250 : vector<8x32xf32>
    %252 = arith.addf %249, %251 : vector<8x32xf32>
    %253 = math.tanh %252 : vector<8x32xf32>
    %cst_101 = arith.constant 1.000000e+00 : f32
    %254 = vector.broadcast %cst_101 : f32 to vector<8x32xf32>
    %255 = arith.subf %254, %248 : vector<8x32xf32>
    %256 = arith.mulf %255, %253 : vector<8x32xf32>
    %257 = arith.mulf %248, %225 : vector<8x32xf32>
    %258 = arith.addf %256, %257 : vector<8x32xf32>
    %259 = arith.index_cast %227 : i32 to index
    %c0_102 = arith.constant 0 : index
    %260 = vector.load %arg5[%259, %c0_102] : memref<64x32xf32, #tpu.memory_space<vmem>>, vector<8x32xf32>
    tpu.vector_store %arg5[%259, %c0_102], %258 {strides = array<i32>} : memref<64x32xf32, #tpu.memory_space<vmem>>, vector<8x32xf32>,
    %c1_i32 = arith.constant 1 : i32
    %c8_i32_103 = arith.constant 8 : i32
    %261 = arith.muli %c1_i32, %c8_i32_103 : i32
    %262 = tpu.assume_multiple %261, 8 : i32
    %263 = arith.index_cast %262 : i32 to index
    %c0_104 = arith.constant 0 : index
    %264 = vector.load %arg4[%263, %c0_104] : memref<64x96xf32, #tpu.memory_space<vmem>>, vector<8x96xf32>
    %cst_105 = arith.constant dense<0.000000e+00> : vector<8x96xf32>
    %265 = tpu.matmul %258, %223, %cst_105 {dimension_numbers = #tpu.dot_dimension_numbers<[1], [0], [0], [1], [0, 0, 1, 1], [], []>} : vector<8x32xf32>, vector<32x96xf32>, vector<8x96xf32> -> vector<8x96xf32>
    %266 = vector.broadcast %224 : vector<1x96xf32> to vector<8x96xf32>
    %267 = arith.addf %265, %266 : vector<8x96xf32>
    %268 = vector.extract_strided_slice %264 {offsets = [0, 0], sizes = [8, 32], strides = [1, 1]} : vector<8x96xf32> to vector<8x32xf32>
    %269 = vector.extract_strided_slice %267 {offsets = [0, 0], sizes = [8, 32], strides = [1, 1]} : vector<8x96xf32> to vector<8x32xf32>
    %270 = arith.addf %268, %269 : vector<8x32xf32>
    %271 = arith.negf %270 : vector<8x32xf32>
    %272 = math.exp %271 : vector<8x32xf32>
    %cst_106 = arith.constant 1.000000e+00 : f32
    %273 = vector.broadcast %cst_106 : f32 to vector<8x32xf32>
    %274 = arith.addf %273, %272 : vector<8x32xf32>
    %275 = arith.divf %273, %274 : vector<8x32xf32>
    %276 = vector.extract_strided_slice %264 {offsets = [0, 32], sizes = [8, 32], strides = [1, 1]} : vector<8x96xf32> to vector<8x32xf32>
    %277 = vector.extract_strided_slice %267 {offsets = [0, 32], sizes = [8, 32], strides = [1, 1]} : vector<8x96xf32> to vector<8x32xf32>
    %278 = arith.addf %276, %277 : vector<8x32xf32>
    %279 = arith.negf %278 : vector<8x32xf32>
    %280 = math.exp %279 : vector<8x32xf32>
    %cst_107 = arith.constant 1.000000e+00 : f32
    %281 = vector.broadcast %cst_107 : f32 to vector<8x32xf32>
    %282 = arith.addf %281, %280 : vector<8x32xf32>
    %283 = arith.divf %281, %282 : vector<8x32xf32>
    %284 = vector.extract_strided_slice %264 {offsets = [0, 64], sizes = [8, 32], strides = [1, 1]} : vector<8x96xf32> to vector<8x32xf32>
    %285 = vector.extract_strided_slice %267 {offsets = [0, 64], sizes = [8, 32], strides = [1, 1]} : vector<8x96xf32> to vector<8x32xf32>
    %286 = arith.mulf %275, %285 : vector<8x32xf32>
    %287 = arith.addf %284, %286 : vector<8x32xf32>
    %288 = math.tanh %287 : vector<8x32xf32>
    %cst_108 = arith.constant 1.000000e+00 : f32
    %289 = vector.broadcast %cst_108 : f32 to vector<8x32xf32>
    %290 = arith.subf %289, %283 : vector<8x32xf32>
    %291 = arith.mulf %290, %288 : vector<8x32xf32>
    %292 = arith.mulf %283, %258 : vector<8x32xf32>
    %293 = arith.addf %291, %292 : vector<8x32xf32>
    %294 = arith.index_cast %262 : i32 to index
    %c0_109 = arith.constant 0 : index
    %295 = vector.load %arg5[%294, %c0_109] : memref<64x32xf32, #tpu.memory_space<vmem>>, vector<8x32xf32>
    tpu.vector_store %arg5[%294, %c0_109], %293 {strides = array<i32>} : memref<64x32xf32, #tpu.memory_space<vmem>>, vector<8x32xf32>,
    %c2_i32 = arith.constant 2 : i32
    %c8_i32_110 = arith.constant 8 : i32
    %296 = arith.muli %c2_i32, %c8_i32_110 : i32
    %297 = tpu.assume_multiple %296, 8 : i32
    %298 = arith.index_cast %297 : i32 to index
    %c0_111 = arith.constant 0 : index
    %299 = vector.load %arg4[%298, %c0_111] : memref<64x96xf32, #tpu.memory_space<vmem>>, vector<8x96xf32>
    %cst_112 = arith.constant dense<0.000000e+00> : vector<8x96xf32>
    %300 = tpu.matmul %293, %223, %cst_112 {dimension_numbers = #tpu.dot_dimension_numbers<[1], [0], [0], [1], [0, 0, 1, 1], [], []>} : vector<8x32xf32>, vector<32x96xf32>, vector<8x96xf32> -> vector<8x96xf32>
    %301 = vector.broadcast %224 : vector<1x96xf32> to vector<8x96xf32>
    %302 = arith.addf %300, %301 : vector<8x96xf32>
    %303 = vector.extract_strided_slice %299 {offsets = [0, 0], sizes = [8, 32], strides = [1, 1]} : vector<8x96xf32> to vector<8x32xf32>
    %304 = vector.extract_strided_slice %302 {offsets = [0, 0], sizes = [8, 32], strides = [1, 1]} : vector<8x96xf32> to vector<8x32xf32>
    %305 = arith.addf %303, %304 : vector<8x32xf32>
    %306 = arith.negf %305 : vector<8x32xf32>
    %307 = math.exp %306 : vector<8x32xf32>
    %cst_113 = arith.constant 1.000000e+00 : f32
    %308 = vector.broadcast %cst_113 : f32 to vector<8x32xf32>
    %309 = arith.addf %308, %307 : vector<8x32xf32>
    %310 = arith.divf %308, %309 : vector<8x32xf32>
    %311 = vector.extract_strided_slice %299 {offsets = [0, 32], sizes = [8, 32], strides = [1, 1]} : vector<8x96xf32> to vector<8x32xf32>
    %312 = vector.extract_strided_slice %302 {offsets = [0, 32], sizes = [8, 32], strides = [1, 1]} : vector<8x96xf32> to vector<8x32xf32>
    %313 = arith.addf %311, %312 : vector<8x32xf32>
    %314 = arith.negf %313 : vector<8x32xf32>
    %315 = math.exp %314 : vector<8x32xf32>
    %cst_114 = arith.constant 1.000000e+00 : f32
    %316 = vector.broadcast %cst_114 : f32 to vector<8x32xf32>
    %317 = arith.addf %316, %315 : vector<8x32xf32>
    %318 = arith.divf %316, %317 : vector<8x32xf32>
    %319 = vector.extract_strided_slice %299 {offsets = [0, 64], sizes = [8, 32], strides = [1, 1]} : vector<8x96xf32> to vector<8x32xf32>
    %320 = vector.extract_strided_slice %302 {offsets = [0, 64], sizes = [8, 32], strides = [1, 1]} : vector<8x96xf32> to vector<8x32xf32>
    %321 = arith.mulf %310, %320 : vector<8x32xf32>
    %322 = arith.addf %319, %321 : vector<8x32xf32>
    %323 = math.tanh %322 : vector<8x32xf32>
    %cst_115 = arith.constant 1.000000e+00 : f32
    %324 = vector.broadcast %cst_115 : f32 to vector<8x32xf32>
    %325 = arith.subf %324, %318 : vector<8x32xf32>
    %326 = arith.mulf %325, %323 : vector<8x32xf32>
    %327 = arith.mulf %318, %293 : vector<8x32xf32>
    %328 = arith.addf %326, %327 : vector<8x32xf32>
    %329 = arith.index_cast %297 : i32 to index
    %c0_116 = arith.constant 0 : index
    %330 = vector.load %arg5[%329, %c0_116] : memref<64x32xf32, #tpu.memory_space<vmem>>, vector<8x32xf32>
    tpu.vector_store %arg5[%329, %c0_116], %328 {strides = array<i32>} : memref<64x32xf32, #tpu.memory_space<vmem>>, vector<8x32xf32>,
    %c3_i32 = arith.constant 3 : i32
    %c8_i32_117 = arith.constant 8 : i32
    %331 = arith.muli %c3_i32, %c8_i32_117 : i32
    %332 = tpu.assume_multiple %331, 8 : i32
    %333 = arith.index_cast %332 : i32 to index
    %c0_118 = arith.constant 0 : index
    %334 = vector.load %arg4[%333, %c0_118] : memref<64x96xf32, #tpu.memory_space<vmem>>, vector<8x96xf32>
    %cst_119 = arith.constant dense<0.000000e+00> : vector<8x96xf32>
    %335 = tpu.matmul %328, %223, %cst_119 {dimension_numbers = #tpu.dot_dimension_numbers<[1], [0], [0], [1], [0, 0, 1, 1], [], []>} : vector<8x32xf32>, vector<32x96xf32>, vector<8x96xf32> -> vector<8x96xf32>
    %336 = vector.broadcast %224 : vector<1x96xf32> to vector<8x96xf32>
    %337 = arith.addf %335, %336 : vector<8x96xf32>
    %338 = vector.extract_strided_slice %334 {offsets = [0, 0], sizes = [8, 32], strides = [1, 1]} : vector<8x96xf32> to vector<8x32xf32>
    %339 = vector.extract_strided_slice %337 {offsets = [0, 0], sizes = [8, 32], strides = [1, 1]} : vector<8x96xf32> to vector<8x32xf32>
    %340 = arith.addf %338, %339 : vector<8x32xf32>
    %341 = arith.negf %340 : vector<8x32xf32>
    %342 = math.exp %341 : vector<8x32xf32>
    %cst_120 = arith.constant 1.000000e+00 : f32
    %343 = vector.broadcast %cst_120 : f32 to vector<8x32xf32>
    %344 = arith.addf %343, %342 : vector<8x32xf32>
    %345 = arith.divf %343, %344 : vector<8x32xf32>
    %346 = vector.extract_strided_slice %334 {offsets = [0, 32], sizes = [8, 32], strides = [1, 1]} : vector<8x96xf32> to vector<8x32xf32>
    %347 = vector.extract_strided_slice %337 {offsets = [0, 32], sizes = [8, 32], strides = [1, 1]} : vector<8x96xf32> to vector<8x32xf32>
    %348 = arith.addf %346, %347 : vector<8x32xf32>
    %349 = arith.negf %348 : vector<8x32xf32>
    %350 = math.exp %349 : vector<8x32xf32>
    %cst_121 = arith.constant 1.000000e+00 : f32
    %351 = vector.broadcast %cst_121 : f32 to vector<8x32xf32>
    %352 = arith.addf %351, %350 : vector<8x32xf32>
    %353 = arith.divf %351, %352 : vector<8x32xf32>
    %354 = vector.extract_strided_slice %334 {offsets = [0, 64], sizes = [8, 32], strides = [1, 1]} : vector<8x96xf32> to vector<8x32xf32>
    %355 = vector.extract_strided_slice %337 {offsets = [0, 64], sizes = [8, 32], strides = [1, 1]} : vector<8x96xf32> to vector<8x32xf32>
    %356 = arith.mulf %345, %355 : vector<8x32xf32>
    %357 = arith.addf %354, %356 : vector<8x32xf32>
    %358 = math.tanh %357 : vector<8x32xf32>
    %cst_122 = arith.constant 1.000000e+00 : f32
    %359 = vector.broadcast %cst_122 : f32 to vector<8x32xf32>
    %360 = arith.subf %359, %353 : vector<8x32xf32>
    %361 = arith.mulf %360, %358 : vector<8x32xf32>
    %362 = arith.mulf %353, %328 : vector<8x32xf32>
    %363 = arith.addf %361, %362 : vector<8x32xf32>
    %364 = arith.index_cast %332 : i32 to index
    %c0_123 = arith.constant 0 : index
    %365 = vector.load %arg5[%364, %c0_123] : memref<64x32xf32, #tpu.memory_space<vmem>>, vector<8x32xf32>
    tpu.vector_store %arg5[%364, %c0_123], %363 {strides = array<i32>} : memref<64x32xf32, #tpu.memory_space<vmem>>, vector<8x32xf32>,
    %c4_i32 = arith.constant 4 : i32
    %c8_i32_124 = arith.constant 8 : i32
    %366 = arith.muli %c4_i32, %c8_i32_124 : i32
    %367 = tpu.assume_multiple %366, 8 : i32
    %368 = arith.index_cast %367 : i32 to index
    %c0_125 = arith.constant 0 : index
    %369 = vector.load %arg4[%368, %c0_125] : memref<64x96xf32, #tpu.memory_space<vmem>>, vector<8x96xf32>
    %cst_126 = arith.constant dense<0.000000e+00> : vector<8x96xf32>
    %370 = tpu.matmul %363, %223, %cst_126 {dimension_numbers = #tpu.dot_dimension_numbers<[1], [0], [0], [1], [0, 0, 1, 1], [], []>} : vector<8x32xf32>, vector<32x96xf32>, vector<8x96xf32> -> vector<8x96xf32>
    %371 = vector.broadcast %224 : vector<1x96xf32> to vector<8x96xf32>
    %372 = arith.addf %370, %371 : vector<8x96xf32>
    %373 = vector.extract_strided_slice %369 {offsets = [0, 0], sizes = [8, 32], strides = [1, 1]} : vector<8x96xf32> to vector<8x32xf32>
    %374 = vector.extract_strided_slice %372 {offsets = [0, 0], sizes = [8, 32], strides = [1, 1]} : vector<8x96xf32> to vector<8x32xf32>
    %375 = arith.addf %373, %374 : vector<8x32xf32>
    %376 = arith.negf %375 : vector<8x32xf32>
    %377 = math.exp %376 : vector<8x32xf32>
    %cst_127 = arith.constant 1.000000e+00 : f32
    %378 = vector.broadcast %cst_127 : f32 to vector<8x32xf32>
    %379 = arith.addf %378, %377 : vector<8x32xf32>
    %380 = arith.divf %378, %379 : vector<8x32xf32>
    %381 = vector.extract_strided_slice %369 {offsets = [0, 32], sizes = [8, 32], strides = [1, 1]} : vector<8x96xf32> to vector<8x32xf32>
    %382 = vector.extract_strided_slice %372 {offsets = [0, 32], sizes = [8, 32], strides = [1, 1]} : vector<8x96xf32> to vector<8x32xf32>
    %383 = arith.addf %381, %382 : vector<8x32xf32>
    %384 = arith.negf %383 : vector<8x32xf32>
    %385 = math.exp %384 : vector<8x32xf32>
    %cst_128 = arith.constant 1.000000e+00 : f32
    %386 = vector.broadcast %cst_128 : f32 to vector<8x32xf32>
    %387 = arith.addf %386, %385 : vector<8x32xf32>
    %388 = arith.divf %386, %387 : vector<8x32xf32>
    %389 = vector.extract_strided_slice %369 {offsets = [0, 64], sizes = [8, 32], strides = [1, 1]} : vector<8x96xf32> to vector<8x32xf32>
    %390 = vector.extract_strided_slice %372 {offsets = [0, 64], sizes = [8, 32], strides = [1, 1]} : vector<8x96xf32> to vector<8x32xf32>
    %391 = arith.mulf %380, %390 : vector<8x32xf32>
    %392 = arith.addf %389, %391 : vector<8x32xf32>
    %393 = math.tanh %392 : vector<8x32xf32>
    %cst_129 = arith.constant 1.000000e+00 : f32
    %394 = vector.broadcast %cst_129 : f32 to vector<8x32xf32>
    %395 = arith.subf %394, %388 : vector<8x32xf32>
    %396 = arith.mulf %395, %393 : vector<8x32xf32>
    %397 = arith.mulf %388, %363 : vector<8x32xf32>
    %398 = arith.addf %396, %397 : vector<8x32xf32>
    %399 = arith.index_cast %367 : i32 to index
    %c0_130 = arith.constant 0 : index
    %400 = vector.load %arg5[%399, %c0_130] : memref<64x32xf32, #tpu.memory_space<vmem>>, vector<8x32xf32>
    tpu.vector_store %arg5[%399, %c0_130], %398 {strides = array<i32>} : memref<64x32xf32, #tpu.memory_space<vmem>>, vector<8x32xf32>,
    %c5_i32 = arith.constant 5 : i32
    %c8_i32_131 = arith.constant 8 : i32
    %401 = arith.muli %c5_i32, %c8_i32_131 : i32
    %402 = tpu.assume_multiple %401, 8 : i32
    %403 = arith.index_cast %402 : i32 to index
    %c0_132 = arith.constant 0 : index
    %404 = vector.load %arg4[%403, %c0_132] : memref<64x96xf32, #tpu.memory_space<vmem>>, vector<8x96xf32>
    %cst_133 = arith.constant dense<0.000000e+00> : vector<8x96xf32>
    %405 = tpu.matmul %398, %223, %cst_133 {dimension_numbers = #tpu.dot_dimension_numbers<[1], [0], [0], [1], [0, 0, 1, 1], [], []>} : vector<8x32xf32>, vector<32x96xf32>, vector<8x96xf32> -> vector<8x96xf32>
    %406 = vector.broadcast %224 : vector<1x96xf32> to vector<8x96xf32>
    %407 = arith.addf %405, %406 : vector<8x96xf32>
    %408 = vector.extract_strided_slice %404 {offsets = [0, 0], sizes = [8, 32], strides = [1, 1]} : vector<8x96xf32> to vector<8x32xf32>
    %409 = vector.extract_strided_slice %407 {offsets = [0, 0], sizes = [8, 32], strides = [1, 1]} : vector<8x96xf32> to vector<8x32xf32>
    %410 = arith.addf %408, %409 : vector<8x32xf32>
    %411 = arith.negf %410 : vector<8x32xf32>
    %412 = math.exp %411 : vector<8x32xf32>
    %cst_134 = arith.constant 1.000000e+00 : f32
    %413 = vector.broadcast %cst_134 : f32 to vector<8x32xf32>
    %414 = arith.addf %413, %412 : vector<8x32xf32>
    %415 = arith.divf %413, %414 : vector<8x32xf32>
    %416 = vector.extract_strided_slice %404 {offsets = [0, 32], sizes = [8, 32], strides = [1, 1]} : vector<8x96xf32> to vector<8x32xf32>
    %417 = vector.extract_strided_slice %407 {offsets = [0, 32], sizes = [8, 32], strides = [1, 1]} : vector<8x96xf32> to vector<8x32xf32>
    %418 = arith.addf %416, %417 : vector<8x32xf32>
    %419 = arith.negf %418 : vector<8x32xf32>
    %420 = math.exp %419 : vector<8x32xf32>
    %cst_135 = arith.constant 1.000000e+00 : f32
    %421 = vector.broadcast %cst_135 : f32 to vector<8x32xf32>
    %422 = arith.addf %421, %420 : vector<8x32xf32>
    %423 = arith.divf %421, %422 : vector<8x32xf32>
    %424 = vector.extract_strided_slice %404 {offsets = [0, 64], sizes = [8, 32], strides = [1, 1]} : vector<8x96xf32> to vector<8x32xf32>
    %425 = vector.extract_strided_slice %407 {offsets = [0, 64], sizes = [8, 32], strides = [1, 1]} : vector<8x96xf32> to vector<8x32xf32>
    %426 = arith.mulf %415, %425 : vector<8x32xf32>
    %427 = arith.addf %424, %426 : vector<8x32xf32>
    %428 = math.tanh %427 : vector<8x32xf32>
    %cst_136 = arith.constant 1.000000e+00 : f32
    %429 = vector.broadcast %cst_136 : f32 to vector<8x32xf32>
    %430 = arith.subf %429, %423 : vector<8x32xf32>
    %431 = arith.mulf %430, %428 : vector<8x32xf32>
    %432 = arith.mulf %423, %398 : vector<8x32xf32>
    %433 = arith.addf %431, %432 : vector<8x32xf32>
    %434 = arith.index_cast %402 : i32 to index
    %c0_137 = arith.constant 0 : index
    %435 = vector.load %arg5[%434, %c0_137] : memref<64x32xf32, #tpu.memory_space<vmem>>, vector<8x32xf32>
    tpu.vector_store %arg5[%434, %c0_137], %433 {strides = array<i32>} : memref<64x32xf32, #tpu.memory_space<vmem>>, vector<8x32xf32>,
    %c6_i32 = arith.constant 6 : i32
    %c8_i32_138 = arith.constant 8 : i32
    %436 = arith.muli %c6_i32, %c8_i32_138 : i32
    %437 = tpu.assume_multiple %436, 8 : i32
    %438 = arith.index_cast %437 : i32 to index
    %c0_139 = arith.constant 0 : index
    %439 = vector.load %arg4[%438, %c0_139] : memref<64x96xf32, #tpu.memory_space<vmem>>, vector<8x96xf32>
    %cst_140 = arith.constant dense<0.000000e+00> : vector<8x96xf32>
    %440 = tpu.matmul %433, %223, %cst_140 {dimension_numbers = #tpu.dot_dimension_numbers<[1], [0], [0], [1], [0, 0, 1, 1], [], []>} : vector<8x32xf32>, vector<32x96xf32>, vector<8x96xf32> -> vector<8x96xf32>
    %441 = vector.broadcast %224 : vector<1x96xf32> to vector<8x96xf32>
    %442 = arith.addf %440, %441 : vector<8x96xf32>
    %443 = vector.extract_strided_slice %439 {offsets = [0, 0], sizes = [8, 32], strides = [1, 1]} : vector<8x96xf32> to vector<8x32xf32>
    %444 = vector.extract_strided_slice %442 {offsets = [0, 0], sizes = [8, 32], strides = [1, 1]} : vector<8x96xf32> to vector<8x32xf32>
    %445 = arith.addf %443, %444 : vector<8x32xf32>
    %446 = arith.negf %445 : vector<8x32xf32>
    %447 = math.exp %446 : vector<8x32xf32>
    %cst_141 = arith.constant 1.000000e+00 : f32
    %448 = vector.broadcast %cst_141 : f32 to vector<8x32xf32>
    %449 = arith.addf %448, %447 : vector<8x32xf32>
    %450 = arith.divf %448, %449 : vector<8x32xf32>
    %451 = vector.extract_strided_slice %439 {offsets = [0, 32], sizes = [8, 32], strides = [1, 1]} : vector<8x96xf32> to vector<8x32xf32>
    %452 = vector.extract_strided_slice %442 {offsets = [0, 32], sizes = [8, 32], strides = [1, 1]} : vector<8x96xf32> to vector<8x32xf32>
    %453 = arith.addf %451, %452 : vector<8x32xf32>
    %454 = arith.negf %453 : vector<8x32xf32>
    %455 = math.exp %454 : vector<8x32xf32>
    %cst_142 = arith.constant 1.000000e+00 : f32
    %456 = vector.broadcast %cst_142 : f32 to vector<8x32xf32>
    %457 = arith.addf %456, %455 : vector<8x32xf32>
    %458 = arith.divf %456, %457 : vector<8x32xf32>
    %459 = vector.extract_strided_slice %439 {offsets = [0, 64], sizes = [8, 32], strides = [1, 1]} : vector<8x96xf32> to vector<8x32xf32>
    %460 = vector.extract_strided_slice %442 {offsets = [0, 64], sizes = [8, 32], strides = [1, 1]} : vector<8x96xf32> to vector<8x32xf32>
    %461 = arith.mulf %450, %460 : vector<8x32xf32>
    %462 = arith.addf %459, %461 : vector<8x32xf32>
    %463 = math.tanh %462 : vector<8x32xf32>
    %cst_143 = arith.constant 1.000000e+00 : f32
    %464 = vector.broadcast %cst_143 : f32 to vector<8x32xf32>
    %465 = arith.subf %464, %458 : vector<8x32xf32>
    %466 = arith.mulf %465, %463 : vector<8x32xf32>
    %467 = arith.mulf %458, %433 : vector<8x32xf32>
    %468 = arith.addf %466, %467 : vector<8x32xf32>
    %469 = arith.index_cast %437 : i32 to index
    %c0_144 = arith.constant 0 : index
    %470 = vector.load %arg5[%469, %c0_144] : memref<64x32xf32, #tpu.memory_space<vmem>>, vector<8x32xf32>
    tpu.vector_store %arg5[%469, %c0_144], %468 {strides = array<i32>} : memref<64x32xf32, #tpu.memory_space<vmem>>, vector<8x32xf32>,
    %c7_i32 = arith.constant 7 : i32
    %c8_i32_145 = arith.constant 8 : i32
    %471 = arith.muli %c7_i32, %c8_i32_145 : i32
    %472 = tpu.assume_multiple %471, 8 : i32
    %473 = arith.index_cast %472 : i32 to index
    %c0_146 = arith.constant 0 : index
    %474 = vector.load %arg4[%473, %c0_146] : memref<64x96xf32, #tpu.memory_space<vmem>>, vector<8x96xf32>
    %cst_147 = arith.constant dense<0.000000e+00> : vector<8x96xf32>
    %475 = tpu.matmul %468, %223, %cst_147 {dimension_numbers = #tpu.dot_dimension_numbers<[1], [0], [0], [1], [0, 0, 1, 1], [], []>} : vector<8x32xf32>, vector<32x96xf32>, vector<8x96xf32> -> vector<8x96xf32>
    %476 = vector.broadcast %224 : vector<1x96xf32> to vector<8x96xf32>
    %477 = arith.addf %475, %476 : vector<8x96xf32>
    %478 = vector.extract_strided_slice %474 {offsets = [0, 0], sizes = [8, 32], strides = [1, 1]} : vector<8x96xf32> to vector<8x32xf32>
    %479 = vector.extract_strided_slice %477 {offsets = [0, 0], sizes = [8, 32], strides = [1, 1]} : vector<8x96xf32> to vector<8x32xf32>
    %480 = arith.addf %478, %479 : vector<8x32xf32>
    %481 = arith.negf %480 : vector<8x32xf32>
    %482 = math.exp %481 : vector<8x32xf32>
    %cst_148 = arith.constant 1.000000e+00 : f32
    %483 = vector.broadcast %cst_148 : f32 to vector<8x32xf32>
    %484 = arith.addf %483, %482 : vector<8x32xf32>
    %485 = arith.divf %483, %484 : vector<8x32xf32>
    %486 = vector.extract_strided_slice %474 {offsets = [0, 32], sizes = [8, 32], strides = [1, 1]} : vector<8x96xf32> to vector<8x32xf32>
    %487 = vector.extract_strided_slice %477 {offsets = [0, 32], sizes = [8, 32], strides = [1, 1]} : vector<8x96xf32> to vector<8x32xf32>
    %488 = arith.addf %486, %487 : vector<8x32xf32>
    %489 = arith.negf %488 : vector<8x32xf32>
    %490 = math.exp %489 : vector<8x32xf32>
    %cst_149 = arith.constant 1.000000e+00 : f32
    %491 = vector.broadcast %cst_149 : f32 to vector<8x32xf32>
    %492 = arith.addf %491, %490 : vector<8x32xf32>
    %493 = arith.divf %491, %492 : vector<8x32xf32>
    %494 = vector.extract_strided_slice %474 {offsets = [0, 64], sizes = [8, 32], strides = [1, 1]} : vector<8x96xf32> to vector<8x32xf32>
    %495 = vector.extract_strided_slice %477 {offsets = [0, 64], sizes = [8, 32], strides = [1, 1]} : vector<8x96xf32> to vector<8x32xf32>
    %496 = arith.mulf %485, %495 : vector<8x32xf32>
    %497 = arith.addf %494, %496 : vector<8x32xf32>
    %498 = math.tanh %497 : vector<8x32xf32>
    %cst_150 = arith.constant 1.000000e+00 : f32
    %499 = vector.broadcast %cst_150 : f32 to vector<8x32xf32>
    %500 = arith.subf %499, %493 : vector<8x32xf32>
    %501 = arith.mulf %500, %498 : vector<8x32xf32>
    %502 = arith.mulf %493, %468 : vector<8x32xf32>
    %503 = arith.addf %501, %502 : vector<8x32xf32>
    %504 = arith.index_cast %472 : i32 to index
    %c0_151 = arith.constant 0 : index
    %505 = vector.load %arg5[%504, %c0_151] : memref<64x32xf32, #tpu.memory_space<vmem>>, vector<8x32xf32>
    tpu.vector_store %arg5[%504, %c0_151], %503 {strides = array<i32>} : memref<64x32xf32, #tpu.memory_space<vmem>>, vector<8x32xf32>,
    %c8_i32_152 = arith.constant 8 : i32
    %c0_153 = arith.constant 0 : index
    %c0_154 = arith.constant 0 : index
    %506 = vector.load %arg5[%c0_153, %c0_154] : memref<64x32xf32, #tpu.memory_space<vmem>>, vector<64x32xf32>
    %c280 = arith.constant 280 : index
    %c0_155 = arith.constant 0 : index
    %507 = vector.load %arg2[%c280, %c0_155] : memref<432x128xf32, #tpu.memory_space<vmem>>, vector<32x32xf32>
    %cst_156 = arith.constant dense<0.000000e+00> : vector<64x32xf32>
    %508 = tpu.matmul %506, %507, %cst_156 {dimension_numbers = #tpu.dot_dimension_numbers<[1], [0], [0], [1], [0, 0, 1, 1], [], []>} : vector<64x32xf32>, vector<32x32xf32>, vector<64x32xf32> -> vector<64x32xf32>
    %c232_157 = arith.constant 232 : index
    %c96_158 = arith.constant 96 : index
    %509 = vector.load %arg2[%c232_157, %c96_158] : memref<432x128xf32, #tpu.memory_space<vmem>>, vector<1x32xf32>
    %510 = vector.broadcast %0 : vector<64x1xf32> to vector<64x32xf32>
    %511 = vector.broadcast %509 : vector<1x32xf32> to vector<64x32xf32>
    %512 = arith.mulf %510, %511 : vector<64x32xf32>
    %513 = arith.addf %508, %512 : vector<64x32xf32>
    %c272_159 = arith.constant 272 : index
    %c96_160 = arith.constant 96 : index
    %514 = vector.load %arg2[%c272_159, %c96_160] : memref<432x128xf32, #tpu.memory_space<vmem>>, vector<1x32xf32>
    %515 = vector.broadcast %5 : vector<64x1xf32> to vector<64x32xf32>
    %516 = vector.broadcast %514 : vector<1x32xf32> to vector<64x32xf32>
    %517 = arith.mulf %515, %516 : vector<64x32xf32>
    %518 = arith.addf %513, %517 : vector<64x32xf32>
    %c312 = arith.constant 312 : index
    %c0_161 = arith.constant 0 : index
    %519 = vector.load %arg2[%c312, %c0_161] : memref<432x128xf32, #tpu.memory_space<vmem>>, vector<1x32xf32>
    %520 = vector.broadcast %519 : vector<1x32xf32> to vector<64x32xf32>
    %521 = arith.addf %518, %520 : vector<64x32xf32>
    %cst_162 = arith.constant dense<0.000000e+00> : vector<64xf32>
    %522 = vector.multi_reduction <add>, %521, %cst_162 [1] : vector<64x32xf32> to vector<64xf32>
    %523 = vector.shape_cast %522 : vector<64xf32> to vector<64x1xf32>
    %cst_163 = arith.constant 3.200000e+01 : f32
    %524 = vector.broadcast %cst_163 : f32 to vector<64x1xf32>
    %525 = arith.divf %523, %524 : vector<64x1xf32>
    %526 = vector.broadcast %525 : vector<64x1xf32> to vector<64x32xf32>
    %527 = arith.subf %521, %526 : vector<64x32xf32>
    %528 = arith.mulf %527, %527 : vector<64x32xf32>
    %cst_164 = arith.constant dense<0.000000e+00> : vector<64xf32>
    %529 = vector.multi_reduction <add>, %528, %cst_164 [1] : vector<64x32xf32> to vector<64xf32>
    %530 = vector.shape_cast %529 : vector<64xf32> to vector<64x1xf32>
    %cst_165 = arith.constant 3.200000e+01 : f32
    %531 = vector.broadcast %cst_165 : f32 to vector<64x1xf32>
    %532 = arith.divf %530, %531 : vector<64x1xf32>
    %533 = vector.broadcast %525 : vector<64x1xf32> to vector<64x32xf32>
    %534 = arith.subf %521, %533 : vector<64x32xf32>
    %cst_166 = arith.constant 9.99999974E-6 : f32
    %535 = vector.broadcast %cst_166 : f32 to vector<64x1xf32>
    %536 = arith.addf %532, %535 : vector<64x1xf32>
    %537 = math.rsqrt %536 : vector<64x1xf32>
    %538 = vector.broadcast %537 : vector<64x1xf32> to vector<64x32xf32>
    %539 = arith.mulf %534, %538 : vector<64x32xf32>
    %c312_167 = arith.constant 312 : index
    %c32_168 = arith.constant 32 : index
    %540 = vector.load %arg2[%c312_167, %c32_168] : memref<432x128xf32, #tpu.memory_space<vmem>>, vector<1x32xf32>
    %541 = vector.broadcast %540 : vector<1x32xf32> to vector<64x32xf32>
    %542 = arith.mulf %539, %541 : vector<64x32xf32>
    %c312_169 = arith.constant 312 : index
    %c64_170 = arith.constant 64 : index
    %543 = vector.load %arg2[%c312_169, %c64_170] : memref<432x128xf32, #tpu.memory_space<vmem>>, vector<1x32xf32>
    %544 = vector.broadcast %543 : vector<1x32xf32> to vector<64x32xf32>
    %545 = arith.addf %542, %544 : vector<64x32xf32>
    %cst_171 = arith.constant 0.000000e+00 : f32
    %546 = vector.broadcast %cst_171 : f32 to vector<64x32xf32>
    %547 = arith.cmpf oge, %545, %546 : vector<64x32xf32>
    %cst_172 = arith.constant 0.00999999977 : f32
    %548 = vector.broadcast %cst_172 : f32 to vector<64x32xf32>
    %549 = arith.mulf %548, %545 : vector<64x32xf32>
    %550 = arith.select %547, %545, %549 : vector<64x32xi1>, vector<64x32xf32>
    %c320 = arith.constant 320 : index
    %c0_173 = arith.constant 0 : index
    %551 = vector.load %arg2[%c320, %c0_173] : memref<432x128xf32, #tpu.memory_space<vmem>>, vector<32x32xf32>
    %cst_174 = arith.constant dense<0.000000e+00> : vector<64x32xf32>
    %552 = tpu.matmul %550, %551, %cst_174 {dimension_numbers = #tpu.dot_dimension_numbers<[1], [0], [0], [1], [0, 0, 1, 1], [], []>} : vector<64x32xf32>, vector<32x32xf32>, vector<64x32xf32> -> vector<64x32xf32>
    %c312_175 = arith.constant 312 : index
    %c96_176 = arith.constant 96 : index
    %553 = vector.load %arg2[%c312_175, %c96_176] : memref<432x128xf32, #tpu.memory_space<vmem>>, vector<1x32xf32>
    %554 = vector.broadcast %553 : vector<1x32xf32> to vector<64x32xf32>
    %555 = arith.addf %552, %554 : vector<64x32xf32>
    %cst_177 = arith.constant dense<0.000000e+00> : vector<64xf32>
    %556 = vector.multi_reduction <add>, %555, %cst_177 [1] : vector<64x32xf32> to vector<64xf32>
    %557 = vector.shape_cast %556 : vector<64xf32> to vector<64x1xf32>
    %cst_178 = arith.constant 3.200000e+01 : f32
    %558 = vector.broadcast %cst_178 : f32 to vector<64x1xf32>
    %559 = arith.divf %557, %558 : vector<64x1xf32>
    %560 = vector.broadcast %559 : vector<64x1xf32> to vector<64x32xf32>
    %561 = arith.subf %555, %560 : vector<64x32xf32>
    %562 = arith.mulf %561, %561 : vector<64x32xf32>
    %cst_179 = arith.constant dense<0.000000e+00> : vector<64xf32>
    %563 = vector.multi_reduction <add>, %562, %cst_179 [1] : vector<64x32xf32> to vector<64xf32>
    %564 = vector.shape_cast %563 : vector<64xf32> to vector<64x1xf32>
    %cst_180 = arith.constant 3.200000e+01 : f32
    %565 = vector.broadcast %cst_180 : f32 to vector<64x1xf32>
    %566 = arith.divf %564, %565 : vector<64x1xf32>
    %567 = vector.broadcast %559 : vector<64x1xf32> to vector<64x32xf32>
    %568 = arith.subf %555, %567 : vector<64x32xf32>
    %cst_181 = arith.constant 9.99999974E-6 : f32
    %569 = vector.broadcast %cst_181 : f32 to vector<64x1xf32>
    %570 = arith.addf %566, %569 : vector<64x1xf32>
    %571 = math.rsqrt %570 : vector<64x1xf32>
    %572 = vector.broadcast %571 : vector<64x1xf32> to vector<64x32xf32>
    %573 = arith.mulf %568, %572 : vector<64x32xf32>
    %c352 = arith.constant 352 : index
    %c0_182 = arith.constant 0 : index
    %574 = vector.load %arg2[%c352, %c0_182] : memref<432x128xf32, #tpu.memory_space<vmem>>, vector<1x32xf32>
    %575 = vector.broadcast %574 : vector<1x32xf32> to vector<64x32xf32>
    %576 = arith.mulf %573, %575 : vector<64x32xf32>
    %c352_183 = arith.constant 352 : index
    %c32_184 = arith.constant 32 : index
    %577 = vector.load %arg2[%c352_183, %c32_184] : memref<432x128xf32, #tpu.memory_space<vmem>>, vector<1x32xf32>
    %578 = vector.broadcast %577 : vector<1x32xf32> to vector<64x32xf32>
    %579 = arith.addf %576, %578 : vector<64x32xf32>
    %cst_185 = arith.constant 0.000000e+00 : f32
    %580 = vector.broadcast %cst_185 : f32 to vector<64x32xf32>
    %581 = arith.cmpf oge, %579, %580 : vector<64x32xf32>
    %cst_186 = arith.constant 0.00999999977 : f32
    %582 = vector.broadcast %cst_186 : f32 to vector<64x32xf32>
    %583 = arith.mulf %582, %579 : vector<64x32xf32>
    %584 = arith.select %581, %579, %583 : vector<64x32xi1>, vector<64x32xf32>
    %c360 = arith.constant 360 : index
    %c0_187 = arith.constant 0 : index
    %585 = vector.load %arg2[%c360, %c0_187] : memref<432x128xf32, #tpu.memory_space<vmem>>, vector<32x32xf32>
    %cst_188 = arith.constant dense<0.000000e+00> : vector<64x32xf32>
    %586 = tpu.matmul %584, %585, %cst_188 {dimension_numbers = #tpu.dot_dimension_numbers<[1], [0], [0], [1], [0, 0, 1, 1], [], []>} : vector<64x32xf32>, vector<32x32xf32>, vector<64x32xf32> -> vector<64x32xf32>
    %c352_189 = arith.constant 352 : index
    %c64_190 = arith.constant 64 : index
    %587 = vector.load %arg2[%c352_189, %c64_190] : memref<432x128xf32, #tpu.memory_space<vmem>>, vector<1x32xf32>
    %588 = vector.broadcast %587 : vector<1x32xf32> to vector<64x32xf32>
    %589 = arith.addf %586, %588 : vector<64x32xf32>
    %cst_191 = arith.constant dense<0.000000e+00> : vector<64xf32>
    %590 = vector.multi_reduction <add>, %589, %cst_191 [1] : vector<64x32xf32> to vector<64xf32>
    %591 = vector.shape_cast %590 : vector<64xf32> to vector<64x1xf32>
    %cst_192 = arith.constant 3.200000e+01 : f32
    %592 = vector.broadcast %cst_192 : f32 to vector<64x1xf32>
    %593 = arith.divf %591, %592 : vector<64x1xf32>
    %594 = vector.broadcast %593 : vector<64x1xf32> to vector<64x32xf32>
    %595 = arith.subf %589, %594 : vector<64x32xf32>
    %596 = arith.mulf %595, %595 : vector<64x32xf32>
    %cst_193 = arith.constant dense<0.000000e+00> : vector<64xf32>
    %597 = vector.multi_reduction <add>, %596, %cst_193 [1] : vector<64x32xf32> to vector<64xf32>
    %598 = vector.shape_cast %597 : vector<64xf32> to vector<64x1xf32>
    %cst_194 = arith.constant 3.200000e+01 : f32
    %599 = vector.broadcast %cst_194 : f32 to vector<64x1xf32>
    %600 = arith.divf %598, %599 : vector<64x1xf32>
    %601 = vector.broadcast %593 : vector<64x1xf32> to vector<64x32xf32>
    %602 = arith.subf %589, %601 : vector<64x32xf32>
    %cst_195 = arith.constant 9.99999974E-6 : f32
    %603 = vector.broadcast %cst_195 : f32 to vector<64x1xf32>
    %604 = arith.addf %600, %603 : vector<64x1xf32>
    %605 = math.rsqrt %604 : vector<64x1xf32>
    %606 = vector.broadcast %605 : vector<64x1xf32> to vector<64x32xf32>
    %607 = arith.mulf %602, %606 : vector<64x32xf32>
    %c352_196 = arith.constant 352 : index
    %c96_197 = arith.constant 96 : index
    %608 = vector.load %arg2[%c352_196, %c96_197] : memref<432x128xf32, #tpu.memory_space<vmem>>, vector<1x32xf32>
    %609 = vector.broadcast %608 : vector<1x32xf32> to vector<64x32xf32>
    %610 = arith.mulf %607, %609 : vector<64x32xf32>
    %c392 = arith.constant 392 : index
    %c0_198 = arith.constant 0 : index
    %611 = vector.load %arg2[%c392, %c0_198] : memref<432x128xf32, #tpu.memory_space<vmem>>, vector<1x32xf32>
    %612 = vector.broadcast %611 : vector<1x32xf32> to vector<64x32xf32>
    %613 = arith.addf %610, %612 : vector<64x32xf32>
    %cst_199 = arith.constant 0.000000e+00 : f32
    %614 = vector.broadcast %cst_199 : f32 to vector<64x32xf32>
    %615 = arith.cmpf oge, %613, %614 : vector<64x32xf32>
    %cst_200 = arith.constant 0.00999999977 : f32
    %616 = vector.broadcast %cst_200 : f32 to vector<64x32xf32>
    %617 = arith.mulf %616, %613 : vector<64x32xf32>
    %618 = arith.select %615, %613, %617 : vector<64x32xi1>, vector<64x32xf32>
    %c400 = arith.constant 400 : index
    %c0_201 = arith.constant 0 : index
    %619 = vector.load %arg2[%c400, %c0_201] : memref<432x128xf32, #tpu.memory_space<vmem>>, vector<32x25xf32>
    %cst_202 = arith.constant dense<0.000000e+00> : vector<64x25xf32>
    %620 = tpu.matmul %618, %619, %cst_202 {dimension_numbers = #tpu.dot_dimension_numbers<[1], [0], [0], [1], [0, 0, 1, 1], [], []>} : vector<64x32xf32>, vector<32x25xf32>, vector<64x25xf32> -> vector<64x25xf32>
    %c392_203 = arith.constant 392 : index
    %c32_204 = arith.constant 32 : index
    %621 = vector.load %arg2[%c392_203, %c32_204] : memref<432x128xf32, #tpu.memory_space<vmem>>, vector<1x25xf32>
    %622 = vector.broadcast %621 : vector<1x25xf32> to vector<64x25xf32>
    %623 = arith.addf %620, %622 : vector<64x25xf32>
    %624 = vector.extract_strided_slice %623 {offsets = [0, 0], sizes = [64, 1], strides = [1, 1]} : vector<64x25xf32> to vector<64x1xf32>
    %cst_205 = arith.constant 0.000000e+00 : f32
    %625 = vector.broadcast %cst_205 : f32 to vector<64x1xf32>
    %626 = arith.subf %625, %624 : vector<64x1xf32>
    %cst_206 = arith.constant 0.000000e+00 : f32
    %627 = vector.broadcast %cst_206 : f32 to vector<64x1xf32>
    %628 = arith.maximumf %626, %627 : vector<64x1xf32>
    %629 = math.absf %624 : vector<64x1xf32>
    %cst_207 = arith.constant 0.000000e+00 : f32
    %630 = vector.broadcast %cst_207 : f32 to vector<64x1xf32>
    %631 = arith.subf %630, %629 : vector<64x1xf32>
    %632 = math.exp %631 : vector<64x1xf32>
    %633 = math.log1p %632 : vector<64x1xf32>
    %634 = arith.addf %628, %633 : vector<64x1xf32>
    %cst_208 = arith.constant -2.30258512 : f32
    %635 = vector.broadcast %cst_208 : f32 to vector<64x1xf32>
    %636 = arith.mulf %635, %634 : vector<64x1xf32>
    %637 = math.exp %636 : vector<64x1xf32>
    %cst_209 = arith.constant 2.000000e+00 : f32
    %638 = vector.broadcast %cst_209 : f32 to vector<64x1xf32>
    %639 = arith.mulf %638, %637 : vector<64x1xf32>
    %cst_210 = arith.constant 1.000000e-07 : f32
    %640 = vector.broadcast %cst_210 : f32 to vector<64x1xf32>
    %641 = arith.addf %639, %640 : vector<64x1xf32>
    %642 = vector.extract_strided_slice %623 {offsets = [0, 1], sizes = [64, 16], strides = [1, 1]} : vector<64x25xf32> to vector<64x16xf32>
    %cst_211 = arith.constant 0.000000e+00 : f32
    %643 = vector.broadcast %cst_211 : f32 to vector<64x16xf32>
    %644 = arith.subf %643, %642 : vector<64x16xf32>
    %cst_212 = arith.constant 0.000000e+00 : f32
    %645 = vector.broadcast %cst_212 : f32 to vector<64x16xf32>
    %646 = arith.maximumf %644, %645 : vector<64x16xf32>
    %647 = math.absf %642 : vector<64x16xf32>
    %cst_213 = arith.constant 0.000000e+00 : f32
    %648 = vector.broadcast %cst_213 : f32 to vector<64x16xf32>
    %649 = arith.subf %648, %647 : vector<64x16xf32>
    %650 = math.exp %649 : vector<64x16xf32>
    %651 = math.log1p %650 : vector<64x16xf32>
    %652 = arith.addf %646, %651 : vector<64x16xf32>
    %cst_214 = arith.constant -2.30258512 : f32
    %653 = vector.broadcast %cst_214 : f32 to vector<64x16xf32>
    %654 = arith.mulf %653, %652 : vector<64x16xf32>
    %655 = math.exp %654 : vector<64x16xf32>
    %cst_215 = arith.constant 2.000000e+00 : f32
    %656 = vector.broadcast %cst_215 : f32 to vector<64x16xf32>
    %657 = arith.mulf %656, %655 : vector<64x16xf32>
    %cst_216 = arith.constant 1.000000e-07 : f32
    %658 = vector.broadcast %cst_216 : f32 to vector<64x16xf32>
    %659 = arith.addf %657, %658 : vector<64x16xf32>
    %660 = tpu.iota {dimensions = array<i32: 1>} : vector<64x16xi32>
    %c1_i32_217 = arith.constant 1 : i32
    %661 = vector.broadcast %c1_i32_217 : i32 to vector<64x16xi32>
    %662 = arith.addi %660, %661 : vector<64x16xi32>
    %663 = arith.sitofp %662 : vector<64x16xi32> to vector<64x16xf32>
    %664 = vector.broadcast %0 : vector<64x1xf32> to vector<64x16xf32>
    %665 = arith.mulf %664, %663 : vector<64x16xf32>
    %cst_218 = arith.constant 8.000000e+03 : f32
    %666 = vector.broadcast %cst_218 : f32 to vector<64x16xf32>
    %667 = arith.cmpf olt, %665, %666 : vector<64x16xf32>
    %668 = arith.extui %667 : vector<64x16xi1> to vector<64x16xi32>
    %669 = arith.sitofp %668 : vector<64x16xi32> to vector<64x16xf32>
    %cst_219 = arith.constant 9.99999974E-5 : f32
    %670 = vector.broadcast %cst_219 : f32 to vector<64x16xf32>
    %671 = arith.addf %669, %670 : vector<64x16xf32>
    %672 = arith.mulf %659, %671 : vector<64x16xf32>
    %cst_220 = arith.constant dense<0.000000e+00> : vector<64xf32>
    %673 = vector.multi_reduction <add>, %672, %cst_220 [1] : vector<64x16xf32> to vector<64xf32>
    %674 = vector.shape_cast %673 : vector<64xf32> to vector<64x1xf32>
    %675 = vector.broadcast %674 : vector<64x1xf32> to vector<64x16xf32>
    %676 = arith.divf %672, %675 : vector<64x16xf32>
    %677 = vector.broadcast %641 : vector<64x1xf32> to vector<64x16xf32>
    %678 = arith.mulf %676, %677 : vector<64x16xf32>
    %679 = vector.extract_strided_slice %623 {offsets = [0, 17], sizes = [64, 8], strides = [1, 1]} : vector<64x25xf32> to vector<64x8xf32>
    %cst_221 = arith.constant 5.000000e+00 : f32
    %680 = vector.broadcast %cst_221 : f32 to vector<64x8xf32>
    %681 = arith.subf %679, %680 : vector<64x8xf32>
    %cst_222 = arith.constant 0.000000e+00 : f32
    %682 = vector.broadcast %cst_222 : f32 to vector<64x8xf32>
    %683 = arith.subf %682, %681 : vector<64x8xf32>
    %cst_223 = arith.constant 0.000000e+00 : f32
    %684 = vector.broadcast %cst_223 : f32 to vector<64x8xf32>
    %685 = arith.maximumf %683, %684 : vector<64x8xf32>
    %686 = math.absf %681 : vector<64x8xf32>
    %cst_224 = arith.constant 0.000000e+00 : f32
    %687 = vector.broadcast %cst_224 : f32 to vector<64x8xf32>
    %688 = arith.subf %687, %686 : vector<64x8xf32>
    %689 = math.exp %688 : vector<64x8xf32>
    %690 = math.log1p %689 : vector<64x8xf32>
    %691 = arith.addf %685, %690 : vector<64x8xf32>
    %cst_225 = arith.constant -2.30258512 : f32
    %692 = vector.broadcast %cst_225 : f32 to vector<64x8xf32>
    %693 = arith.mulf %692, %691 : vector<64x8xf32>
    %694 = math.exp %693 : vector<64x8xf32>
    %cst_226 = arith.constant 2.000000e+00 : f32
    %695 = vector.broadcast %cst_226 : f32 to vector<64x8xf32>
    %696 = arith.mulf %695, %694 : vector<64x8xf32>
    %cst_227 = arith.constant 1.000000e-07 : f32
    %697 = vector.broadcast %cst_227 : f32 to vector<64x8xf32>
    %698 = arith.addf %696, %697 : vector<64x8xf32>
    %c0_228 = arith.constant 0 : index
    %c0_229 = arith.constant 0 : index
    %699 = vector.load %arg3[%c0_228, %c0_229] : memref<64x24xf32, #tpu.memory_space<vmem>>, vector<64x16xf32>
    tpu.vector_store %arg3[%c0_228, %c0_229], %678 {strides = array<i32>} : memref<64x24xf32, #tpu.memory_space<vmem>>, vector<64x16xf32>,
    %c0_230 = arith.constant 0 : index
    %c16 = arith.constant 16 : index
    %700 = vector.load %arg3[%c0_230, %c16] : memref<64x24xf32, #tpu.memory_space<vmem>>, vector<64x8xf32>
    tpu.vector_store %arg3[%c0_230, %c16], %698 {strides = array<i32>} : memref<64x24xf32, #tpu.memory_space<vmem>>, vector<64x8xf32>,
    return
  }
  func.func @transform_0(%arg0: i32) -> (i32, i32) {
    %c0_i32 = arith.constant 0 : i32
    %c0_i32_0 = arith.constant 0 : i32
    %c0_i32_1 = arith.constant 0 : i32
    return %c0_i32, %c0_i32_0 : i32, i32
  }
  func.func @transform_1(%arg0: i32) -> (i32, i32) {
    %c0_i32 = arith.constant 0 : i32
    %c0_i32_0 = arith.constant 0 : i32
    %c0_i32_1 = arith.constant 0 : i32
    return %c0_i32, %c0_i32_0 : i32, i32
  }
  func.func @transform_2(%arg0: i32) -> (i32, i32) {
    %c0_i32 = arith.constant 0 : i32
    %c0_i32_0 = arith.constant 0 : i32
    %c0_i32_1 = arith.constant 0 : i32
    return %c0_i32, %c0_i32_0 : i32, i32
  }
}

</mosaic_0001>

<bundles_post_ra>
// kernel: run.1
= control target key start
LH: loop header
LB: loop body
LE: loop exit
PB: predicated region body
PF: predicated region fallthrough
CT: control target
= control target key end

     0   :  { %v5622_v0 = vmov 1   ;;  %s5623_s27 = smov 96   ;;  %v5625_v39 = vmov 0   ;;  %vm101_vm0 = vcmask 261120   ;;  %s5626_s4 = smov 32   ;;  %s7399_s0 = inlined_call_operand.vmem [shape: f32[64,2], index: 0, kind: input, shape index: {}]   ;;  %s7400_s1 = inlined_call_operand.vmem [shape: f32[432,128], index: 1, kind: input, shape index: {}]   ;;  %s7401_s2 = inlined_call_operand.vmem [shape: f32[64,24], index: 2, kind: output, shape index: {}]  }
   0x1   :  { %5313 = vset.pattern.permute.xlu1 %v5622_v0  ;;  %5312 = vset.pattern.permute.xlu0 %v5622_v0  ;;  %v5650_v1 = vld [vmem:[%s7399_s0 + $0x10] sm:$0xff]  ;;  %v5655_v2 = vld [vmem:[%s7399_s0] sm:$0xff]  ;;  %v5660_v3 = vld [vmem:[%s7399_s0 + $0x18] sm:$0xff] }
   0x2   :  { %v4589_v4 = vadd.f32 4.5, %v5650_v1  ;;  %v4587_v5 = vadd.f32 4.5, %v5655_v2  ;;  %v4590_v6 = vadd.f32 4.5, %v5660_v3  ;;  %v5668_v7 = vld [vmem:[%s7399_s0 + $0x8] sm:$0xff]  ;;  %v5674_v9 = vld [vmem:[%s7399_s0 + $0x20] sm:$0xff]  ;;  %v5680_v15 = vld [vmem:[%s7399_s0 + $0x30] sm:$0xff] }
   0x3   :  { %v4588_v8 = vadd.f32 4.5, %v5668_v7  ;;  %v4591_v14 = vadd.f32 4.5, %v5674_v9  ;;  %v5685_v16 = vld [vmem:[%s7399_s0 + $0x28] sm:$0xff]  ;;  %v4593_v18 = vadd.f32 4.5, %v5680_v15  ;;  %v4613_v20 = vld [vmem:[%s7400_s1 + $0x50] ss:$0 sm:$0xff] }
   0x4   :  { %v30_v10 = vmul.f32 0.44444445, %v4589_v4  ;;  %v28_v11 = vmul.f32 0.44444445, %v4587_v5  ;;  %v31_v12 = vmul.f32 0.44444445, %v4590_v6 }
   0x5   :  { %v29_v13 = vmul.f32 0.44444445, %v4588_v8  ;;  %v32_v17 = vmul.f32 0.44444445, %v4591_v14  ;;  %v4592_v19 = vadd.f32 4.5, %v5685_v16  ;;  %v5695_v21 = vld [vmem:[%s7399_s0 + $0x38] sm:$0xff] }
   0x6   :  { %843 = vperm.xlu1 %5313, %v30_v10   ;;  %833 = vperm.xlu0 %5312, %v28_v11   ;;  %v34_v22 = vmul.f32 0.44444445, %v4593_v18  ;;  %v4594_v24 = vadd.f32 4.5, %v5695_v21  ;;  %s5624_s0 = smov 64   ;;  %v5781_v5 = vld [vmem:[%s7400_s1] ss:$0 sm:$0xff] }
   0x7   :  { %v33_v23 = vmul.f32 0.44444445, %v4592_v19 }
   0x8   :  { %v35_v25 = vmul.f32 0.44444445, %v4594_v24 }
   0xa   :  { %848 = vperm.xlu1 %5313, %v31_v12   ;;  %838 = vperm.xlu0 %5312, %v29_v13  }
   0xe   :  { %796 = vrot.lane.b32.xlu1 %v4613_v20, %s5623_s27  ;;  %853 = vperm.xlu0 %5312, %v32_v17  }
  0x12   :  { %863 = vperm.xlu1 %5313, %v34_v22   ;;  %858 = vperm.xlu0 %5312, %v33_v23  }
  0x16   :  { %868 = vperm.xlu0 %5312, %v35_v25   ;;  %5315 = vset.pattern.permute.xlu1 %v5625_v39 }
  0x1a   :  { %5314 = vset.pattern.permute.xlu0 %v5625_v39 }
  0x85   :  { %v5699_v26 = vpop.permute.xlu1 %843  ;;  %v5701_v27 = vpop.permute.xlu0 %833 }
  0x86   :  { %v871_v30 = vmul.f32 %v4613_v20, %v5701_v27  ;;  %v873_v36 = vmul.f32 %v4613_v20, %v5699_v26 }
  0x89   :  { %v5703_v28 = vpop.permute.xlu1 %848  ;;  %v5705_v29 = vpop.permute.xlu0 %838 }
  0x8a   :  { %v872_v31 = vmul.f32 %v4613_v20, %v5705_v29  ;;  %v874_v37 = vmul.f32 %v4613_v20, %v5703_v28 }
  0x8d   :  { %v5709_v32 = vpop.permute.xlu1 %796  ;;  %v5711_v33 = vpop.permute.xlu0 %853 }
  0x8e   :  { %v5714_v34 = vadd.f32 %v871_v30, %v5709_v32  ;;  %v5717_v35 = vadd.f32 %v872_v31, %v5709_v32  ;;  %v875_v40 = vmul.f32 %v4613_v20, %v5711_v33  ;;  %v5730_v42 = vadd.f32 %v873_v36, %v5709_v32 }
  0x8f   :  { %v5733_v43 = vadd.f32 %v874_v37, %v5709_v32 }
  0x90   :  { %895 = vrot.lane.b32.xlu1 %v5714_v34, %s5624_s0  ;;  %897 = vrot.lane.b32.xlu0 %v5717_v35, %s5624_s0  ;;  %v5746_v48 = vadd.f32 %v875_v40, %v5709_v32 }
  0x91   :  { %v5725_v38 = vpop.permute.xlu0 %858  ;;  %v5735_v44 = vpop.permute.xlu1 %863 }
  0x92   :  { %v876_v41 = vmul.f32 %v4613_v20, %v5725_v38  ;;  %v877_v46 = vmul.f32 %v4613_v20, %v5735_v44 }
  0x94   :  { %899 = vrot.lane.b32.xlu1 %v5730_v42, %s5624_s0  ;;  %901 = vrot.lane.b32.xlu0 %v5733_v43, %s5624_s0  ;;  %v5749_v49 = vadd.f32 %v876_v41, %v5709_v32  ;;  %v5756_v50 = vadd.f32 %v877_v46, %v5709_v32 }
  0x95   :  { %v5741_v45 = vpop.permute.xlu0 %868 }
  0x96   :  { %v878_v47 = vmul.f32 %v4613_v20, %v5741_v45 }
  0x98   :  { %903 = vrot.lane.b32.xlu1 %v5746_v48, %s5624_s0  ;;  %905 = vrot.lane.b32.xlu0 %v5749_v49, %s5624_s0  ;;  %v5759_v51 = vadd.f32 %v878_v47, %v5709_v32 }
  0x9c   :  { %907 = vrot.lane.b32.xlu1 %v5756_v50, %s5624_s0  ;;  %909 = vrot.lane.b32.xlu0 %v5759_v51, %s5624_s0 }
 0x102   :  { %v896_v52 = vpop.permute.xlu1 %895  ;;  %v898_v53 = vpop.permute.xlu0 %897 }
 0x103   :  { %v919_v54 = vsel %vm101_vm0, %v896_v52, 0.0  ;;  %v922_v55 = vsel %vm101_vm0, %v898_v53, 0.0 }
 0x104   :  { %920 = vadd.xlane.f32.xlu1 %v919_v54  ;;  %923 = vadd.xlane.f32.xlu0 %v922_v55 }
 0x106   :  { %v900_v56 = vpop.permute.xlu1 %899  ;;  %v902_v57 = vpop.permute.xlu0 %901 }
 0x107   :  { %v925_v58 = vsel %vm101_vm0, %v900_v56, 0.0  ;;  %v928_v59 = vsel %vm101_vm0, %v902_v57, 0.0 }
 0x108   :  { %926 = vadd.xlane.f32.xlu0 %v925_v58  ;;  %929 = vadd.xlane.f32.xlu1 %v928_v59 }
 0x10a   :  { %v904_v60 = vpop.permute.xlu1 %903  ;;  %v906_v61 = vpop.permute.xlu0 %905 }
 0x10b   :  { %v931_v62 = vsel %vm101_vm0, %v904_v60, 0.0  ;;  %v934_v63 = vsel %vm101_vm0, %v906_v61, 0.0 }
 0x10c   :  { %932 = vadd.xlane.f32.xlu0 %v931_v62  ;;  %935 = vadd.xlane.f32.xlu1 %v934_v63 }
 0x10e   :  { %v908_v0 = vpop.permute.xlu1 %907  ;;  %v910_v6 = vpop.permute.xlu0 %909 }
 0x10f   :  { %v937_v4 = vsel %vm101_vm0, %v908_v0, 0.0 }
 0x110   :  { %938 = vadd.xlane.f32.xlu0 %v937_v4 }
 0x11d   :  { %44 = vperm.xlu1 %5315, %v5668_v7  }
 0x121   :  { %49 = vperm.xlu1 %5315, %v5650_v1   ;;  %v940_v1 = vsel %vm101_vm0, %v910_v6, 0.0 }
 0x125   :  { %54 = vperm.xlu1 %5315, %v5660_v3  }
 0x126   :  { %39 = vperm.xlu0 %5314, %v5655_v2  }
 0x129   :  { %59 = vperm.xlu1 %5315, %v5674_v9  }
 0x12d   :  { %64 = vperm.xlu1 %5315, %v5685_v16  }
 0x131   :  { %90 = vrot.lane.b32.xlu1 %v5781_v5, %s5623_s27 }
 0x135   :  { %69 = vperm.xlu1 %5315, %v5680_v15  }
 0x159   :  { %941 = vadd.xlane.f32.xlu1 %v940_v1 }
 0x16a   :  { %74 = vperm.xlu1 %5315, %v5695_v21  }
 0x191   :  { %v5788_v2 = vpop.xlane.xlu1 %920  ;;  %v924_v3 = vpop.xlane.xlu0 %923 }
 0x192   :  { %v944_v58 = vmul.f32 0.03125, %v924_v3 }
 0x194   :  { %v5853_v59 = vsub.f32 %v5717_v35, %v944_v58 }
 0x195   :  { %v930_v7 = vpop.xlane.xlu1 %929  ;;  %v5790_v9 = vpop.xlane.xlu0 %926 }
 0x196   :  { %v946_v60 = vmul.f32 0.03125, %v930_v7  ;;  %v960_v63 = vmul.f32 %v5853_v59, %v5853_v59 }
 0x198   :  { %v5856_v61 = vsub.f32 %v5733_v43, %v946_v60 }
 0x199   :  { %v936_v8 = vpop.xlane.xlu1 %935  ;;  %v5794_v11 = vpop.xlane.xlu0 %932 }
 0x19a   :  { %v948_v62 = vmul.f32 0.03125, %v936_v8  ;;  %v962_v4 = vmul.f32 %v5856_v61, %v5856_v61 }
 0x19c   :  { %v5862_v0 = vsub.f32 %v5749_v49, %v948_v62 }
 0x19d   :  { %v5792_v10 = vpop.permute.xlu1 %44  ;;  %v5800_v14 = vpop.xlane.xlu0 %938 }
 0x19e   :  { %v82_v19 = vmul.f32 %v5781_v5, %v5792_v10  ;;  %v964_v35 = vmul.f32 %v5862_v0, %v5862_v0 }
 0x1a1   :  { %v5796_v12 = vpop.permute.xlu1 %49 }
 0x1a2   :  { %v83_v24 = vmul.f32 %v5781_v5, %v5796_v12 }
 0x1a5   :  { %v5798_v13 = vpop.permute.xlu1 %54  ;;  %v5804_v16 = vpop.permute.xlu0 %39 }
 0x1a6   :  { %v81_v18 = vmul.f32 %v5781_v5, %v5804_v16  ;;  %v84_v40 = vmul.f32 %v5781_v5, %v5798_v13 }
 0x1a9   :  { %v5802_v15 = vpop.permute.xlu1 %59 }
 0x1aa   :  { %v85_v23 = vmul.f32 %v5781_v5, %v5802_v15 }
 0x1ad   :  { %v5806_v17 = vpop.permute.xlu1 %64 }
 0x1ae   :  { %v86_v53 = vmul.f32 %v5781_v5, %v5806_v17 }
 0x1b1   :  { %v91_v20 = vpop.permute.xlu1 %90 }
 0x1b2   :  { %v5812_v21 = vadd.f32 %v91_v20, %v82_v19  ;;  %v5814_v22 = vadd.f32 %v91_v20, %v81_v18  ;;  %v5824_v31 = vadd.f32 %v91_v20, %v85_v23  ;;  %v5826_v36 = vadd.f32 %v91_v20, %v83_v24 }
 0x1b3   :  { %v5840_v52 = vadd.f32 %v91_v20, %v84_v40  ;;  %v5848_v56 = vadd.f32 %v91_v20, %v86_v53  ;;  %v943_v19 = vmul.f32 0.03125, %v5788_v2  ;;  %v945_v23 = vmul.f32 0.03125, %v5790_v9 }
 0x1b4   :  { %v105_v25 = vsel %vm101_vm0, %v5812_v21, 0.0  ;;  %v102_v30 = vsel %vm101_vm0, %v5814_v22, 0.0  ;;  %v114_v41 = vsel %vm101_vm0, %v5824_v31, 0.0  ;;  %v108_v46 = vsel %vm101_vm0, %v5826_v36, 0.0 }
 0x1b5   :  { %v5828_v37 = vpop.permute.xlu1 %69  ;;  %106 = vadd.xlane.f32.xlu1 %v105_v25  ;;  %103 = vadd.xlane.f32.xlu0 %v102_v30  ;;  %v111_v55 = vsel %vm101_vm0, %v5840_v52, 0.0  ;;  %v117_v57 = vsel %vm101_vm0, %v5848_v56, 0.0  ;;  %v5890_v24 = vsub.f32 %v5730_v42, %v945_v23  ;;  %v947_v25 = vmul.f32 0.03125, %v5794_v11 }
 0x1b6   :  { %v87_v39 = vmul.f32 %v5781_v5, %v5828_v37  ;;  %v949_v2 = vmul.f32 0.03125, %v5800_v14 }
 0x1b7   :  { %v5897_v30 = vsub.f32 %v5746_v48, %v947_v25 }
 0x1b8   :  { %v5838_v47 = vadd.f32 %v91_v20, %v87_v39  ;;  %v5904_v42 = vsub.f32 %v5756_v50, %v949_v2 }
 0x1b9   :  { %115 = vadd.xlane.f32.xlu1 %v114_v41  ;;  %109 = vadd.xlane.f32.xlu0 %v108_v46  ;;  %v963_v9 = vmul.f32 %v5897_v30, %v5897_v30 }
 0x1ba   :  { %v120_v54 = vsel %vm101_vm0, %v5838_v47, 0.0  ;;  %v965_v11 = vmul.f32 %v5904_v42, %v5904_v42 }
 0x1bd   :  { %121 = vadd.xlane.f32.xlu1 %v120_v54  ;;  %112 = vadd.xlane.f32.xlu0 %v111_v55 }
 0x1c1   :  { %118 = vadd.xlane.f32.xlu0 %v117_v57 }
 0x1ce   :  { %977 = vrot.lane.b32.xlu1 %v960_v63, %s5624_s0  ;;  %v4614_v63 = vld [vmem:[%s7400_s1 + $0x58] ss:$0 sm:$0xff] }
 0x1d2   :  { %981 = vrot.lane.b32.xlu1 %v962_v4, %s5624_s0 }
 0x1d6   :  { %985 = vrot.lane.b32.xlu1 %v964_v35, %s5624_s0 }
 0x1e6   :  { %v942_v43 = vpop.xlane.xlu1 %941 }
 0x1e7   :  { %v950_v6 = vmul.f32 0.03125, %v942_v43 }
 0x1e9   :  { %v5871_v1 = vsub.f32 %v5759_v51, %v950_v6  ;;  %v5886_v51 = vsub.f32 %v5714_v34, %v943_v19  ;;  %v961_v34 = vmul.f32 %v5890_v24, %v5890_v24 }
 0x1ea   :  { %v5873_v3 = vpop.permute.xlu1 %74 }
 0x1eb   :  { %v966_v49 = vmul.f32 %v5871_v1, %v5871_v1  ;;  %v88_v7 = vmul.f32 %v5781_v5, %v5873_v3 }
 0x1ed   :  { %989 = vrot.lane.b32.xlu1 %v966_v49, %s5624_s0  ;;  %v5880_v8 = vadd.f32 %v91_v20, %v88_v7  ;;  %v959_v20 = vmul.f32 %v5886_v51, %v5886_v51 }
 0x1ef   :  { %v123_v18 = vsel %vm101_vm0, %v5880_v8, 0.0 }
 0x1f0   :  { %124 = vadd.xlane.f32.xlu0 %v123_v18 }
 0x206   :  { %975 = vrot.lane.b32.xlu0 %v959_v20, %s5624_s0 }
 0x20a   :  { %979 = vrot.lane.b32.xlu0 %v961_v34, %s5624_s0 }
 0x20e   :  { %983 = vrot.lane.b32.xlu0 %v963_v9, %s5624_s0 }
 0x212   :  { %987 = vrot.lane.b32.xlu0 %v965_v11, %s5624_s0 }
 0x242   :  { %v107_v48 = vpop.xlane.xlu1 %106  ;;  %v104_v58 = vpop.xlane.xlu0 %103 }
 0x243   :  { %v128_v18 = vmul.f32 0.03125, %v107_v48 }
 0x245   :  { %v5924_v25 = vsub.f32 %v5812_v21, %v128_v18  ;;  %v255_v18 = vld [vmem:[%s7400_s1 + $0x18] sm:$0xff] }
 0x246   :  { %v116_v14 = vpop.xlane.xlu1 %115  ;;  %v110_v60 = vpop.xlane.xlu0 %109 }
 0x24a   :  { %v122_v39 = vpop.xlane.xlu1 %121  ;;  %v113_v62 = vpop.xlane.xlu0 %112 }
 0x24b   :  { %v130_v20 = vmul.f32 0.03125, %v113_v62  ;;  %v129_v62 = vmul.f32 0.03125, %v110_v60 }
 0x24d   :  { %v5928_v9 = vsub.f32 %v5840_v52, %v130_v20 }
 0x24e   :  { %v978_v40 = vpop.permute.xlu1 %977  ;;  %v119_v4 = vpop.xlane.xlu0 %118 }
 0x24f   :  { %v1002_v41 = vsel %vm101_vm0, %v978_v40, 0.0  ;;  %v132_v11 = vmul.f32 0.03125, %v119_v4  ;;  %v144_v40 = vmul.f32 %v5924_v25, %v5924_v25  ;;  %v146_v21 = vmul.f32 %v5928_v9, %v5928_v9 }
 0x250   :  { %1003 = vadd.xlane.f32.xlu0 %v1002_v41  ;;  %v131_v4 = vmul.f32 0.03125, %v116_v14 }
 0x251   :  { %v5933_v48 = vsub.f32 %v5848_v56, %v132_v11  ;;  %v160_v52 = vsel %vm101_vm0, %v146_v21, 0.0 }
 0x252   :  { %v982_v46 = vpop.permute.xlu1 %981 }
 0x253   :  { %v1008_v50 = vsel %vm101_vm0, %v982_v46, 0.0  ;;  %v154_v46 = vsel %vm101_vm0, %v144_v40, 0.0 }
 0x254   :  { %1009 = vadd.xlane.f32.xlu0 %v1008_v50 }
 0x256   :  { %v986_v53 = vpop.permute.xlu1 %985 }
 0x257   :  { %v1014_v54 = vsel %vm101_vm0, %v986_v53, 0.0  ;;  %v148_v53 = vmul.f32 %v5933_v48, %v5933_v48 }
 0x258   :  { %1015 = vadd.xlane.f32.xlu0 %v1014_v54 }
 0x259   :  { %v166_v54 = vsel %vm101_vm0, %v148_v53, 0.0 }
 0x25f   :  { %v990_v55 = vpop.permute.xlu1 %989 }
 0x260   :  { %v1020_v57 = vsel %vm101_vm0, %v990_v55, 0.0 }
 0x261   :  { %1021 = vadd.xlane.f32.xlu0 %v1020_v57  ;;  %v127_v57 = vmul.f32 0.03125, %v104_v58 }
 0x277   :  { %1072 = vrot.lane.b32.xlu0 %v4614_v63, %s5626_s4 }
 0x27d   :  { %v125_v35 = vpop.xlane.xlu0 %124 }
 0x27e   :  { %v134_v41 = vmul.f32 0.03125, %v125_v35  ;;  %v5955_v35 = vsub.f32 %v5826_v36, %v129_v62 }
 0x280   :  { %v5939_v50 = vsub.f32 %v5880_v8, %v134_v41  ;;  %v5952_v8 = vsub.f32 %v5814_v22, %v127_v57 }
 0x281   :  { %v976_v43 = vpop.permute.xlu0 %975 }
 0x282   :  { %v999_v6 = vsel %vm101_vm0, %v976_v43, 0.0  ;;  %v150_v56 = vmul.f32 %v5939_v50, %v5939_v50  ;;  %v143_v43 = vmul.f32 %v5952_v8, %v5952_v8 }
 0x283   :  { %1000 = vadd.xlane.f32.xlu1 %v999_v6  ;;  %v133_v6 = vmul.f32 0.03125, %v122_v39 }
 0x284   :  { %v172_v55 = vsel %vm101_vm0, %v150_v56, 0.0  ;;  %v151_v58 = vsel %vm101_vm0, %v143_v43, 0.0 }
 0x285   :  { %v980_v49 = vpop.permute.xlu0 %979  ;;  %v5966_v22 = vsub.f32 %v5838_v47, %v133_v6  ;;  %v253_v47 = vld [vmem:[%s7400_s1 + $0x8] sm:$0xff] }
 0x286   :  { %v1005_v7 = vsel %vm101_vm0, %v980_v49, 0.0  ;;  %v145_v49 = vmul.f32 %v5955_v35, %v5955_v35 }
 0x287   :  { %1006 = vadd.xlane.f32.xlu1 %v1005_v7  ;;  %v254_v7 = vld [vmem:[%s7400_s1 + $0x10] sm:$0xff] }
 0x288   :  { %v157_v14 = vsel %vm101_vm0, %v145_v49, 0.0 }
 0x289   :  { %v984_v19 = vpop.permute.xlu0 %983 }
 0x28a   :  { %v1011_v23 = vsel %vm101_vm0, %v984_v19, 0.0  ;;  %v5166_v19 = vpack.c.bf16 %v254_v7, %v253_v47 }
 0x28b   :  { %1012 = vadd.xlane.f32.xlu1 %v1011_v23  ;;  %v256_v23 = vld [vmem:[%s7400_s1 + $0x20] sm:$0xff] }
 0x28c   :  { %v5170_v20 = vpack.c.bf16 %v256_v23, %v255_v18  ;;  %5167 = vmatprep.subr.bf16.mxu0 %v5166_v19 }
 0x28d   :  { %v988_v2 = vpop.permute.xlu0 %987  ;;  %5169 = vmatpush3.bf16.msra.mxu0 %v5166_v19 }
 0x28e   :  { %v1017_v34 = vsel %vm101_vm0, %v988_v2, 0.0  ;;  %5171 = vmatprep.subr.bf16.mxu0 %v5170_v20  ;;  %v1108_v2 = vld [vmem:[%s7400_s1 + $0x68] sm:$0xff] }
 0x28f   :  { %1018 = vadd.xlane.f32.xlu1 %v1017_v34 }
 0x291   :  { %5173 = vmatpush3.bf16.msra.mxu0 %v5170_v20 }
 0x296   :  { %155 = vadd.xlane.f32.xlu0 %v154_v46 }
 0x29a   :  { %161 = vadd.xlane.f32.xlu0 %v160_v52 }
 0x29e   :  { %167 = vadd.xlane.f32.xlu0 %v166_v54 }
 0x2a0   :  { %1061 = vrot.lane.b32.xlu1 %v4614_v63, %s5624_s0  ;;  %v5960_v63 = vsub.f32 %v5824_v31, %v131_v4  ;;  %v149_v31 = vmul.f32 %v5966_v22, %v5966_v22 }
 0x2a2   :  { %173 = vadd.xlane.f32.xlu0 %v172_v55  ;;  %v147_v36 = vmul.f32 %v5960_v63, %v5960_v63  ;;  %v169_v39 = vsel %vm101_vm0, %v149_v31, 0.0 }
 0x2a4   :  { %v163_v60 = vsel %vm101_vm0, %v147_v36, 0.0 }
 0x2b8   :  { %218 = vrot.lane.b32.xlu0 %v5781_v5, %s5626_s4 }
 0x2c4   :  { %152 = vadd.xlane.f32.xlu1 %v151_v58 }
 0x2c8   :  { %158 = vadd.xlane.f32.xlu1 %v157_v14 }
 0x2cc   :  { %164 = vadd.xlane.f32.xlu1 %v163_v60 }
 0x2d0   :  { %170 = vadd.xlane.f32.xlu1 %v169_v39 }
 0x2dd   :  { %v1004_v11 = vpop.xlane.xlu0 %1003 }
 0x2de   :  { %v1024_v41 = vmul.f32 0.03125, %v1004_v11 }
 0x2e0   :  { %v1032_v52 = vadd.f32 1e-05, %v1024_v41 }
 0x2e1   :  { %207 = vrot.lane.b32.xlu1 %v5781_v5, %s5624_s0  ;;  %v1107_v5 = vld [vmem:[%s7400_s1 + $0x60] sm:$0xff]  ;;  %v1010_v40 = vpop.xlane.xlu0 %1009 }
 0x2e2   :  { %v5995_v34 = vpack.c.bf16 %v1108_v2, %v1107_v5  ;;  %v1026_v46 = vmul.f32 0.03125, %v1010_v40  ;;  %5316 = vrsqrt.f32 %v1032_v52 }
 0x2e4   :  { %5183 = vmatprep.subr.bf16.mxu0 %v5995_v34  ;;  %v1034_v53 = vadd.f32 1e-05, %v1026_v46 }
 0x2e5   :  { %v1016_v21 = vpop.xlane.xlu0 %1015 }
 0x2e6   :  { %v1028_v54 = vmul.f32 0.03125, %v1016_v21  ;;  %5318 = vrsqrt.f32 %v1034_v53 }
 0x2e8   :  { %v1036_v4 = vadd.f32 1e-05, %v1028_v54 }
 0x2ec   :  { %v5317_v39 = vpop.eup %5316 }
 0x2ed   :  { %v1048_v20 = vmul.f32 %v5317_v39, %v5853_v59 }
 0x2ee   :  { %v1022_v55 = vpop.xlane.xlu0 %1021 }
 0x2ef   :  { %v1030_v43 = vmul.f32 0.03125, %v1022_v55 }
 0x2f0   :  { %v5319_v18 = vpop.eup %5318 }
 0x2f1   :  { %v1038_v14 = vadd.f32 1e-05, %v1030_v43  ;;  %v1050_v46 = vmul.f32 %v5319_v18, %v5856_v61 }
 0x2f2   :  { %v6005_v52 = vpop.permute.xlu0 %1072 }
 0x310   :  { %v1001_v56 = vpop.xlane.xlu1 %1000 }
 0x311   :  { %v1023_v57 = vmul.f32 0.03125, %v1001_v56 }
 0x313   :  { %v1031_v62 = vadd.f32 1e-05, %v1023_v57 }
 0x314   :  { %v1007_v6 = vpop.xlane.xlu1 %1006 }
 0x315   :  { %5320 = vrsqrt.f32 %v1031_v62  ;;  %v1025_v58 = vmul.f32 0.03125, %v1007_v6 }
 0x316   :  { %5322 = vrsqrt.f32 %v1036_v4 }
 0x317   :  { %v1033_v49 = vadd.f32 1e-05, %v1025_v58 }
 0x318   :  { %v1013_v36 = vpop.xlane.xlu1 %1012 }
 0x319   :  { %5324 = vrsqrt.f32 %v1033_v49  ;;  %v1027_v60 = vmul.f32 0.03125, %v1013_v36 }
 0x31a   :  { %5326 = vrsqrt.f32 %v1038_v14 }
 0x31b   :  { %v1035_v31 = vadd.f32 1e-05, %v1027_v60 }
 0x31c   :  { %v1019_v47 = vpop.xlane.xlu1 %1018 }
 0x31d   :  { %5328 = vrsqrt.f32 %v1035_v31  ;;  %v1029_v7 = vmul.f32 0.03125, %v1019_v47 }
 0x31f   :  { %v5321_v19 = vpop.eup %5320  ;;  %v1037_v23 = vadd.f32 1e-05, %v1029_v7 }
 0x320   :  { %v5999_v5 = vpop.permute.xlu1 %1061  ;;  %v1047_v2 = vmul.f32 %v5321_v19, %v5886_v51  ;;  %v5323_v40 = vpop.eup %5322 }
 0x321   :  { %5330 = vrsqrt.f32 %v1037_v23  ;;  %v1065_v11 = vmul.f32 %v5999_v5, %v1048_v20  ;;  %v1067_v56 = vmul.f32 %v5999_v5, %v1050_v46  ;;  %v1052_v51 = vmul.f32 %v5323_v40, %v5862_v0 }
 0x322   :  { %v1064_v41 = vmul.f32 %v5999_v5, %v1047_v2 }
 0x323   :  { %v5325_v21 = vpop.eup %5324  ;;  %v1076_v59 = vadd.f32 %v6005_v52, %v1065_v11  ;;  %v1069_v61 = vmul.f32 %v5999_v5, %v1052_v51 }
 0x324   :  { %v1075_v53 = vadd.f32 %v6005_v52, %v1064_v41  ;;  %v1049_v54 = vmul.f32 %v5325_v21, %v5890_v24  ;;  %v5327_v55 = vpop.eup %5326  ;;  %v1078_v24 = vadd.f32 %v6005_v52, %v1067_v56 }
 0x325   :  { %v1092_v58 = vmul.f32 0.01, %v1076_v59  ;;  %vm1084_vm2 = vcmp.ge.f32.partialorder %v1076_v59, 0.0  ;;  %v1054_v0 = vmul.f32 %v5327_v55, %v5871_v1  ;;  %v1080_v31 = vadd.f32 %v6005_v52, %v1069_v61 }
 0x326   :  { %vm1083_vm1 = vcmp.ge.f32.partialorder %v1075_v53, 0.0  ;;  %v1091_v57 = vmul.f32 0.01, %v1075_v53  ;;  %v1066_v62 = vmul.f32 %v5999_v5, %v1049_v54  ;;  %v1094_v18 = vmul.f32 0.01, %v1078_v24 }
 0x327   :  { %v5329_v4 = vpop.eup %5328  ;;  %v1071_v39 = vmul.f32 %v5999_v5, %v1054_v0  ;;  %v1100_v7 = vsel %vm1084_vm2, %v1076_v59, %v1092_v58  ;;  %vm1086_vm4 = vcmp.ge.f32.partialorder %v1078_v24, 0.0  ;;  %v1096_v11 = vmul.f32 0.01, %v1080_v31  ;;  %v156_v59 = vpop.xlane.xlu0 %155 }
 0x328   :  { %v1099_v43 = vsel %vm1083_vm1, %v1075_v53, %v1091_v57  ;;  %v1077_v6 = vadd.f32 %v6005_v52, %v1066_v62  ;;  %v1051_v49 = vmul.f32 %v5329_v4, %v5897_v30  ;;  %v1102_v20 = vsel %vm1086_vm4, %v1078_v24, %v1094_v18 }
 0x329   :  { %1119 = vrot.lane.b32.xlu1 %v1099_v43, %s5624_s0  ;;  %v1082_v40 = vadd.f32 %v6005_v52, %v1071_v39  ;;  %vm1088_vm6 = vcmp.ge.f32.partialorder %v1080_v31, 0.0  ;;  %v176_v51 = vmul.f32 0.03125, %v156_v59 }
 0x32a   :  { %vm1085_vm3 = vcmp.ge.f32.partialorder %v1077_v6, 0.0  ;;  %v1093_v14 = vmul.f32 0.01, %v1077_v6  ;;  %v1068_v60 = vmul.f32 %v5999_v5, %v1051_v49  ;;  %v1104_v21 = vsel %vm1088_vm6, %v1080_v31, %v1096_v11 }
 0x32b   :  { %v5331_v36 = vpop.eup %5330  ;;  %v1098_v53 = vmul.f32 0.01, %v1082_v40  ;;  %vm1090_vm8 = vcmp.ge.f32.partialorder %v1082_v40, 0.0  ;;  %v162_v56 = vpop.xlane.xlu0 %161  ;;  %v184_v62 = vadd.f32 1e-05, %v176_v51 }
 0x32c   :  { %v1101_v47 = vsel %vm1085_vm3, %v1077_v6, %v1093_v14  ;;  %v1053_v19 = vmul.f32 %v5331_v36, %v5904_v42  ;;  %v1079_v1 = vadd.f32 %v6005_v52, %v1068_v60  ;;  %v178_v57 = vmul.f32 0.03125, %v162_v56 }
 0x32d   :  { %1123 = vrot.lane.b32.xlu0 %v1101_v47, %s5624_s0  ;;  %1121 = vrot.lane.b32.xlu1 %v1100_v7, %s5624_s0  ;;  %v1106_v54 = vsel %vm1090_vm8, %v1082_v40, %v1098_v53  ;;  %5332 = vrsqrt.f32 %v184_v62 }
 0x32e   :  { %v1070_v30 = vmul.f32 %v5999_v5, %v1053_v19  ;;  %vm1087_vm5 = vcmp.ge.f32.partialorder %v1079_v1, 0.0  ;;  %v1095_v23 = vmul.f32 0.01, %v1079_v1  ;;  %v186_v4 = vadd.f32 1e-05, %v178_v57 }
 0x32f   :  { %v168_v55 = vpop.xlane.xlu0 %167 }
 0x330   :  { %v1081_v2 = vadd.f32 %v6005_v52, %v1070_v30  ;;  %v1103_v41 = vsel %vm1087_vm5, %v1079_v1, %v1095_v23  ;;  %v180_v61 = vmul.f32 0.03125, %v168_v55  ;;  %5334 = vrsqrt.f32 %v186_v4 }
 0x331   :  { %1125 = vrot.lane.b32.xlu1 %v1102_v20, %s5624_s0  ;;  %1127 = vrot.lane.b32.xlu0 %v1103_v41, %s5624_s0 }
 0x332   :  { %vm1089_vm7 = vcmp.ge.f32.partialorder %v1081_v2, 0.0  ;;  %v1097_v42 = vmul.f32 0.01, %v1081_v2  ;;  %v188_v24 = vadd.f32 1e-05, %v180_v61  ;;  %v1109_v61 = vld [vmem:[%s7400_s1 + $0x70] sm:$0xff] }
 0x333   :  { %v174_v43 = vpop.xlane.xlu0 %173 }
 0x334   :  { %v1105_v46 = vsel %vm1089_vm7, %v1081_v2, %v1097_v42  ;;  %v182_v49 = vmul.f32 0.03125, %v174_v43 }
 0x335   :  { %1129 = vrot.lane.b32.xlu1 %v1104_v21, %s5624_s0  ;;  %1131 = vrot.lane.b32.xlu0 %v1105_v46, %s5624_s0 }
 0x336   :  { %v190_v60 = vadd.f32 1e-05, %v182_v49 }
 0x337   :  { %v5333_v7 = vpop.eup %5332  ;;  %v219_v42 = vpop.permute.xlu0 %218 }
 0x338   :  { %v200_v2 = vmul.f32 %v5333_v7, %v5924_v25 }
 0x339   :  { %1133 = vrot.lane.b32.xlu1 %v1106_v54, %s5624_s0 }
 0x33a   :  { %v5335_v19 = vpop.eup %5334 }
 0x33b   :  { %v202_v11 = vmul.f32 %v5335_v19, %v5928_v9 }
 0x351   :  { %v153_v6 = vpop.xlane.xlu1 %152 }
 0x352   :  { %v175_v58 = vmul.f32 0.03125, %v153_v6 }
 0x354   :  { %v183_v0 = vadd.f32 1e-05, %v175_v58 }
 0x355   :  { %v159_v14 = vpop.xlane.xlu1 %158 }
 0x356   :  { %5336 = vrsqrt.f32 %v183_v0  ;;  %v177_v36 = vmul.f32 0.03125, %v159_v14 }
 0x357   :  { %5338 = vrsqrt.f32 %v188_v24 }
 0x358   :  { %v185_v31 = vadd.f32 1e-05, %v177_v36 }
 0x359   :  { %v165_v39 = vpop.xlane.xlu1 %164 }
 0x35a   :  { %5340 = vrsqrt.f32 %v185_v31  ;;  %v179_v47 = vmul.f32 0.03125, %v165_v39 }
 0x35b   :  { %5342 = vrsqrt.f32 %v190_v60 }
 0x35c   :  { %v187_v18 = vadd.f32 1e-05, %v179_v47 }
 0x35d   :  { %v171_v1 = vpop.xlane.xlu1 %170 }
 0x35e   :  { %5344 = vrsqrt.f32 %v187_v18  ;;  %v181_v30 = vmul.f32 0.03125, %v171_v1 }
 0x360   :  { %v5337_v23 = vpop.eup %5336  ;;  %v189_v20 = vadd.f32 1e-05, %v181_v30 }
 0x361   :  { %v5339_v40 = vpop.eup %5338  ;;  %v208_v41 = vpop.permute.xlu1 %207  ;;  %v199_v46 = vmul.f32 %v5337_v23, %v5952_v8  ;;  %v1110_v8 = vld [vmem:[%s7400_s1 + $0x78] sm:$0xff] }
 0x362   :  { %5346 = vrsqrt.f32 %v189_v20  ;;  %v211_v21 = vmul.f32 %v208_v41, %v200_v2  ;;  %v213_v53 = vmul.f32 %v208_v41, %v202_v11  ;;  %v204_v51 = vmul.f32 %v5339_v40, %v5933_v48 }
 0x363   :  { %v210_v54 = vmul.f32 %v208_v41, %v199_v46  ;;  %v5186_v0 = vpack.c.bf16 %v1110_v8, %v1109_v61 }
 0x364   :  { %v5341_v59 = vpop.eup %5340  ;;  %v222_v56 = vadd.f32 %v219_v42, %v211_v21  ;;  %v224_v4 = vadd.f32 %v219_v42, %v213_v53  ;;  %v215_v9 = vmul.f32 %v208_v41, %v204_v51 }
 0x365   :  { %v5343_v55 = vpop.eup %5342  ;;  %v221_v57 = vadd.f32 %v219_v42, %v210_v54  ;;  %v201_v62 = vmul.f32 %v5341_v59, %v5955_v35 }
 0x366   :  { %v238_v25 = vmul.f32 0.01, %v222_v56  ;;  %vm230_vm10 = vcmp.ge.f32.partialorder %v222_v56, 0.0  ;;  %v206_v58 = vmul.f32 %v5343_v55, %v5939_v50  ;;  %v240_v36 = vmul.f32 0.01, %v224_v4 }
 0x367   :  { %vm229_vm9 = vcmp.ge.f32.partialorder %v221_v57, 0.0  ;;  %v237_v43 = vmul.f32 0.01, %v221_v57  ;;  %v212_v6 = vmul.f32 %v208_v41, %v201_v62  ;;  %v226_v60 = vadd.f32 %v219_v42, %v215_v9 }
 0x368   :  { %v5345_v48 = vpop.eup %5344  ;;  %v246_v14 = vsel %vm230_vm10, %v222_v56, %v238_v25  ;;  %v217_v31 = vmul.f32 %v208_v41, %v206_v58  ;;  %vm232_vm12 = vcmp.ge.f32.partialorder %v224_v4, 0.0 }
 0x369   :  { %v245_v24 = vsel %vm229_vm9, %v221_v57, %v237_v43  ;;  %v223_v35 = vadd.f32 %v219_v42, %v212_v6  ;;  %v203_v49 = vmul.f32 %v5345_v48, %v5960_v63  ;;  %v248_v19 = vsel %vm232_vm12, %v224_v4, %v240_v36  ;;  %v6068_v57 = vld [vmem:[%s7400_s1 + $0x28] ss:$0 sm:$0xff] }
 0x36a   :  { %4886 = vmatprep.mubr.msk.f32.mxu0 %vm101_vm0, %v245_v24  ;;  %v242_v1 = vmul.f32 0.01, %v226_v60  ;;  %v228_v30 = vadd.f32 %v219_v42, %v217_v31  ;;  %vm234_vm14 = vcmp.ge.f32.partialorder %v226_v60, 0.0 }
 0x36b   :  { %4887 = vmatmul.mubr.msk.f32.vlgmr.msra.gmra.mrb[0].mxu0 %vm101_vm0, %v246_v14  ;;  %vm231_vm11 = vcmp.ge.f32.partialorder %v223_v35, 0.0  ;;  %v239_v39 = vmul.f32 0.01, %v223_v35  ;;  %v214_v47 = vmul.f32 %v208_v41, %v203_v49 }
 0x36c   :  { %v5347_v7 = vpop.eup %5346  ;;  %5185 = vmatpush3.bf16.msra.mxu0 %v5995_v34  ;;  %v250_v34 = vsel %vm234_vm14, %v226_v60, %v242_v1  ;;  %v244_v40 = vmul.f32 0.01, %v228_v30  ;;  %vm236_vm1 = vcmp.ge.f32.partialorder %v228_v30, 0.0 }
 0x36d   :  { %v247_v50 = vsel %vm231_vm11, %v223_v35, %v239_v39  ;;  %v225_v18 = vadd.f32 %v219_v42, %v214_v47  ;;  %v205_v63 = vmul.f32 %v5347_v7, %v5966_v22  ;;  %5187 = vmatprep.subr.bf16.mxu0 %v5186_v0 }
 0x36e   :  { %4889 = vmatprep.mubr.msk.f32.mxu0 %vm101_vm0, %v247_v50  ;;  %v252_v21 = vsel %vm236_vm1, %v228_v30, %v244_v40 }
 0x36f   :  { %4890 = vmatmul.mubr.msk.f32.gmra.mrb[2].mxu0 %vm101_vm0, %v248_v19  ;;  %vm233_vm13 = vcmp.ge.f32.partialorder %v225_v18, 0.0  ;;  %v241_v23 = vmul.f32 0.01, %v225_v18  ;;  %v216_v20 = vmul.f32 %v208_v41, %v205_v63 }
 0x370   :  { %5189 = vmatpush3.bf16.msra.mxu0 %v5186_v0 }
 0x371   :  { %v249_v2 = vsel %vm233_vm13, %v225_v18, %v241_v23  ;;  %v227_v11 = vadd.f32 %v219_v42, %v216_v20 }
 0x372   :  { %4892 = vmatprep.mubr.msk.f32.mxu0 %vm101_vm0, %v249_v2 }
 0x373   :  { %4893 = vmatmul.mubr.msk.f32.gmra.mrb[4].mxu0 %vm101_vm0, %v250_v34  ;;  %vm235_vm15 = vcmp.ge.f32.partialorder %v227_v11, 0.0  ;;  %v243_v22 = vmul.f32 0.01, %v227_v11 }
 0x375   :  { %v251_v46 = vsel %vm235_vm15, %v227_v11, %v243_v22 }
 0x376   :  { %4895 = vmatprep.mubr.msk.f32.mxu0 %vm101_vm0, %v251_v46 }
 0x377   :  { %4896 = vmatmul.mubr.msk.f32.gmra.mrb[6].mxu0 %vm101_vm0, %v252_v21 }
 0x39b   :  { %v1120_v53 = vpop.permute.xlu1 %1119 }
 0x39c   :  { %4926 = vmatprep.mubr.msk.f32.mxu0 %vm101_vm0, %v1120_v53 }
 0x39f   :  { %v1122_v41 = vpop.permute.xlu1 %1121  ;;  %v1124_v42 = vpop.permute.xlu0 %1123 }
 0x3a0   :  { %4927 = vmatmul.mubr.msk.f32.vlgmr.msra.gmra.mrb[8].mxu0 %vm101_vm0, %v1122_v41 }
 0x3a1   :  { %4929 = vmatprep.mubr.msk.f32.mxu0 %vm101_vm0, %v1124_v42 }
 0x3a3   :  { %v1126_v54 = vpop.permute.xlu1 %1125  ;;  %v1128_v59 = vpop.permute.xlu0 %1127 }
 0x3a4   :  { %4930 = vmatmul.mubr.msk.f32.gmra.mrb[10].mxu0 %vm101_vm0, %v1126_v54 }
 0x3a5   :  { %4932 = vmatprep.mubr.msk.f32.mxu0 %vm101_vm0, %v1128_v59 }
 0x3a7   :  { %v1130_v56 = vpop.permute.xlu1 %1129  ;;  %v1132_v51 = vpop.permute.xlu0 %1131 }
 0x3a8   :  { %4933 = vmatmul.mubr.msk.f32.gmra.mrb[12].mxu0 %vm101_vm0, %v1130_v56 }
 0x3a9   :  { %4935 = vmatprep.mubr.msk.f32.mxu0 %vm101_vm0, %v1132_v51 }
 0x3ab   :  { %v1134_v55 = vpop.permute.xlu1 %1133 }
 0x3ac   :  { %4936 = vmatmul.mubr.msk.f32.gmra.mrb[14].mxu0 %vm101_vm0, %v1134_v55 }
 0x43e   :  { %v4888_v62 = vpop.f32.mrb[0].mxu0 }
 0x43f   :  { %v6071_v25 = vadd.f32 %v4888_v62, %v6068_v57  ;;  %v352_v4 = vpop.f32.mrb[1].mxu0 }
 0x440   :  { %v6074_v9 = vadd.f32 %v6068_v57, %v352_v4 }
 0x441   :  { %v394_v61 = vsel %vm101_vm0, %v6071_v25, 0.0 }
 0x442   :  { %395 = vadd.xlane.f32.xlu1 %v394_v61  ;;  %v4891_v8 = vpop.f32.mrb[2].mxu0  ;;  %v391_v43 = vsel %vm101_vm0, %v6074_v9, 0.0 }
 0x443   :  { %v362_v6 = vpop.f32.mrb[3].mxu0  ;;  %392 = vadd.xlane.f32.xlu0 %v391_v43  ;;  %v6084_v58 = vadd.f32 %v4891_v8, %v6068_v57 }
 0x444   :  { %v6081_v48 = vadd.f32 %v6068_v57, %v362_v6 }
 0x445   :  { %v400_v31 = vsel %vm101_vm0, %v6084_v58, 0.0 }
 0x446   :  { %v4894_v24 = vpop.f32.mrb[4].mxu0  ;;  %v397_v35 = vsel %vm101_vm0, %v6081_v48, 0.0 }
 0x447   :  { %v372_v49 = vpop.f32.mrb[5].mxu0  ;;  %398 = vadd.xlane.f32.xlu0 %v397_v35  ;;  %v6092_v14 = vadd.f32 %v4894_v24, %v6068_v57 }
 0x448   :  { %v6089_v0 = vadd.f32 %v6068_v57, %v372_v49 }
 0x449   :  { %v406_v18 = vsel %vm101_vm0, %v6092_v14, 0.0 }
 0x44a   :  { %v4897_v36 = vpop.f32.mrb[6].mxu0  ;;  %v403_v60 = vsel %vm101_vm0, %v6089_v0, 0.0 }
 0x44b   :  { %v382_v39 = vpop.f32.mrb[7].mxu0  ;;  %404 = vadd.xlane.f32.xlu1 %v403_v60  ;;  %401 = vadd.xlane.f32.xlu0 %v400_v31  ;;  %v6102_v7 = vadd.f32 %v4897_v36, %v6068_v57 }
 0x44c   :  { %v6099_v47 = vadd.f32 %v6068_v57, %v382_v39 }
 0x44d   :  { %v412_v63 = vsel %vm101_vm0, %v6102_v7, 0.0 }
 0x44e   :  { %v409_v50 = vsel %vm101_vm0, %v6099_v47, 0.0 }
 0x44f   :  { %410 = vadd.xlane.f32.xlu1 %v409_v50  ;;  %407 = vadd.xlane.f32.xlu0 %v406_v18 }
 0x453   :  { %413 = vadd.xlane.f32.xlu0 %v412_v63 }
 0x473   :  { %v4928_v19 = vpop.f32.mrb[8].mxu0 }
 0x474   :  { %v6111_v1 = vadd.f32 %v4928_v19, %v5999_v5  ;;  %v1217_v30 = vpop.f32.mrb[9].mxu0 }
 0x475   :  { %v6114_v23 = vadd.f32 %v1217_v30, %v5999_v5 }
 0x476   :  { %v1259_v20 = vsel %vm101_vm0, %v6111_v1, 0.0 }
 0x477   :  { %1260 = vadd.xlane.f32.xlu0 %v1259_v20  ;;  %v4931_v2 = vpop.f32.mrb[10].mxu0  ;;  %v1256_v11 = vsel %vm101_vm0, %v6114_v23, 0.0 }
 0x478   :  { %v6121_v34 = vadd.f32 %v4931_v2, %v5999_v5  ;;  %1257 = vadd.xlane.f32.xlu1 %v1256_v11  ;;  %v1227_v40 = vpop.f32.mrb[11].mxu0 }
 0x479   :  { %v6124_v22 = vadd.f32 %v1227_v40, %v5999_v5 }
 0x47a   :  { %v1265_v46 = vsel %vm101_vm0, %v6121_v34, 0.0 }
 0x47b   :  { %1266 = vadd.xlane.f32.xlu0 %v1265_v46  ;;  %v4934_v21 = vpop.f32.mrb[12].mxu0  ;;  %v1262_v53 = vsel %vm101_vm0, %v6124_v22, 0.0 }
 0x47c   :  { %v6131_v41 = vadd.f32 %v4934_v21, %v5999_v5  ;;  %1263 = vadd.xlane.f32.xlu1 %v1262_v53  ;;  %v1237_v42 = vpop.f32.mrb[13].mxu0 }
 0x47d   :  { %v6134_v54 = vadd.f32 %v1237_v42, %v5999_v5 }
 0x47e   :  { %v1271_v59 = vsel %vm101_vm0, %v6131_v41, 0.0 }
 0x47f   :  { %1272 = vadd.xlane.f32.xlu0 %v1271_v59  ;;  %v4937_v56 = vpop.f32.mrb[14].mxu0  ;;  %v1268_v51 = vsel %vm101_vm0, %v6134_v54, 0.0 }
 0x480   :  { %v6141_v55 = vadd.f32 %v4937_v56, %v5999_v5  ;;  %1269 = vadd.xlane.f32.xlu1 %v1268_v51  ;;  %v1247_v62 = vpop.f32.mrb[15].mxu0 }
 0x481   :  { %v6144_v4 = vadd.f32 %v1247_v62, %v5999_v5 }
 0x482   :  { %v1277_v61 = vsel %vm101_vm0, %v6141_v55, 0.0 }
 0x483   :  { %1278 = vadd.xlane.f32.xlu0 %v1277_v61  ;;  %v1274_v8 = vsel %vm101_vm0, %v6144_v4, 0.0 }
 0x484   :  { %1275 = vadd.xlane.f32.xlu1 %v1274_v8 }
 0x4cf   :  { %v396_v43 = vpop.xlane.xlu1 %395 }
 0x4d0   :  { %v416_v6 = vmul.f32 0.03125, %v396_v43  ;;  %v393_v24 = vpop.xlane.xlu0 %392 }
 0x4d1   :  { %v415_v35 = vmul.f32 0.03125, %v393_v24 }
 0x4d2   :  { %v6151_v49 = vsub.f32 %v6071_v25, %v416_v6 }
 0x4d3   :  { %v6154_v36 = vsub.f32 %v6074_v9, %v415_v35 }
 0x4d4   :  { %v399_v5 = vpop.xlane.xlu0 %398  ;;  %v432_v60 = vmul.f32 %v6151_v49, %v6151_v49 }
 0x4d5   :  { %v417_v31 = vmul.f32 0.03125, %v399_v5  ;;  %v431_v39 = vmul.f32 %v6154_v36, %v6154_v36 }
 0x4d6   :  { %v442_v50 = vsel %vm101_vm0, %v432_v60, 0.0 }
 0x4d7   :  { %v6162_v18 = vsub.f32 %v6081_v48, %v417_v31  ;;  %443 = vadd.xlane.f32.xlu0 %v442_v50  ;;  %v439_v25 = vsel %vm101_vm0, %v431_v39, 0.0 }
 0x4d8   :  { %v405_v63 = vpop.xlane.xlu1 %404  ;;  %440 = vadd.xlane.f32.xlu1 %v439_v25  ;;  %v402_v9 = vpop.xlane.xlu0 %401 }
 0x4d9   :  { %v419_v19 = vmul.f32 0.03125, %v405_v63  ;;  %v418_v30 = vmul.f32 0.03125, %v402_v9  ;;  %v433_v20 = vmul.f32 %v6162_v18, %v6162_v18 }
 0x4db   :  { %v6168_v2 = vsub.f32 %v6089_v0, %v419_v19  ;;  %v6171_v11 = vsub.f32 %v6084_v58, %v418_v30  ;;  %v445_v48 = vsel %vm101_vm0, %v433_v20, 0.0 }
 0x4dc   :  { %v411_v40 = vpop.xlane.xlu1 %410  ;;  %446 = vadd.xlane.f32.xlu1 %v445_v48  ;;  %v408_v46 = vpop.xlane.xlu0 %407 }
 0x4dd   :  { %v421_v21 = vmul.f32 0.03125, %v411_v40  ;;  %v420_v53 = vmul.f32 0.03125, %v408_v46  ;;  %v435_v42 = vmul.f32 %v6168_v2, %v6168_v2  ;;  %v434_v59 = vmul.f32 %v6171_v11, %v6171_v11 }
 0x4df   :  { %v6179_v56 = vsub.f32 %v6099_v47, %v421_v21  ;;  %v6182_v0 = vsub.f32 %v6092_v14, %v420_v53  ;;  %v451_v58 = vsel %vm101_vm0, %v435_v42, 0.0  ;;  %v448_v51 = vsel %vm101_vm0, %v434_v59, 0.0 }
 0x4e0   :  { %452 = vadd.xlane.f32.xlu1 %v451_v58  ;;  %449 = vadd.xlane.f32.xlu0 %v448_v51  ;;  %v414_v62 = vpop.xlane.xlu0 %413 }
 0x4e1   :  { %v422_v61 = vmul.f32 0.03125, %v414_v62  ;;  %v437_v8 = vmul.f32 %v6179_v56, %v6179_v56  ;;  %v436_v43 = vmul.f32 %v6182_v0, %v6182_v0 }
 0x4e3   :  { %v6191_v47 = vsub.f32 %v6102_v7, %v422_v61  ;;  %v457_v14 = vsel %vm101_vm0, %v437_v8, 0.0  ;;  %v454_v6 = vsel %vm101_vm0, %v436_v43, 0.0 }
 0x4e4   :  { %458 = vadd.xlane.f32.xlu1 %v457_v14  ;;  %455 = vadd.xlane.f32.xlu0 %v454_v6 }
 0x4e5   :  { %v438_v24 = vmul.f32 %v6191_v47, %v6191_v47 }
 0x4e7   :  { %v460_v35 = vsel %vm101_vm0, %v438_v24, 0.0 }
 0x4e8   :  { %461 = vadd.xlane.f32.xlu0 %v460_v35 }
 0x504   :  { %v1261_v5 = vpop.xlane.xlu0 %1260 }
 0x505   :  { %v1281_v60 = vmul.f32 0.03125, %v1261_v5  ;;  %v1258_v31 = vpop.xlane.xlu1 %1257 }
 0x506   :  { %v1280_v39 = vmul.f32 0.03125, %v1258_v31 }
 0x507   :  { %v6199_v50 = vsub.f32 %v6111_v1, %v1281_v60 }
 0x508   :  { %v6202_v7 = vsub.f32 %v6114_v23, %v1280_v39  ;;  %v1267_v25 = vpop.xlane.xlu0 %1266 }
 0x509   :  { %v1283_v63 = vmul.f32 0.03125, %v1267_v25  ;;  %v1264_v9 = vpop.xlane.xlu1 %1263  ;;  %v1297_v19 = vmul.f32 %v6199_v50, %v6199_v50  ;;  %v543_v25 = vld [vmem:[%s7400_s1 + $0x38] sm:$0xff] }
 0x50a   :  { %v1282_v30 = vmul.f32 0.03125, %v1264_v9  ;;  %v1296_v20 = vmul.f32 %v6202_v7, %v6202_v7 }
 0x50b   :  { %v6209_v48 = vsub.f32 %v6121_v34, %v1283_v63  ;;  %v1307_v40 = vsel %vm101_vm0, %v1297_v19, 0.0  ;;  %v544_v63 = vld [vmem:[%s7400_s1 + $0x40] sm:$0xff]  ;;  %v545_v19 = vld [vmem:[%s7400_s1 + $0x48] sm:$0xff] }
 0x50c   :  { %v6213_v1 = vsub.f32 %v6124_v22, %v1282_v30  ;;  %1308 = vadd.xlane.f32.xlu0 %v1307_v40  ;;  %v1273_v23 = vpop.xlane.xlu0 %1272  ;;  %v1304_v46 = vsel %vm101_vm0, %v1296_v20, 0.0  ;;  %v5178_v30 = vpack.c.bf16 %v545_v19, %v544_v63  ;;  %v1405_v20 = vld [vmem:[%s7400_s1 + $0x88] sm:$0xff]  ;;  %v1406_v40 = vld [vmem:[%s7400_s1 + $0x90] sm:$0xff] }
 0x50d   :  { %v1285_v21 = vmul.f32 0.03125, %v1273_v23  ;;  %v1270_v53 = vpop.xlane.xlu1 %1269  ;;  %1305 = vadd.xlane.f32.xlu1 %v1304_v46  ;;  %v1299_v42 = vmul.f32 %v6209_v48, %v6209_v48  ;;  %v6268_v23 = vpack.c.bf16 %v1406_v40, %v1405_v20  ;;  %v6273_v46 = vld [vmem:[%s7400_s1 + $0x80] ss:$0 sm:$0xff] }
 0x50e   :  { %v1284_v59 = vmul.f32 0.03125, %v1270_v53  ;;  %v1298_v34 = vmul.f32 %v6213_v1, %v6213_v1 }
 0x50f   :  { %v6221_v58 = vsub.f32 %v6131_v41, %v1285_v21  ;;  %v1313_v22 = vsel %vm101_vm0, %v1299_v42, 0.0 }
 0x510   :  { %v6225_v51 = vsub.f32 %v6134_v54, %v1284_v59  ;;  %1314 = vadd.xlane.f32.xlu0 %v1313_v22  ;;  %v1279_v62 = vpop.xlane.xlu0 %1278  ;;  %v1310_v61 = vsel %vm101_vm0, %v1298_v34, 0.0 }
 0x511   :  { %v1287_v8 = vmul.f32 0.03125, %v1279_v62  ;;  %v1276_v43 = vpop.xlane.xlu1 %1275  ;;  %1311 = vadd.xlane.f32.xlu1 %v1310_v61  ;;  %v1301_v14 = vmul.f32 %v6221_v58, %v6221_v58 }
 0x512   :  { %v1286_v6 = vmul.f32 0.03125, %v1276_v43  ;;  %v1300_v41 = vmul.f32 %v6225_v51, %v6225_v51 }
 0x513   :  { %v6233_v24 = vsub.f32 %v6141_v55, %v1287_v8  ;;  %v1319_v54 = vsel %vm101_vm0, %v1301_v14, 0.0 }
 0x514   :  { %v6237_v35 = vsub.f32 %v6144_v4, %v1286_v6  ;;  %1320 = vadd.xlane.f32.xlu0 %v1319_v54  ;;  %v1316_v5 = vsel %vm101_vm0, %v1300_v41, 0.0  ;;  %v542_v4 = vld [vmem:[%s7400_s1 + $0x30] sm:$0xff] }
 0x515   :  { %1317 = vadd.xlane.f32.xlu1 %v1316_v5  ;;  %v1303_v60 = vmul.f32 %v6233_v24, %v6233_v24  ;;  %v5174_v9 = vpack.c.bf16 %v543_v25, %v542_v4 }
 0x516   :  { %v1302_v31 = vmul.f32 %v6237_v35, %v6237_v35 }
 0x517   :  { %v1325_v39 = vsel %vm101_vm0, %v1303_v60, 0.0  ;;  %5175 = vmatprep.subr.bf16.mxu1 %v5174_v9 }
 0x518   :  { %1326 = vadd.xlane.f32.xlu0 %v1325_v39  ;;  %v1322_v55 = vsel %vm101_vm0, %v1302_v31, 0.0  ;;  %5177 = vmatpush3.bf16.msra.mxu1 %v5174_v9 }
 0x519   :  { %1323 = vadd.xlane.f32.xlu1 %v1322_v55  ;;  %5179 = vmatprep.subr.bf16.mxu1 %v5178_v30 }
 0x51c   :  { %5181 = vmatpush3.bf16.msra.mxu1 %v5178_v30 }
 0x51d   :  { %5191 = vmatprep.subr.bf16.mxu1 %v6268_v23 }
 0x52a   :  { %496 = vrot.lane.b32.xlu1 %v6068_v57, %s5623_s27 }
 0x52e   :  { %507 = vrot.lane.b32.xlu0 %v6068_v57, %s5624_s0  ;;  %1410 = vrot.lane.b32.xlu1 %v6273_v46, %s5623_s27 }
 0x532   :  { %546 = vrot.lane.b32.xlu1 %v6068_v57, %s5626_s4 }
 0x564   :  { %v444_v53 = vpop.xlane.xlu0 %443 }
 0x565   :  { %v441_v21 = vpop.xlane.xlu1 %440  ;;  %v464_v62 = vmul.f32 0.03125, %v444_v53 }
 0x566   :  { %v463_v61 = vmul.f32 0.03125, %v441_v21 }
 0x567   :  { %v472_v6 = vadd.f32 1e-05, %v464_v62 }
 0x568   :  { %v471_v5 = vadd.f32 1e-05, %v463_v61 }
 0x569   :  { %v447_v42 = vpop.xlane.xlu1 %446  ;;  %5348 = vrsqrt.f32 %v472_v6 }
 0x56a   :  { %v465_v8 = vmul.f32 0.03125, %v447_v42  ;;  %5350 = vrsqrt.f32 %v471_v5 }
 0x56c   :  { %v473_v31 = vadd.f32 1e-05, %v465_v8 }
 0x56d   :  { %v450_v59 = vpop.xlane.xlu0 %449  ;;  %v453_v34 = vpop.xlane.xlu1 %452 }
 0x56e   :  { %v467_v14 = vmul.f32 0.03125, %v453_v34  ;;  %v466_v41 = vmul.f32 0.03125, %v450_v59  ;;  %5352 = vrsqrt.f32 %v473_v31 }
 0x570   :  { %v475_v55 = vadd.f32 1e-05, %v467_v14  ;;  %v474_v4 = vadd.f32 1e-05, %v466_v41 }
 0x571   :  { %v456_v22 = vpop.xlane.xlu0 %455  ;;  %v459_v43 = vpop.xlane.xlu1 %458 }
 0x572   :  { %v469_v60 = vmul.f32 0.03125, %v459_v43  ;;  %v468_v39 = vmul.f32 0.03125, %v456_v22  ;;  %5354 = vrsqrt.f32 %v475_v55  ;;  %v1408_v55 = vld [vmem:[%s7400_s1 + $0xa0] sm:$0xff] }
 0x573   :  { %5356 = vrsqrt.f32 %v474_v4  ;;  %v5349_v22 = vpop.eup %5348 }
 0x574   :  { %v477_v25 = vadd.f32 1e-05, %v469_v60  ;;  %v476_v63 = vadd.f32 1e-05, %v468_v39  ;;  %v5351_v61 = vpop.eup %5350  ;;  %v1407_v39 = vld [vmem:[%s7400_s1 + $0x98] sm:$0xff] }
 0x575   :  { %v462_v54 = vpop.xlane.xlu0 %461 }
 0x576   :  { %v470_v57 = vmul.f32 0.03125, %v462_v54  ;;  %5358 = vrsqrt.f32 %v477_v25 }
 0x577   :  { %5360 = vrsqrt.f32 %v476_v63 }
 0x578   :  { %v478_v9 = vadd.f32 1e-05, %v470_v57  ;;  %v5353_v43 = vpop.eup %5352 }
 0x57a   :  { %5362 = vrsqrt.f32 %v478_v9 }
 0x57c   :  { %v5355_v41 = vpop.eup %5354 }
 0x57d   :  { %v5357_v60 = vpop.eup %5356 }
 0x580   :  { %v5359_v57 = vpop.eup %5358 }
 0x581   :  { %v5361_v63 = vpop.eup %5360 }
 0x599   :  { %v1309_v19 = vpop.xlane.xlu0 %1308 }
 0x59a   :  { %v1329_v30 = vmul.f32 0.03125, %v1309_v19  ;;  %v1306_v20 = vpop.xlane.xlu1 %1305 }
 0x59b   :  { %v1328_v40 = vmul.f32 0.03125, %v1306_v20  ;;  %v5363_v20 = vpop.eup %5362 }
 0x59c   :  { %v1337_v21 = vadd.f32 1e-05, %v1329_v30 }
 0x59d   :  { %v1336_v53 = vadd.f32 1e-05, %v1328_v40  ;;  %v1315_v42 = vpop.xlane.xlu0 %1314 }
 0x59e   :  { %5364 = vrsqrt.f32 %v1337_v21  ;;  %v1312_v59 = vpop.xlane.xlu1 %1311  ;;  %v1331_v34 = vmul.f32 0.03125, %v1315_v42  ;;  %v488_v21 = vmul.f32 %v5349_v22, %v6151_v49 }
 0x59f   :  { %5366 = vrsqrt.f32 %v1336_v53  ;;  %v1330_v62 = vmul.f32 0.03125, %v1312_v59  ;;  %v6287_v53 = vpack.c.bf16 %v1408_v55, %v1407_v39  ;;  %v492_v39 = vmul.f32 %v5361_v63, %v6182_v0 }
 0x5a0   :  { %v1339_v54 = vadd.f32 1e-05, %v1331_v34  ;;  %v487_v34 = vmul.f32 %v5351_v61, %v6154_v36 }
 0x5a1   :  { %v1321_v8 = vpop.xlane.xlu0 %1320  ;;  %v1338_v31 = vadd.f32 1e-05, %v1330_v62  ;;  %v489_v62 = vmul.f32 %v5353_v43, %v6162_v18 }
 0x5a2   :  { %v1333_v14 = vmul.f32 0.03125, %v1321_v8  ;;  %v1318_v6 = vpop.xlane.xlu1 %1317  ;;  %5368 = vrsqrt.f32 %v1339_v54  ;;  %v493_v54 = vmul.f32 %v5359_v57, %v6179_v56 }
 0x5a3   :  { %v1332_v5 = vmul.f32 0.03125, %v1318_v6  ;;  %5370 = vrsqrt.f32 %v1338_v31  ;;  %v491_v6 = vmul.f32 %v5355_v41, %v6168_v2  ;;  %v494_v31 = vmul.f32 %v5363_v20, %v6191_v47 }
 0x5a4   :  { %v1341_v4 = vadd.f32 1e-05, %v1333_v14  ;;  %v490_v14 = vmul.f32 %v5357_v60, %v6171_v11 }
 0x5a5   :  { %v1327_v25 = vpop.xlane.xlu0 %1326  ;;  %v1340_v9 = vadd.f32 1e-05, %v1332_v5 }
 0x5a6   :  { %v1335_v19 = vmul.f32 0.03125, %v1327_v25  ;;  %v1324_v30 = vpop.xlane.xlu1 %1323  ;;  %5372 = vrsqrt.f32 %v1341_v4 }
 0x5a7   :  { %v1334_v40 = vmul.f32 0.03125, %v1324_v30  ;;  %5374 = vrsqrt.f32 %v1340_v9 }
 0x5a8   :  { %v5365_v42 = vpop.eup %5364  ;;  %v1343_v59 = vadd.f32 1e-05, %v1335_v19 }
 0x5a9   :  { %v5367_v8 = vpop.eup %5366  ;;  %v1342_v5 = vadd.f32 1e-05, %v1334_v40  ;;  %v508_v22 = vpop.permute.xlu0 %507  ;;  %v1353_v36 = vmul.f32 %v5365_v42, %v6199_v50 }
 0x5aa   :  { %v497_v49 = vpop.permute.xlu1 %496  ;;  %5376 = vrsqrt.f32 %v1343_v59  ;;  %v1352_v2 = vmul.f32 %v5367_v8, %v6202_v7 }
 0x5ab   :  { %v499_v61 = vmul.f32 %v497_v49, %v487_v34  ;;  %v500_v18 = vmul.f32 %v497_v49, %v488_v21  ;;  %v501_v43 = vmul.f32 %v497_v49, %v489_v62  ;;  %v502_v55 = vmul.f32 %v497_v49, %v490_v14 }
 0x5ac   :  { %v503_v11 = vmul.f32 %v497_v49, %v491_v6  ;;  %v504_v57 = vmul.f32 %v497_v49, %v492_v39  ;;  %5378 = vrsqrt.f32 %v1342_v5  ;;  %v505_v0 = vmul.f32 %v497_v49, %v493_v54  ;;  %v5369_v30 = vpop.eup %5368 }
 0x5ad   :  { %v510_v41 = vadd.f32 %v508_v22, %v499_v61  ;;  %v511_v56 = vadd.f32 %v508_v22, %v500_v18  ;;  %v512_v60 = vadd.f32 %v508_v22, %v501_v43  ;;  %v513_v4 = vadd.f32 %v508_v22, %v502_v55  ;;  %v5371_v21 = vpop.eup %5370 }
 0x5ae   :  { %v514_v25 = vadd.f32 %v508_v22, %v503_v11  ;;  %v506_v19 = vmul.f32 %v497_v49, %v494_v31  ;;  %v515_v7 = vadd.f32 %v508_v22, %v504_v57  ;;  %v516_v59 = vadd.f32 %v508_v22, %v505_v0 }
 0x5af   :  { %vm518_vm2 = vcmp.ge.f32.partialorder %v510_v41, 0.0  ;;  %v526_v47 = vmul.f32 0.01, %v510_v41  ;;  %vm519_vm3 = vcmp.ge.f32.partialorder %v511_v56, 0.0  ;;  %v527_v50 = vmul.f32 0.01, %v511_v56 }
 0x5b0   :  { %vm520_vm4 = vcmp.ge.f32.partialorder %v512_v60, 0.0  ;;  %v528_v63 = vmul.f32 0.01, %v512_v60  ;;  %v529_v9 = vmul.f32 0.01, %v513_v4  ;;  %vm521_vm5 = vcmp.ge.f32.partialorder %v513_v4, 0.0  ;;  %v5373_v34 = vpop.eup %5372 }
 0x5b1   :  { %v534_v20 = vsel %vm518_vm2, %v510_v41, %v526_v47  ;;  %v535_v40 = vsel %vm519_vm3, %v511_v56, %v527_v50  ;;  %v530_v42 = vmul.f32 0.01, %v514_v25  ;;  %vm522_vm6 = vcmp.ge.f32.partialorder %v514_v25, 0.0  ;;  %v5375_v8 = vpop.eup %5374 }
 0x5b2   :  { %4906 = vmatprep.mubr.msk.f32.mxu1 %vm101_vm0, %v534_v20  ;;  %v536_v62 = vsel %vm520_vm4, %v512_v60, %v528_v63  ;;  %v537_v14 = vsel %vm521_vm5, %v513_v4, %v529_v9  ;;  %v1360_v6 = vmul.f32 %v1352_v2, %v6005_v52  ;;  %v531_v54 = vmul.f32 0.01, %v515_v7 }
 0x5b3   :  { %4907 = vmatmul.mubr.msk.f32.vlgmr.msra.gmra.mrb[0].mxu1 %vm101_vm0, %v535_v40  ;;  %v517_v5 = vadd.f32 %v508_v22, %v506_v19  ;;  %v1361_v49 = vmul.f32 %v1353_v36, %v6005_v52  ;;  %v1354_v39 = vmul.f32 %v5371_v21, %v6213_v1  ;;  %v538_v61 = vsel %vm522_vm6, %v514_v25, %v530_v42 }
 0x5b4   :  { %5193 = vmatpush3.bf16.msra.mxu1 %v6268_v23  ;;  %4909 = vmatprep.mubr.msk.f32.mxu1 %vm101_vm0, %v536_v62  ;;  %v5377_v31 = vpop.eup %5376  ;;  %vm523_vm7 = vcmp.ge.f32.partialorder %v515_v7, 0.0  ;;  %v532_v18 = vmul.f32 0.01, %v516_v59  ;;  %v1355_v43 = vmul.f32 %v5369_v30, %v6209_v48  ;;  %vm524_vm8 = vcmp.ge.f32.partialorder %v516_v59, 0.0 }
 0x5b5   :  { %5195 = vmatprep.subr.bf16.mxu1 %v6287_v53  ;;  %v1373_v23 = vadd.f32 %v6273_v46, %v1360_v6  ;;  %v1362_v55 = vmul.f32 %v1354_v39, %v6005_v52  ;;  %v1356_v11 = vmul.f32 %v5375_v8, %v6225_v51  ;;  %v539_v1 = vsel %vm523_vm7, %v515_v7, %v531_v54 }
 0x5b6   :  { %v5379_v22 = vpop.eup %5378  ;;  %v533_v36 = vmul.f32 0.01, %v517_v5  ;;  %v1374_v2 = vadd.f32 %v6273_v46, %v1361_v49  ;;  %v540_v41 = vsel %vm524_vm8, %v516_v59, %v532_v18  ;;  %vm525_vm9 = vcmp.ge.f32.partialorder %v517_v5, 0.0 }
 0x5b7   :  { %4910 = vmatmul.mubr.msk.f32.gmra.mrb[2].mxu1 %vm101_vm0, %v537_v14  ;;  %v1363_v48 = vmul.f32 %v1355_v43, %v6005_v52  ;;  %v1357_v56 = vmul.f32 %v5373_v34, %v6221_v58  ;;  %v1389_v60 = vmul.f32 0.01, %v1373_v23  ;;  %v1375_v51 = vadd.f32 %v6273_v46, %v1362_v55  ;;  %v1411_v55 = vpop.permute.xlu1 %1410 }
 0x5b8   :  { %4912 = vmatprep.mubr.msk.f32.mxu1 %vm101_vm0, %v538_v61  ;;  %5197 = vmatpush3.bf16.msra.mxu1 %v6287_v53  ;;  %v1364_v57 = vmul.f32 %v1356_v11, %v6005_v52  ;;  %v1358_v4 = vmul.f32 %v5379_v22, %v6237_v35  ;;  %vm1381_vm10 = vcmp.ge.f32.partialorder %v1373_v23, 0.0  ;;  %v541_v53 = vsel %vm525_vm9, %v517_v5, %v533_v36 }
 0x5b9   :  { %vm1382_vm11 = vcmp.ge.f32.partialorder %v1374_v2, 0.0  ;;  %v1390_v25 = vmul.f32 0.01, %v1374_v2  ;;  %v1376_v0 = vadd.f32 %v6273_v46, %v1363_v48  ;;  %v1365_v47 = vmul.f32 %v1357_v56, %v6005_v52 }
 0x5ba   :  { %v1359_v58 = vmul.f32 %v5377_v31, %v6233_v24  ;;  %v1397_v50 = vsel %vm1381_vm10, %v1373_v23, %v1389_v60  ;;  %v1391_v63 = vmul.f32 0.01, %v1375_v51  ;;  %v1377_v9 = vadd.f32 %v6273_v46, %v1364_v57 }
 0x5bb   :  { %4913 = vmatmul.mubr.msk.f32.gmra.mrb[4].mxu1 %vm101_vm0, %v539_v1  ;;  %v1366_v35 = vmul.f32 %v1358_v4, %v6005_v52  ;;  %vm1383_vm12 = vcmp.ge.f32.partialorder %v1375_v51, 0.0  ;;  %v1398_v19 = vsel %vm1382_vm11, %v1374_v2, %v1390_v25  ;;  %v1392_v30 = vmul.f32 0.01, %v1376_v0 }
 0x5bc   :  { %4915 = vmatprep.mubr.msk.f32.mxu1 %vm101_vm0, %v540_v41  ;;  %v1378_v20 = vadd.f32 %v6273_v46, %v1365_v47  ;;  %v1367_v40 = vmul.f32 %v1359_v58, %v6005_v52  ;;  %v1399_v24 = vsel %vm1383_vm12, %v1375_v51, %v1391_v63  ;;  %vm1384_vm13 = vcmp.ge.f32.partialorder %v1376_v0, 0.0  ;;  %v6373_v63 = vpop.permute.xlu1 %546 }
 0x5bd   :  { %v1393_v7 = vmul.f32 0.01, %v1377_v9  ;;  %v1379_v21 = vadd.f32 %v6273_v46, %v1366_v35  ;;  %vm1385_vm14 = vcmp.ge.f32.partialorder %v1377_v9, 0.0  ;;  %v1400_v42 = vsel %vm1384_vm13, %v1376_v0, %v1392_v30 }
 0x5be   :  { %v1394_v59 = vmul.f32 0.01, %v1378_v20  ;;  %v1380_v34 = vadd.f32 %v6273_v46, %v1367_v40  ;;  %vm1386_vm15 = vcmp.ge.f32.partialorder %v1378_v20, 0.0  ;;  %vm5628_vm3 = vmmov 0  }
 0x5bf   :  { %4916 = vmatmul.mubr.msk.f32.gmra.mrb[6].mxu1 %vm101_vm0, %v541_v53  ;;  %v1401_v62 = vsel %vm1385_vm14, %v1377_v9, %v1393_v7  ;;  %v1395_v8 = vmul.f32 0.01, %v1379_v21  ;;  %vm1387_vm1 = vcmp.ge.f32.partialorder %v1379_v21, 0.0  ;;  %vm1971_vm14 = vcmask 785408  }
 0x5c0   :  { %4946 = vmatprep.mubr.msk.f32.mxu1 %vm101_vm0, %v1397_v50  ;;  %v1402_v52 = vsel %vm1386_vm15, %v1378_v20, %v1394_v59  ;;  %v1396_v14 = vmul.f32 0.01, %v1380_v34  ;;  %vm1388_vm2 = vcmp.ge.f32.partialorder %v1380_v34, 0.0  ;;  %v1980_v59 = vld [vmem:[%s7400_s1 + $0xf0] sm:$0xff] }
 0x5c1   :  { %v1403_v6 = vsel %vm1387_vm1, %v1379_v21, %v1395_v8  ;;  %v5627_v8 = vmov 0.0|0.0  }
 0x5c2   :  { %v1404_v54 = vsel %vm1388_vm2, %v1380_v34, %v1396_v14  ;;  %v1981_v34 = vld [vmem:[%s7400_s1 + $0xf8] sm:$0xff]  ;;  %5214 = vmatprep.subr.bf16.mxu1 %v5627_v8  ;;  %v1983_v14 = vld [vmem:[%s7400_s1 + $0x108] sm:$0xff] }
 0x5c3   :  { %4947 = vmatmul.mubr.msk.f32.vlgmr.msra.gmra.mrb[8].mxu1 %vm101_vm0, %v1398_v19 }
 0x5c4   :  { %4949 = vmatprep.mubr.msk.f32.mxu1 %vm101_vm0, %v1399_v24 }
 0x5c7   :  { %4950 = vmatmul.mubr.msk.f32.gmra.mrb[10].mxu1 %vm101_vm0, %v1400_v42 }
 0x5c8   :  { %4952 = vmatprep.mubr.msk.f32.mxu1 %vm101_vm0, %v1401_v62  ;;  %v1982_v62 = vld [vmem:[%s7400_s1 + $0x100] sm:$0xff] }
 0x5cb   :  { %4953 = vmatmul.mubr.msk.f32.gmra.mrb[12].mxu1 %vm101_vm0, %v1402_v52  ;;  %v6399_v52 = vpack.c.bf16 %v1981_v34, %v1980_v59 }
 0x5cc   :  { %4955 = vmatprep.mubr.msk.f32.mxu1 %vm101_vm0, %v1403_v6  ;;  %v5629_v6 = vmov 0.0  }
 0x5cd   :  { %5216 = vmatpush3.bf16.msra.mxu1 %v6399_v52 }
 0x5ce   :  { %5217 = vmatprep.subr.bf16.mxu1 %v5627_v8 }
 0x5cf   :  { %4956 = vmatmul.mubr.msk.f32.gmra.mrb[14].mxu1 %vm101_vm0, %v1404_v54  ;;  %v6407_v54 = vpack.c.bf16 %v1983_v14, %v1982_v62 }
 0x5d0   :  { %5006 = vmatprep.mubr.msk.f32.mxu1 %vm5628_vm3, %v5629_v6 }
 0x5d1   :  { %5219 = vmatpush3.bf16.msra.mxu1 %v6407_v54 }
 0x5d2   :  { %5220 = vmatprep.subr.bf16.mxu1 %v5627_v8 }
 0x5d4   :  { %5007 = vmatmul.mubr.f32.vlgmr.msra.gmra.mrb[16].mxu1 %v5629_v6 }
 0x5d5   :  { %5222 = vmatpush3.bf16.msra.mxu1 %v6399_v52  ;;  %5017 = vmatprep.mubr.msk.f32.mxu1 %vm5628_vm3, %v5629_v6 }
 0x5d6   :  { %5223 = vmatprep.subr.bf16.mxu1 %v5627_v8 }
 0x5d9   :  { %5225 = vmatpush3.bf16.msra.mxu1 %v6407_v54 }
 0x5da   :  { %5226 = vmatprep.subr.bf16.mxu1 %v5627_v8 }
 0x686   :  { %v4908_v5 = vpop.f32.mrb[0].mxu1 }
 0x687   :  { %v639_v49 = vpop.f32.mrb[1].mxu1  ;;  %v645_v24 = vadd.f32 %v4908_v5, %v6373_v63 }
 0x688   :  { %v640_v19 = vadd.f32 %v639_v49, %v6373_v63 }
 0x689   :  { %v681_v42 = vsel %vm101_vm0, %v645_v24, 0.0 }
 0x68a   :  { %v6339_v39 = vpop.f32.mrb[2].mxu1  ;;  %v678_v21 = vsel %vm101_vm0, %v640_v19, 0.0 }
 0x68b   :  { %v6341_v31 = vpop.f32.mrb[3].mxu1 }
 0x68e   :  { %v6343_v61 = vpop.f32.mrb[4].mxu1 }
 0x68f   :  { %v6345_v18 = vpop.f32.mrb[5].mxu1 }
 0x692   :  { %v6347_v43 = vpop.f32.mrb[6].mxu1 }
 0x693   :  { %v6349_v23 = vpop.f32.mrb[7].mxu1 }
 0x696   :  { %v4948_v11 = vpop.f32.mrb[8].mxu1 }
 0x697   :  { %v6351_v22 = vadd.f32 %v4948_v11, %v1411_v55  ;;  %v1503_v1 = vpop.f32.mrb[9].mxu1 }
 0x698   :  { %v6353_v36 = vadd.f32 %v1503_v1, %v1411_v55 }
 0x699   :  { %v1545_v2 = vsel %vm101_vm0, %v6351_v22, 0.0 }
 0x69a   :  { %1546 = vadd.xlane.f32.xlu1 %v1545_v2  ;;  %v4951_v41 = vpop.f32.mrb[10].mxu1  ;;  %v1542_v48 = vsel %vm101_vm0, %v6353_v36, 0.0 }
 0x69b   :  { %v1513_v56 = vpop.f32.mrb[11].mxu1  ;;  %1543 = vadd.xlane.f32.xlu0 %v1542_v48  ;;  %v6361_v51 = vadd.f32 %v4951_v41, %v1411_v55 }
 0x69c   :  { %v6359_v60 = vadd.f32 %v1513_v56, %v1411_v55 }
 0x69d   :  { %v1551_v50 = vsel %vm101_vm0, %v6361_v51, 0.0 }
 0x69e   :  { %v4954_v57 = vpop.f32.mrb[12].mxu1  ;;  %v1548_v4 = vsel %vm101_vm0, %v6359_v60, 0.0 }
 0x69f   :  { %v1523_v53 = vpop.f32.mrb[13].mxu1  ;;  %1549 = vadd.xlane.f32.xlu0 %v1548_v4  ;;  %v6367_v0 = vadd.f32 %v4954_v57, %v1411_v55 }
 0x6a0   :  { %v6365_v25 = vadd.f32 %v1523_v53, %v1411_v55 }
 0x6a1   :  { %v1557_v40 = vsel %vm101_vm0, %v6367_v0, 0.0 }
 0x6a2   :  { %v4957_v47 = vpop.f32.mrb[14].mxu1  ;;  %v1554_v58 = vsel %vm101_vm0, %v6365_v25, 0.0 }
 0x6a3   :  { %v1533_v9 = vpop.f32.mrb[15].mxu1  ;;  %1555 = vadd.xlane.f32.xlu1 %v1554_v58  ;;  %1552 = vadd.xlane.f32.xlu0 %v1551_v50  ;;  %v6378_v30 = vadd.f32 %v4957_v47, %v1411_v55 }
 0x6a4   :  { %v6375_v35 = vadd.f32 %v1533_v9, %v1411_v55 }
 0x6a5   :  { %v1563_v7 = vsel %vm101_vm0, %v6378_v30, 0.0 }
 0x6a6   :  { %v1560_v20 = vsel %vm101_vm0, %v6375_v35, 0.0 }
 0x6a7   :  { %1561 = vadd.xlane.f32.xlu1 %v1560_v20  ;;  %1558 = vadd.xlane.f32.xlu0 %v1557_v40 }
 0x6ab   :  { %1564 = vadd.xlane.f32.xlu0 %v1563_v7  ;;  %679 = vadd.xlane.f32.xlu1 %v678_v21 }
 0x6af   :  { %682 = vadd.xlane.f32.xlu0 %v681_v42 }
 0x727   :  { %v1547_v49 = vpop.xlane.xlu1 %1546 }
 0x728   :  { %v1544_v5 = vpop.xlane.xlu0 %1543  ;;  %v1567_v53 = vmul.f32 0.03125, %v1547_v49 }
 0x729   :  { %v1566_v48 = vmul.f32 0.03125, %v1544_v5 }
 0x72a   :  { %v6427_v7 = vsub.f32 %v6351_v22, %v1567_v53 }
 0x72b   :  { %v6420_v47 = vsub.f32 %v6353_v36, %v1566_v48 }
 0x72c   :  { %v1550_v55 = vpop.xlane.xlu0 %1549 }
 0x72d   :  { %v1568_v58 = vmul.f32 0.03125, %v1550_v55  ;;  %v1582_v59 = vmul.f32 %v6420_v47, %v6420_v47 }
 0x72f   :  { %v6430_v21 = vsub.f32 %v6359_v60, %v1568_v58  ;;  %v1590_v22 = vsel %vm101_vm0, %v1582_v59, 0.0  ;;  %v1583_v60 = vmul.f32 %v6427_v7, %v6427_v7 }
 0x730   :  { %v1556_v11 = vpop.xlane.xlu1 %1555  ;;  %v1553_v1 = vpop.xlane.xlu0 %1552 }
 0x731   :  { %v1569_v42 = vmul.f32 0.03125, %v1553_v1  ;;  %v1570_v36 = vmul.f32 0.03125, %v1556_v11  ;;  %v1584_v5 = vmul.f32 %v6430_v21, %v6430_v21 }
 0x733   :  { %v6440_v14 = vsub.f32 %v6361_v51, %v1569_v42  ;;  %v1593_v51 = vsel %vm101_vm0, %v1583_v60, 0.0  ;;  %v1596_v1 = vsel %vm101_vm0, %v1584_v5, 0.0  ;;  %v1697_v42 = vld [vmem:[%s7400_s1 + $0xd0] sm:$0xff] }
 0x734   :  { %v1562_v2 = vpop.xlane.xlu1 %1561  ;;  %v1559_v41 = vpop.xlane.xlu0 %1558  ;;  %v1693_v60 = vld [vmem:[%s7400_s1 + $0xb0] sm:$0xff] }
 0x735   :  { %v1572_v49 = vmul.f32 0.03125, %v1562_v2  ;;  %v1571_v55 = vmul.f32 0.03125, %v1559_v41  ;;  %v1585_v48 = vmul.f32 %v6440_v14, %v6440_v14 }
 0x737   :  { %v1599_v41 = vsel %vm101_vm0, %v1585_v48, 0.0 }
 0x738   :  { %v1565_v56 = vpop.xlane.xlu0 %1564  ;;  %v680_v57 = vpop.xlane.xlu1 %679 }
 0x739   :  { %v702_v4 = vmul.f32 0.03125, %v680_v57  ;;  %v6456_v57 = vsub.f32 %v6375_v35, %v1572_v49  ;;  %v6505_v49 = vld [vmem:[%s7400_s1 + $0x110] ss:$0 sm:$0xff] }
 0x73b   :  { %v6422_v50 = vsub.f32 %v640_v19, %v702_v4  ;;  %v6459_v4 = vsub.f32 %v6367_v0, %v1571_v55  ;;  %v1588_v0 = vmul.f32 %v6456_v57, %v6456_v57 }
 0x73c   :  { %v683_v9 = vpop.xlane.xlu0 %682 }
 0x73d   :  { %v703_v20 = vmul.f32 0.03125, %v683_v9  ;;  %v718_v40 = vmul.f32 %v6422_v50, %v6422_v50  ;;  %v1587_v35 = vmul.f32 %v6459_v4, %v6459_v4  ;;  %v1608_v9 = vsel %vm101_vm0, %v1588_v0, 0.0 }
 0x73f   :  { %v6434_v34 = vsub.f32 %v645_v24, %v703_v20  ;;  %v726_v19 = vsel %vm101_vm0, %v718_v40, 0.0  ;;  %v6448_v24 = vsub.f32 %v6365_v25, %v1570_v36  ;;  %v1573_v25 = vmul.f32 0.03125, %v1565_v56  ;;  %v1696_v40 = vld [vmem:[%s7400_s1 + $0xc8] sm:$0xff]  ;;  %v1698_v36 = vld [vmem:[%s7400_s1 + $0xd8] sm:$0xff] }
 0x740   :  { %727 = vadd.xlane.f32.xlu1 %v726_v19  ;;  %v1605_v56 = vsel %vm101_vm0, %v1587_v35, 0.0  ;;  %v5198_v59 = vpack.c.bf16 %v1697_v42, %v1696_v40  ;;  %v1699_v19 = vld [vmem:[%s7400_s1 + $0xe0] sm:$0xff] }
 0x741   :  { %v719_v62 = vmul.f32 %v6434_v34, %v6434_v34  ;;  %v1586_v2 = vmul.f32 %v6448_v24, %v6448_v24  ;;  %v6465_v53 = vsub.f32 %v6378_v30, %v1573_v25 }
 0x742   :  { %5199 = vmatprep.subr.bf16.mxu0 %v5198_v59 }
 0x743   :  { %v729_v11 = vsel %vm101_vm0, %v719_v62, 0.0  ;;  %v1602_v58 = vsel %vm101_vm0, %v1586_v2, 0.0  ;;  %v1589_v20 = vmul.f32 %v6465_v53, %v6465_v53  ;;  %v5202_v62 = vpack.c.bf16 %v1699_v19, %v1698_v36  ;;  %5201 = vmatpush3.bf16.msra.mxu0 %v5198_v59 }
 0x744   :  { %730 = vadd.xlane.f32.xlu0 %v729_v11  ;;  %1591 = vadd.xlane.f32.xlu1 %v1590_v22  ;;  %v1692_v22 = vld [vmem:[%s7400_s1 + $0xa8] sm:$0xff] }
 0x745   :  { %v1611_v30 = vsel %vm101_vm0, %v1589_v20, 0.0  ;;  %5203 = vmatprep.subr.bf16.mxu0 %v5202_v62  ;;  %v6499_v5 = vpack.c.bf16 %v1693_v60, %v1692_v22 }
 0x747   :  { %5205 = vmatpush3.bf16.msra.mxu0 %v5202_v62 }
 0x748   :  { %1594 = vadd.xlane.f32.xlu0 %v1593_v51  ;;  %1597 = vadd.xlane.f32.xlu1 %v1596_v1 }
 0x749   :  { %5207 = vmatprep.subr.bf16.mxu0 %v6499_v5 }
 0x74c   :  { %1600 = vadd.xlane.f32.xlu0 %v1599_v41  ;;  %1603 = vadd.xlane.f32.xlu1 %v1602_v58 }
 0x750   :  { %1606 = vadd.xlane.f32.xlu0 %v1605_v56  ;;  %1609 = vadd.xlane.f32.xlu1 %v1608_v9 }
 0x754   :  { %1612 = vadd.xlane.f32.xlu0 %v1611_v30 }
 0x761   :  { %1646 = vrot.lane.b32.xlu1 %v6273_v46, %s5624_s0 }
 0x76a   :  { %1657 = vrot.lane.b32.xlu0 %v6273_v46, %s5626_s4  ;;  %v2059_v46 = vpop.f32.mrb[16].mxu1 }
 0x76b   :  { %v6508_v55 = vadd.f32 %v6505_v49, %v2059_v46  ;;  %v5008_v11 = vpop.f32.mrb[17].mxu1 }
 0x76d   :  { %2071 = vrot.lane.b32.xlu1 %v6508_v55, %s5624_s0 }
 0x7cd   :  { %v728_v51 = vpop.xlane.xlu1 %727 }
 0x7ce   :  { %v750_v41 = vmul.f32 0.03125, %v728_v51 }
 0x7d0   :  { %v758_v40 = vadd.f32 1e-05, %v750_v41 }
 0x7d1   :  { %v731_v1 = vpop.xlane.xlu0 %730  ;;  %v1592_v48 = vpop.xlane.xlu1 %1591 }
 0x7d2   :  { %v1614_v25 = vmul.f32 0.03125, %v1592_v48  ;;  %v751_v9 = vmul.f32 0.03125, %v731_v1 }
 0x7d4   :  { %v1622_v2 = vadd.f32 1e-05, %v1614_v25  ;;  %v759_v62 = vadd.f32 1e-05, %v751_v9 }
 0x7d5   :  { %v1595_v58 = vpop.xlane.xlu0 %1594  ;;  %v1598_v35 = vpop.xlane.xlu1 %1597 }
 0x7d6   :  { %v1615_v0 = vmul.f32 0.03125, %v1595_v58  ;;  %v1616_v56 = vmul.f32 0.03125, %v1598_v35  ;;  %5380 = vrsqrt.f32 %v1622_v2 }
 0x7d8   :  { %v1623_v20 = vadd.f32 1e-05, %v1615_v0  ;;  %v1624_v30 = vadd.f32 1e-05, %v1616_v56 }
 0x7d9   :  { %v1601_v42 = vpop.xlane.xlu0 %1600  ;;  %v1604_v59 = vpop.xlane.xlu1 %1603 }
 0x7da   :  { %5382 = vrsqrt.f32 %v1623_v20  ;;  %v1617_v36 = vmul.f32 0.03125, %v1601_v42  ;;  %v1618_v19 = vmul.f32 0.03125, %v1604_v59 }
 0x7db   :  { %5384 = vrsqrt.f32 %v1624_v30 }
 0x7dc   :  { %v1625_v22 = vadd.f32 1e-05, %v1617_v36  ;;  %v1626_v60 = vadd.f32 1e-05, %v1618_v19  ;;  %5386 = vrsqrt.f32 %v758_v40 }
 0x7dd   :  { %v1607_v46 = vpop.xlane.xlu0 %1606  ;;  %v1610_v11 = vpop.xlane.xlu1 %1609 }
 0x7de   :  { %5388 = vrsqrt.f32 %v1625_v22  ;;  %v1619_v51 = vmul.f32 0.03125, %v1607_v46  ;;  %v1620_v48 = vmul.f32 0.03125, %v1610_v11 }
 0x7df   :  { %5390 = vrsqrt.f32 %v1626_v60 }
 0x7e0   :  { %5392 = vrsqrt.f32 %v759_v62  ;;  %v1627_v1 = vadd.f32 1e-05, %v1619_v51  ;;  %v1628_v25 = vadd.f32 1e-05, %v1620_v48  ;;  %v5381_v2 = vpop.eup %5380  ;;  %v1694_v51 = vld [vmem:[%s7400_s1 + $0xb8] sm:$0xff] }
 0x7e1   :  { %v1613_v41 = vpop.xlane.xlu0 %1612  ;;  %v6512_v58 = vpop.permute.xlu1 %1646  ;;  %v1638_v0 = vmul.f32 %v5381_v2, %v6420_v47 }
 0x7e2   :  { %5394 = vrsqrt.f32 %v1627_v1  ;;  %v1621_v35 = vmul.f32 0.03125, %v1613_v41 }
 0x7e3   :  { %5396 = vrsqrt.f32 %v1628_v25  ;;  %v1649_v20 = vmul.f32 %v6512_v58, %v1638_v0 }
 0x7e4   :  { %v5383_v56 = vpop.eup %5382  ;;  %v1629_v9 = vadd.f32 1e-05, %v1621_v35 }
 0x7e5   :  { %v5385_v30 = vpop.eup %5384  ;;  %v1639_v40 = vmul.f32 %v5383_v56, %v6427_v7  ;;  %v6517_v42 = vpop.permute.xlu0 %1657 }
 0x7e6   :  { %5398 = vrsqrt.f32 %v1629_v9  ;;  %v1660_v59 = vadd.f32 %v6517_v42, %v1649_v20  ;;  %v1640_v36 = vmul.f32 %v5385_v30, %v6430_v21  ;;  %v5387_v19 = vpop.eup %5386  ;;  %v1695_v21 = vld [vmem:[%s7400_s1 + $0xc0] sm:$0xff] }
 0x7e7   :  { %v1650_v62 = vmul.f32 %v6512_v58, %v1639_v40  ;;  %v774_v41 = vmul.f32 %v5387_v19, %v6422_v50  ;;  %v5210_v20 = vpack.c.bf16 %v1695_v21, %v1694_v51 }
 0x7e8   :  { %v5389_v22 = vpop.eup %5388  ;;  %vm1668_vm4 = vcmp.ge.f32.partialorder %v1660_v59, 0.0  ;;  %v1676_v47 = vmul.f32 0.01, %v1660_v59  ;;  %v1651_v60 = vmul.f32 %v6512_v58, %v1640_v36 }
 0x7e9   :  { %v5391_v46 = vpop.eup %5390  ;;  %v1661_v11 = vadd.f32 %v6517_v42, %v1650_v62  ;;  %v1641_v7 = vmul.f32 %v5389_v22, %v6440_v14  ;;  %v6546_v22 = vld [vmem:[%s7400_s1 + $0x50] ss:$0 sm:$0xff] }
 0x7ea   :  { %v5393_v48 = vpop.eup %5392  ;;  %v1684_v1 = vsel %vm1668_vm4, %v1660_v59, %v1676_v47  ;;  %v1662_v25 = vadd.f32 %v6517_v42, %v1651_v60  ;;  %v1642_v2 = vmul.f32 %v5391_v46, %v6448_v24  ;;  %v787_v47 = vmul.f32 %v6546_v22, %v774_v41 }
 0x7eb   :  { %4966 = vmatprep.mubr.msk.f32.mxu0 %vm101_vm0, %v1684_v1  ;;  %vm1669_vm5 = vcmp.ge.f32.partialorder %v1661_v11, 0.0  ;;  %v1677_v14 = vmul.f32 0.01, %v1661_v11  ;;  %v1652_v35 = vmul.f32 %v6512_v58, %v1641_v7  ;;  %v775_v40 = vmul.f32 %v5393_v48, %v6434_v34 }
 0x7ec   :  { %v5395_v0 = vpop.eup %5394  ;;  %vm1670_vm6 = vcmp.ge.f32.partialorder %v1662_v25, 0.0  ;;  %v1678_v56 = vmul.f32 0.01, %v1662_v25  ;;  %v1653_v9 = vmul.f32 %v6512_v58, %v1642_v2  ;;  %v799_v1 = vadd.f32 %v5709_v32, %v787_v47 }
 0x7ed   :  { %v5397_v30 = vpop.eup %5396  ;;  %v1685_v59 = vsel %vm1669_vm5, %v1661_v11, %v1677_v14  ;;  %v1663_v24 = vadd.f32 %v6517_v42, %v1652_v35  ;;  %v1643_v50 = vmul.f32 %v5395_v0, %v6459_v4  ;;  %v788_v21 = vmul.f32 %v6546_v22, %v775_v40  ;;  %v6576_v40 = vld [vmem:[%s7400_s1 + $0xe8] ss:$0 sm:$0xff] }
 0x7ee   :  { %4967 = vmatmul.mubr.msk.f32.vlgmr.msra.gmra.mrb[16].mxu0 %vm101_vm0, %v1685_v59  ;;  %v1686_v36 = vsel %vm1670_vm6, %v1662_v25, %v1678_v56  ;;  %v1664_v19 = vadd.f32 %v6517_v42, %v1653_v9  ;;  %v1644_v62 = vmul.f32 %v5397_v30, %v6456_v57  ;;  %v815_v56 = vmul.f32 0.01, %v799_v1 }
 0x7ef   :  { %5209 = vmatpush3.bf16.msra.mxu0 %v6499_v5  ;;  %4969 = vmatprep.mubr.msk.f32.mxu0 %vm101_vm0, %v1686_v36  ;;  %vm1671_vm7 = vcmp.ge.f32.partialorder %v1663_v24, 0.0  ;;  %v1679_v34 = vmul.f32 0.01, %v1663_v24  ;;  %v1654_v4 = vmul.f32 %v6512_v58, %v1643_v50  ;;  %v800_v35 = vadd.f32 %v5709_v32, %v788_v21 }
 0x7f0   :  { %v5399_v60 = vpop.eup %5398  ;;  %vm1672_vm8 = vcmp.ge.f32.partialorder %v1664_v19, 0.0  ;;  %v1680_v46 = vmul.f32 0.01, %v1664_v19  ;;  %5211 = vmatprep.subr.bf16.mxu0 %v5210_v20  ;;  %v1655_v57 = vmul.f32 %v6512_v58, %v1644_v62  ;;  %vm807_vm12 = vcmp.ge.f32.partialorder %v799_v1, 0.0 }
 0x7f1   :  { %v1687_v11 = vsel %vm1671_vm7, %v1663_v24, %v1679_v34  ;;  %v1665_v7 = vadd.f32 %v6517_v42, %v1654_v4  ;;  %v1645_v51 = vmul.f32 %v5399_v60, %v6465_v53  ;;  %v823_v30 = vsel %vm807_vm12, %v799_v1, %v815_v56  ;;  %v2072_v60 = vpop.permute.xlu1 %2071 }
 0x7f2   :  { %4970 = vmatmul.mubr.msk.f32.gmra.mrb[18].mxu0 %vm101_vm0, %v1687_v11  ;;  %v1688_v5 = vsel %vm1672_vm8, %v1664_v19, %v1680_v46  ;;  %v1666_v48 = vadd.f32 %v6517_v42, %v1655_v57  ;;  %vm808_vm13 = vcmp.ge.f32.partialorder %v800_v35, 0.0 }
 0x7f3   :  { %4972 = vmatprep.mubr.msk.f32.mxu0 %vm101_vm0, %v1688_v5  ;;  %vm1673_vm9 = vcmp.ge.f32.partialorder %v1665_v7, 0.0  ;;  %v1681_v25 = vmul.f32 0.01, %v1665_v7  ;;  %5213 = vmatpush3.bf16.msra.mxu0 %v5210_v20  ;;  %v1656_v2 = vmul.f32 %v6512_v58, %v1645_v51  ;;  %v816_v58 = vmul.f32 0.01, %v800_v35 }
 0x7f4   :  { %vm1674_vm10 = vcmp.ge.f32.partialorder %v1666_v48, 0.0  ;;  %v1682_v41 = vmul.f32 0.01, %v1666_v48  ;;  %5238 = vmatprep.subr.bf16.mxu0 %v5627_v8 }
 0x7f5   :  { %v1689_v53 = vsel %vm1673_vm9, %v1665_v7, %v1681_v25  ;;  %v1667_v14 = vadd.f32 %v6517_v42, %v1656_v2  ;;  %v824_v42 = vsel %vm808_vm13, %v800_v35, %v816_v58 }
 0x7f6   :  { %4973 = vmatmul.mubr.msk.f32.gmra.mrb[20].mxu0 %vm101_vm0, %v1689_v53  ;;  %v1690_v0 = vsel %vm1674_vm10, %v1666_v48, %v1682_v41 }
 0x7f7   :  { %4975 = vmatprep.mubr.msk.f32.mxu0 %vm101_vm0, %v1690_v0  ;;  %vm1675_vm11 = vcmp.ge.f32.partialorder %v1667_v14, 0.0  ;;  %v1683_v9 = vmul.f32 0.01, %v1667_v14 }
 0x7f9   :  { %v1691_v20 = vsel %vm1675_vm11, %v1667_v14, %v1683_v9  ;;  %v650_v14 = vadd.f32 %v6341_v31, %v6373_v63 }
 0x7fa   :  { %4976 = vmatmul.mubr.msk.f32.gmra.mrb[22].mxu0 %vm101_vm0, %v1691_v20 }
 0x7fb   :  { %4986 = vmatprep.mubr.msk.f32.mxu0 %vm101_vm0, %v823_v30  ;;  %v684_v35 = vsel %vm101_vm0, %v650_v14, 0.0 }
 0x7fe   :  { %4987 = vmatmul.mubr.msk.f32.vlgmr.msra.gmra.mrb[16].mxu0 %vm101_vm0, %v824_v42 }
 0x7ff   :  { %5240 = vmatpush3.bf16.msra.mxu0 %v6399_v52 }
 0x800   :  { %5241 = vmatprep.subr.bf16.mxu0 %v5627_v8 }
 0x803   :  { %5243 = vmatpush3.bf16.msra.mxu0 %v6407_v54 }
 0x804   :  { %5250 = vmatprep.subr.bf16.mxu0 %v5627_v8 }
 0x8d1   :  { %v4988_v59 = vpop.f32.mrb[16].mxu0 }
 0x8d2   :  { %v1964_v24 = vadd.f32 %v4988_v59, %v6576_v40  ;;  %v1919_v50 = vpop.f32.mrb[17].mxu0 }
 0x8d3   :  { %v1963_v36 = vadd.f32 %v6576_v40, %v1919_v50 }
 0x8d4   :  { %1973 = vst.msk [vmem:[#allocation2 + $0x8] sm:$0xff] %vm1971_vm14, %v1964_v24  ;;  %v655_v24 = vadd.f32 %v6339_v39, %v6373_v63 }
 0x8d5   :  { %1972 = vst.msk [vmem:[#allocation2] sm:$0xff] %vm1971_vm14, %v1963_v36 }
 0x8d6   :  { %v687_v31 = vsel %vm101_vm0, %v655_v24, 0.0 }
 0x8db   :  { %v2095_v0 = vld [vmem:[#allocation2 + $0x8] sm:$0xff] }
 0x8dc   :  { %v1985_v19 = vld [vmem:[#allocation2] sm:$0xff] }
 0x8dd   :  { %v2063_v62 = vadd.f32 %v6508_v55, %v1985_v19 }
 0x8df   :  { %v4650_v47 = vmul.f32 -1.442695, %v2063_v62 }
 0x8e1   :  { %5400 = vpow2.f32 %v4650_v47 }
 0x8eb   :  { %v5401_v34 = vpop.eup %5400 }
 0x8ec   :  { %v2067_v4 = vadd.f32 1.0, %v5401_v34 }
 0x8ee   :  { %5402 = vrcp.f32 %v2067_v4 }
 0x8f8   :  { %v5403_v46 = vpop.eup %5402 }
 0x8f9   :  { %v2074_v57 = vmul.f32 %v5403_v46, %v2072_v60  ;;  %v2081_v21 = vsub.f32 1.0, %v5403_v46  ;;  %v2087_v48 = vmul.f32 0.0, %v5403_v46 }
 0x8fb   :  { %2076 = vrot.lane.b32.xlu1 %v2074_v57, %s5624_s0 }
 0x96d   :  { %v2077_v11 = vpop.permute.xlu1 %2076 }
 0x96e   :  { %v2079_v7 = vadd.f32 %v2077_v11, %v1985_v19 }
 0x970   :  { %5404 = vtanh.f32 %v2079_v7 }
 0x97a   :  { %v5405_v51 = vpop.eup %5404 }
 0x97b   :  { %2083 = vrot.lane.b32.xlu0 %v5405_v51, %s5623_s27 }
 0x9ed   :  { %v2084_v5 = vpop.permute.xlu0 %2083 }
 0x9ee   :  { %v2086_v55 = vmul.f32 %v2084_v5, %v2081_v21 }
 0x9f0   :  { %v2088_v1 = vadd.f32 %v2087_v48, %v2086_v55 }
 0x9f2   :  { %2090 = vrot.lane.b32.xlu1 %v2088_v1, %s5623_s27 }
 0xa64   :  { %v2091_v25 = vpop.permute.xlu1 %2090 }
 0xa65   :  { %2093 = vst.msk [vmem:[#allocation3] sm:$0xff] %vm101_vm0, %v2091_v25  ;;  %5018 = vmatmul.mubr.msk.f32.vlgmr.msra.gmra.mrb[18].mxu1 %vm101_vm0, %v2091_v25 }
 0xa66   :  { %5228 = vmatpush3.bf16.msra.mxu1 %v6399_v52  ;;  %5028 = vmatprep.mubr.msk.f32.mxu1 %vm5628_vm3, %v5629_v6 }
 0xa67   :  { %5229 = vmatprep.subr.bf16.mxu1 %v5627_v8 }
 0xa6a   :  { %5231 = vmatpush3.bf16.msra.mxu1 %v6407_v54 }
 0xa6b   :  { %5232 = vmatprep.subr.bf16.mxu1 %v5627_v8 }
 0xb38   :  { %v2164_v2 = vpop.f32.mrb[18].mxu1 }
 0xb39   :  { %v2165_v41 = vadd.f32 %v6505_v49, %v2164_v2  ;;  %v5019_v53 = vpop.f32.mrb[19].mxu1 }
 0xb3b   :  { %2176 = vrot.lane.b32.xlu0 %v2165_v41, %s5624_s0  ;;  %v2168_v56 = vadd.f32 %v2165_v41, %v2095_v0 }
 0xb3d   :  { %v4652_v9 = vmul.f32 -1.442695, %v2168_v56 }
 0xb3f   :  { %5406 = vpow2.f32 %v4652_v9 }
 0xb49   :  { %v5407_v20 = vpop.eup %5406 }
 0xb4a   :  { %v2172_v58 = vadd.f32 1.0, %v5407_v20 }
 0xb4c   :  { %5408 = vrcp.f32 %v2172_v58 }
 0xb56   :  { %v5409_v30 = vpop.eup %5408 }
 0xb5a   :  { %685 = vadd.xlane.f32.xlu0 %v684_v35 }
 0xbad   :  { %v2177_v42 = vpop.permute.xlu0 %2176 }
 0xbae   :  { %v2179_v59 = vmul.f32 %v5409_v30, %v2177_v42 }
 0xbb0   :  { %2181 = vrot.lane.b32.xlu1 %v2179_v59, %s5624_s0 }
 0xbd4   :  { %688 = vadd.xlane.f32.xlu1 %v687_v31 }
 0xbe7   :  { %v686_v50 = vpop.xlane.xlu0 %685 }
 0xbe8   :  { %v704_v36 = vmul.f32 0.03125, %v686_v50 }
 0xbea   :  { %v712_v19 = vsub.f32 %v650_v14, %v704_v36  ;;  %v2186_v14 = vsub.f32 1.0, %v5409_v30 }
 0xbec   :  { %v720_v62 = vmul.f32 %v712_v19, %v712_v19 }
 0xbee   :  { %v732_v47 = vsel %vm101_vm0, %v720_v62, 0.0 }
 0xbef   :  { %733 = vadd.xlane.f32.xlu1 %v732_v47 }
 0xc22   :  { %v2182_v34 = vpop.permute.xlu1 %2181 }
 0xc23   :  { %v2184_v4 = vadd.f32 %v2182_v34, %v2095_v0  ;;  %v2192_v0 = vmul.f32 %v5409_v30, %v2088_v1 }
 0xc25   :  { %5410 = vtanh.f32 %v2184_v4 }
 0xc2f   :  { %v5411_v60 = vpop.eup %5410 }
 0xc30   :  { %2188 = vrot.lane.b32.xlu0 %v5411_v60, %s5623_s27 }
 0xc61   :  { %v689_v46 = vpop.xlane.xlu1 %688 }
 0xc62   :  { %v705_v57 = vmul.f32 0.03125, %v689_v46 }
 0xc64   :  { %v713_v11 = vsub.f32 %v655_v24, %v705_v57 }
 0xc66   :  { %v721_v39 = vmul.f32 %v713_v11, %v713_v11 }
 0xc68   :  { %v735_v7 = vsel %vm101_vm0, %v721_v39, 0.0 }
 0xc69   :  { %736 = vadd.xlane.f32.xlu1 %v735_v7 }
 0xc7c   :  { %v734_v51 = vpop.xlane.xlu1 %733 }
 0xc7d   :  { %v752_v21 = vmul.f32 0.03125, %v734_v51 }
 0xc7f   :  { %v760_v5 = vadd.f32 1e-05, %v752_v21 }
 0xc81   :  { %5412 = vrsqrt.f32 %v760_v5 }
 0xc8b   :  { %v5413_v48 = vpop.eup %5412 }
 0xc8c   :  { %v776_v55 = vmul.f32 %v5413_v48, %v712_v19 }
 0xc8e   :  { %v789_v25 = vmul.f32 %v6546_v22, %v776_v55 }
 0xc90   :  { %v801_v2 = vadd.f32 %v5709_v32, %v789_v25 }
 0xc92   :  { %vm809_vm15 = vcmp.ge.f32.partialorder %v801_v2, 0.0  ;;  %v817_v41 = vmul.f32 0.01, %v801_v2 }
 0xc94   :  { %v825_v53 = vsel %vm809_vm15, %v801_v2, %v817_v41 }
 0xc95   :  { %4989 = vmatprep.mubr.msk.f32.mxu0 %vm101_vm0, %v825_v53 }
 0xca2   :  { %v2189_v35 = vpop.permute.xlu0 %2188 }
 0xca3   :  { %v2191_v56 = vmul.f32 %v2189_v35, %v2186_v14 }
 0xca5   :  { %v2193_v9 = vadd.f32 %v2192_v0, %v2191_v56 }
 0xca7   :  { %2195 = vrot.lane.b32.xlu1 %v2193_v9, %s5623_s27 }
 0xcf6   :  { %v737_v20 = vpop.xlane.xlu1 %736 }
 0xcf7   :  { %v753_v58 = vmul.f32 0.03125, %v737_v20 }
 0xcf9   :  { %v761_v42 = vadd.f32 1e-05, %v753_v58 }
 0xcfb   :  { %5414 = vrsqrt.f32 %v761_v42  ;;  %v660_v42 = vadd.f32 %v6345_v18, %v6373_v63 }
 0xd05   :  { %v5415_v59 = vpop.eup %5414 }
 0xd06   :  { %v777_v24 = vmul.f32 %v5415_v59, %v713_v11  ;;  %v670_v59 = vadd.f32 %v6349_v23, %v6373_v63 }
 0xd08   :  { %v790_v31 = vmul.f32 %v6546_v22, %v777_v24  ;;  %v690_v24 = vsel %vm101_vm0, %v660_v42, 0.0 }
 0xd0a   :  { %v802_v50 = vadd.f32 %v5709_v32, %v790_v31  ;;  %v675_v31 = vadd.f32 %v6347_v43, %v6373_v63  ;;  %v665_v43 = vadd.f32 %v6343_v61, %v6373_v63 }
 0xd0c   :  { %vm810_vm1 = vcmp.ge.f32.partialorder %v802_v50, 0.0  ;;  %v818_v36 = vmul.f32 0.01, %v802_v50 }
 0xd0e   :  { %v826_v19 = vsel %vm810_vm1, %v802_v50, %v818_v36  ;;  %v696_v50 = vsel %vm101_vm0, %v670_v59, 0.0  ;;  %v699_v36 = vsel %vm101_vm0, %v675_v31, 0.0 }
 0xd0f   :  { %4990 = vmatmul.mubr.msk.f32.gmra.mrb[18].mxu0 %vm101_vm0, %v826_v19 }
 0xd19   :  { %v2196_v1 = vpop.permute.xlu1 %2195 }
 0xd1a   :  { %2199 = vst.msk [vmem:[#allocation3 + $0x8] sm:$0xff] %vm101_vm0, %v2196_v1  ;;  %5029 = vmatmul.mubr.msk.f32.vlgmr.msra.gmra.mrb[20].mxu1 %vm101_vm0, %v2196_v1 }
 0xd1b   :  { %5234 = vmatpush3.bf16.msra.mxu1 %v6399_v52  ;;  %5039 = vmatprep.mubr.msk.f32.mxu1 %vm5628_vm3, %v5629_v6 }
 0xd1c   :  { %5235 = vmatprep.subr.bf16.mxu1 %v5627_v8 }
 0xd1f   :  { %5237 = vmatpush3.bf16.msra.mxu1 %v6407_v54 }
 0xd20   :  { %5244 = vmatprep.subr.bf16.mxu1 %v5627_v8 }
 0xde2   :  { %v4991_v30 = vpop.f32.mrb[18].mxu0 }
 0xde3   :  { %v1966_v62 = vadd.f32 %v4991_v30, %v6576_v40  ;;  %v1929_v47 = vpop.f32.mrb[19].mxu0 }
 0xde4   :  { %v1965_v34 = vadd.f32 %v6576_v40, %v1929_v47 }
 0xde5   :  { %1975 = vst.msk [vmem:[#allocation2 + $0x18] sm:$0xff] %vm1971_vm14, %v1966_v62 }
 0xde6   :  { %1974 = vst.msk [vmem:[#allocation2 + $0x10] sm:$0xff] %vm1971_vm14, %v1965_v34 }
 0xdec   :  { %v2307_v19 = vld [vmem:[#allocation2 + $0x18] sm:$0xff] }
 0xded   :  { %v2270_v4 = vpop.f32.mrb[20].mxu1  ;;  %v2201_v57 = vld [vmem:[#allocation2 + $0x10] sm:$0xff] }
 0xdee   :  { %v2271_v60 = vadd.f32 %v6505_v49, %v2270_v4  ;;  %v5030_v46 = vpop.f32.mrb[21].mxu1  ;;  %v693_v4 = vsel %vm101_vm0, %v665_v43, 0.0 }
 0xdf0   :  { %2282 = vrot.lane.b32.xlu0 %v2271_v60, %s5624_s0  ;;  %v2274_v11 = vadd.f32 %v2271_v60, %v2201_v57 }
 0xdf2   :  { %v4654_v39 = vmul.f32 -1.442695, %v2274_v11 }
 0xdf4   :  { %5416 = vpow2.f32 %v4654_v39 }
 0xdfe   :  { %v5417_v7 = vpop.eup %5416 }
 0xdff   :  { %v2278_v51 = vadd.f32 1.0, %v5417_v7 }
 0xe01   :  { %5418 = vrcp.f32 %v2278_v51 }
 0xe0b   :  { %v5419_v21 = vpop.eup %5418 }
 0xe0c   :  { %v2292_v41 = vsub.f32 1.0, %v5419_v21  ;;  %v2298_v14 = vmul.f32 %v5419_v21, %v2193_v9 }
 0xe62   :  { %v2283_v5 = vpop.permute.xlu0 %2282 }
 0xe63   :  { %v2285_v48 = vmul.f32 %v5419_v21, %v2283_v5 }
 0xe65   :  { %2287 = vrot.lane.b32.xlu0 %v2285_v48, %s5624_s0 }
 0xed7   :  { %v2288_v55 = vpop.permute.xlu0 %2287 }
 0xed8   :  { %v2290_v25 = vadd.f32 %v2288_v55, %v2201_v57 }
 0xeda   :  { %5420 = vtanh.f32 %v2290_v25 }
 0xee4   :  { %v5421_v2 = vpop.eup %5420 }
 0xee5   :  { %2294 = vrot.lane.b32.xlu0 %v5421_v2, %s5623_s27 }
 0xf57   :  { %v2295_v53 = vpop.permute.xlu0 %2294 }
 0xf58   :  { %v2297_v35 = vmul.f32 %v2295_v53, %v2292_v41 }
 0xf5a   :  { %v6629_v0 = vadd.f32 %v2298_v14, %v2297_v35 }
 0xf5c   :  { %2301 = vrot.lane.b32.xlu1 %v6629_v0, %s5623_s27 }
 0xfce   :  { %v2302_v56 = vpop.permute.xlu1 %2301 }
 0xfcf   :  { %2305 = vst.msk [vmem:[#allocation3 + $0x10] sm:$0xff] %vm101_vm0, %v2302_v56  ;;  %5040 = vmatmul.mubr.msk.f32.vlgmr.msra.gmra.mrb[22].mxu1 %vm101_vm0, %v2302_v56 }
 0xfd0   :  { %5246 = vmatpush3.bf16.msra.mxu1 %v6399_v52  ;;  %5061 = vmatprep.mubr.msk.f32.mxu1 %vm5628_vm3, %v5629_v6 }
 0xfd1   :  { %5247 = vmatprep.subr.bf16.mxu1 %v5627_v8 }
 0xfd4   :  { %5249 = vmatpush3.bf16.msra.mxu1 %v6407_v54 }
 0xfd5   :  { %5256 = vmatprep.subr.bf16.mxu1 %v5627_v8 }
0x10a2   :  { %v2376_v9 = vpop.f32.mrb[22].mxu1 }
0x10a3   :  { %v2377_v20 = vadd.f32 %v6505_v49, %v2376_v9  ;;  %v5041_v58 = vpop.f32.mrb[23].mxu1 }
0x10a5   :  { %2388 = vrot.lane.b32.xlu0 %v2377_v20, %s5624_s0  ;;  %v2380_v1 = vadd.f32 %v2377_v20, %v2307_v19 }
0x10a7   :  { %v4656_v30 = vmul.f32 -1.442695, %v2380_v1 }
0x10a9   :  { %5422 = vpow2.f32 %v4656_v30 }
0x10b3   :  { %v5423_v18 = vpop.eup %5422 }
0x10b4   :  { %v2384_v62 = vadd.f32 1.0, %v5423_v18 }
0x10b6   :  { %5424 = vrcp.f32 %v2384_v62 }
0x10c0   :  { %v5425_v23 = vpop.eup %5424 }
0x10c1   :  { %v2398_v18 = vsub.f32 1.0, %v5425_v23 }
0x10c4   :  { %691 = vadd.xlane.f32.xlu0 %v690_v24 }
0x10c8   :  { %697 = vadd.xlane.f32.xlu0 %v696_v50 }
0x10cc   :  { %700 = vadd.xlane.f32.xlu0 %v699_v36 }
0x1117   :  { %v2389_v47 = vpop.permute.xlu0 %2388 }
0x1118   :  { %v2391_v34 = vmul.f32 %v5425_v23, %v2389_v47  ;;  %v2404_v47 = vmul.f32 %v5425_v23, %v6629_v0 }
0x111a   :  { %2393 = vrot.lane.b32.xlu1 %v2391_v34, %s5624_s0 }
0x113e   :  { %694 = vadd.xlane.f32.xlu1 %v693_v4 }
0x1151   :  { %v692_v60 = vpop.xlane.xlu0 %691 }
0x1152   :  { %v706_v46 = vmul.f32 0.03125, %v692_v60 }
0x1154   :  { %v714_v57 = vsub.f32 %v660_v42, %v706_v46 }
0x1155   :  { %v698_v5 = vpop.xlane.xlu0 %697 }
0x1156   :  { %v722_v11 = vmul.f32 %v714_v57, %v714_v57  ;;  %v708_v48 = vmul.f32 0.03125, %v698_v5 }
0x1158   :  { %v738_v39 = vsel %vm101_vm0, %v722_v11, 0.0  ;;  %v716_v25 = vsub.f32 %v670_v59, %v708_v48 }
0x1159   :  { %739 = vadd.xlane.f32.xlu0 %v738_v39  ;;  %v701_v55 = vpop.xlane.xlu0 %700 }
0x115a   :  { %v709_v2 = vmul.f32 0.03125, %v701_v55  ;;  %v724_v56 = vmul.f32 %v716_v25, %v716_v25 }
0x115c   :  { %v717_v14 = vsub.f32 %v675_v31, %v709_v2  ;;  %v744_v9 = vsel %vm101_vm0, %v724_v56, 0.0 }
0x115e   :  { %v725_v20 = vmul.f32 %v717_v14, %v717_v14 }
0x1160   :  { %v747_v58 = vsel %vm101_vm0, %v725_v20, 0.0 }
0x118c   :  { %v2394_v7 = vpop.permute.xlu1 %2393 }
0x118d   :  { %v2396_v51 = vadd.f32 %v2394_v7, %v2307_v19 }
0x118f   :  { %5426 = vtanh.f32 %v2396_v51 }
0x1199   :  { %v5427_v21 = vpop.eup %5426 }
0x119a   :  { %2400 = vrot.lane.b32.xlu1 %v5427_v21, %s5623_s27 }
0x11cb   :  { %v695_v61 = vpop.xlane.xlu1 %694 }
0x11cc   :  { %v707_v63 = vmul.f32 0.03125, %v695_v61 }
0x11ce   :  { %v715_v41 = vsub.f32 %v665_v43, %v707_v63 }
0x11d0   :  { %v723_v53 = vmul.f32 %v715_v41, %v715_v41 }
0x11d2   :  { %v741_v35 = vsel %vm101_vm0, %v723_v53, 0.0 }
0x11d3   :  { %742 = vadd.xlane.f32.xlu0 %v741_v35 }
0x11d7   :  { %745 = vadd.xlane.f32.xlu0 %v744_v9 }
0x11db   :  { %748 = vadd.xlane.f32.xlu0 %v747_v58 }
0x11e6   :  { %v740_v42 = vpop.xlane.xlu0 %739 }
0x11e7   :  { %v754_v24 = vmul.f32 0.03125, %v740_v42 }
0x11e9   :  { %v762_v50 = vadd.f32 1e-05, %v754_v24 }
0x11eb   :  { %5428 = vrsqrt.f32 %v762_v50 }
0x11f5   :  { %v5429_v59 = vpop.eup %5428 }
0x11f6   :  { %v778_v36 = vmul.f32 %v5429_v59, %v714_v57 }
0x11f8   :  { %v791_v19 = vmul.f32 %v6546_v22, %v778_v36 }
0x11fa   :  { %v803_v31 = vadd.f32 %v5709_v32, %v791_v19 }
0x11fc   :  { %vm811_vm2 = vcmp.ge.f32.partialorder %v803_v31, 0.0  ;;  %v819_v1 = vmul.f32 0.01, %v803_v31 }
0x11fe   :  { %v827_v30 = vsel %vm811_vm2, %v803_v31, %v819_v1 }
0x11ff   :  { %4992 = vmatprep.mubr.msk.f32.mxu0 %vm101_vm0, %v827_v30 }
0x120c   :  { %v2401_v62 = vpop.permute.xlu1 %2400 }
0x120d   :  { %v2403_v34 = vmul.f32 %v2401_v62, %v2398_v18 }
0x120f   :  { %v6665_v43 = vadd.f32 %v2404_v47, %v2403_v34 }
0x1211   :  { %2407 = vrot.lane.b32.xlu0 %v6665_v43, %s5623_s27 }
0x1260   :  { %v743_v4 = vpop.xlane.xlu0 %742 }
0x1261   :  { %v755_v60 = vmul.f32 0.03125, %v743_v4 }
0x1263   :  { %v763_v46 = vadd.f32 1e-05, %v755_v60 }
0x1264   :  { %v746_v57 = vpop.xlane.xlu0 %745 }
0x1265   :  { %5430 = vrsqrt.f32 %v763_v46  ;;  %v756_v11 = vmul.f32 0.03125, %v746_v57 }
0x1267   :  { %v764_v39 = vadd.f32 1e-05, %v756_v11 }
0x1268   :  { %v749_v7 = vpop.xlane.xlu0 %748 }
0x1269   :  { %5432 = vrsqrt.f32 %v764_v39  ;;  %v757_v51 = vmul.f32 0.03125, %v749_v7 }
0x126b   :  { %v765_v21 = vadd.f32 1e-05, %v757_v51 }
0x126d   :  { %5434 = vrsqrt.f32 %v765_v21 }
0x126f   :  { %v5431_v5 = vpop.eup %5430 }
0x1270   :  { %v779_v0 = vmul.f32 %v5431_v5, %v715_v41 }
0x1272   :  { %v792_v23 = vmul.f32 %v6546_v22, %v779_v0 }
0x1273   :  { %v5433_v48 = vpop.eup %5432 }
0x1274   :  { %v804_v55 = vadd.f32 %v5709_v32, %v792_v23  ;;  %v780_v61 = vmul.f32 %v5433_v48, %v716_v25 }
0x1276   :  { %vm812_vm4 = vcmp.ge.f32.partialorder %v804_v55, 0.0  ;;  %v820_v63 = vmul.f32 0.01, %v804_v55  ;;  %v793_v2 = vmul.f32 %v6546_v22, %v780_v61 }
0x1277   :  { %v5435_v53 = vpop.eup %5434 }
0x1278   :  { %v828_v35 = vsel %vm812_vm4, %v804_v55, %v820_v63  ;;  %v805_v56 = vadd.f32 %v5709_v32, %v793_v2  ;;  %v781_v9 = vmul.f32 %v5435_v53, %v717_v14 }
0x1279   :  { %4993 = vmatmul.mubr.msk.f32.gmra.mrb[20].mxu0 %vm101_vm0, %v828_v35 }
0x127a   :  { %vm813_vm5 = vcmp.ge.f32.partialorder %v805_v56, 0.0  ;;  %v821_v20 = vmul.f32 0.01, %v805_v56  ;;  %v794_v41 = vmul.f32 %v6546_v22, %v781_v9 }
0x127c   :  { %v829_v58 = vsel %vm813_vm5, %v805_v56, %v821_v20  ;;  %v806_v42 = vadd.f32 %v5709_v32, %v794_v41 }
0x127d   :  { %4995 = vmatprep.mubr.msk.f32.mxu0 %vm101_vm0, %v829_v58  ;;  %v2844_v58 = vld [vmem:[%s7400_s1 + $0x118] sm:$0xff] }
0x127e   :  { %vm814_vm6 = vcmp.ge.f32.partialorder %v806_v42, 0.0  ;;  %v822_v25 = vmul.f32 0.01, %v806_v42 }
0x1280   :  { %v830_v24 = vsel %vm814_vm6, %v806_v42, %v822_v25  ;;  %v2845_v42 = vld [vmem:[%s7400_s1 + $0x120] sm:$0xff] }
0x1281   :  { %4996 = vmatmul.mubr.msk.f32.gmra.mrb[22].mxu0 %vm101_vm0, %v830_v24  ;;  %v5262_v25 = vpack.c.bf16 %v2845_v42, %v2844_v58  ;;  %v5621_v58 = vld [vmem:[%s7400_s1 + $0x110] ss:$0 sm:$0xff] }
0x1282   :  { %5050 = vmatprep.mubr.msk.f32.mxu0 %vm5628_vm3, %v5629_v6 }
0x1283   :  { %v2408_v14 = vpop.permute.xlu0 %2407 }
0x1284   :  { %2411 = vst.msk [vmem:[#allocation3 + $0x18] sm:$0xff] %vm101_vm0, %v2408_v14 }
0x1285   :  { %5051 = vmatmul.mubr.msk.f32.vlgmr.msra.gmra.mrb[24].mxu0 %vm101_vm0, %v2408_v14 }
0x1286   :  { %5252 = vmatpush3.bf16.msra.mxu0 %v6399_v52  ;;  %5072 = vmatprep.mubr.msk.f32.mxu0 %vm5628_vm3, %v5629_v6 }
0x1287   :  { %5253 = vmatprep.subr.bf16.mxu0 %v5627_v8 }
0x128a   :  { %5255 = vmatpush3.bf16.msra.mxu0 %v6407_v54 }
0x128b   :  { %5263 = vmatprep.subr.bf16.mxu0 %v5262_v25 }
0x134c   :  { %v4994_v32 = vpop.f32.mrb[20].mxu0 }
0x134d   :  { %v1968_v22 = vadd.f32 %v4994_v32, %v6576_v40  ;;  %v1939_v50 = vpop.f32.mrb[21].mxu0 }
0x134e   :  { %v1967_v59 = vadd.f32 %v6576_v40, %v1939_v50 }
0x134f   :  { %1977 = vst.msk [vmem:[#allocation2 + $0x28] sm:$0xff] %vm1971_vm14, %v1968_v22 }
0x1350   :  { %1976 = vst.msk [vmem:[#allocation2 + $0x20] sm:$0xff] %vm1971_vm14, %v1967_v59 }
0x1354   :  { %v4997_v36 = vpop.f32.mrb[22].mxu0 }
0x1355   :  { %v1970_v19 = vadd.f32 %v4997_v36, %v6576_v40  ;;  %v1949_v31 = vpop.f32.mrb[23].mxu0  ;;  %v2846_v36 = vld [vmem:[%s7400_s1 + $0x128] sm:$0xff] }
0x1356   :  { %v1969_v1 = vadd.f32 %v6576_v40, %v1949_v31  ;;  %v2519_v2 = vld [vmem:[#allocation2 + $0x28] sm:$0xff] }
0x1357   :  { %1979 = vst.msk [vmem:[#allocation2 + $0x38] sm:$0xff] %vm1971_vm14, %v1970_v19  ;;  %v2413_v47 = vld [vmem:[#allocation2 + $0x20] sm:$0xff]  ;;  %v2847_v19 = vld [vmem:[%s7400_s1 + $0x130] sm:$0xff] }
0x1358   :  { %1978 = vst.msk [vmem:[#allocation2 + $0x30] sm:$0xff] %vm1971_vm14, %v1969_v1  ;;  %v2482_v30 = vpop.f32.mrb[24].mxu0  ;;  %v5266_v31 = vpack.c.bf16 %v2847_v19, %v2846_v36 }
0x1359   :  { %v2483_v18 = vadd.f32 %v6505_v49, %v2482_v30  ;;  %v5052_v62 = vpop.f32.mrb[25].mxu0  ;;  %v2836_v30 = vld [vmem:[#allocation3] sm:$0xff] }
0x135a   :  { %v2838_v62 = vld [vmem:[#allocation3 + $0x10] sm:$0xff] }
0x135b   :  { %2494 = vrot.lane.b32.xlu1 %v2483_v18, %s5624_s0  ;;  %v2486_v34 = vadd.f32 %v2483_v18, %v2413_v47  ;;  %v2837_v18 = vld [vmem:[#allocation3 + $0x8] sm:$0xff] }
0x135d   :  { %v4658_v4 = vmul.f32 -1.442695, %v2486_v34 }
0x135f   :  { %5436 = vpow2.f32 %v4658_v4 }
0x1369   :  { %v5437_v60 = vpop.eup %5436 }
0x136a   :  { %v2490_v46 = vadd.f32 1.0, %v5437_v60 }
0x136c   :  { %5438 = vrcp.f32 %v2490_v46 }
0x1376   :  { %v5439_v57 = vpop.eup %5438 }
0x1377   :  { %v2504_v21 = vsub.f32 1.0, %v5439_v57  ;;  %v2510_v0 = vmul.f32 %v5439_v57, %v6665_v43 }
0x13cd   :  { %v2495_v11 = vpop.permute.xlu1 %2494 }
0x13ce   :  { %v2497_v40 = vmul.f32 %v5439_v57, %v2495_v11 }
0x13d0   :  { %2499 = vrot.lane.b32.xlu1 %v2497_v40, %s5624_s0 }
0x1442   :  { %v2500_v39 = vpop.permute.xlu1 %2499 }
0x1443   :  { %v2502_v7 = vadd.f32 %v2500_v39, %v2413_v47  ;;  %v2839_v47 = vld [vmem:[#allocation3 + $0x18] sm:$0xff] }
0x1445   :  { %5440 = vtanh.f32 %v2502_v7 }
0x144f   :  { %v5441_v51 = vpop.eup %5440 }
0x1450   :  { %2506 = vrot.lane.b32.xlu1 %v5441_v51, %s5623_s27 }
0x14c2   :  { %v2507_v5 = vpop.permute.xlu1 %2506 }
0x14c3   :  { %v2509_v23 = vmul.f32 %v2507_v5, %v2504_v21  ;;  %v2625_v5 = vld [vmem:[#allocation2 + $0x30] sm:$0xff] }
0x14c5   :  { %v2511_v48 = vadd.f32 %v2510_v0, %v2509_v23 }
0x14c7   :  { %2513 = vrot.lane.b32.xlu1 %v2511_v48, %s5623_s27 }
0x1539   :  { %v2514_v55 = vpop.permute.xlu1 %2513 }
0x153a   :  { %2517 = vst.msk [vmem:[#allocation3 + $0x20] sm:$0xff] %vm101_vm0, %v2514_v55  ;;  %5062 = vmatmul.mubr.msk.f32.vlgmr.msra.gmra.mrb[24].mxu1 %vm101_vm0, %v2514_v55 }
0x153b   :  { %5258 = vmatpush3.bf16.msra.mxu1 %v6399_v52  ;;  %5083 = vmatprep.mubr.msk.f32.mxu1 %vm5628_vm3, %v5629_v6 }
0x153c   :  { %5259 = vmatprep.subr.bf16.mxu1 %v5627_v8 }
0x153f   :  { %5261 = vmatpush3.bf16.msra.mxu1 %v6407_v54 }
0x1541   :  { %v2840_v34 = vld [vmem:[#allocation3 + $0x20] sm:$0xff] }
0x160d   :  { %v2588_v61 = vpop.f32.mrb[24].mxu1 }
0x160e   :  { %v2589_v43 = vadd.f32 %v6505_v49, %v2588_v61  ;;  %v5063_v63 = vpop.f32.mrb[25].mxu1 }
0x1610   :  { %2600 = vrot.lane.b32.xlu1 %v2589_v43, %s5624_s0  ;;  %v2592_v53 = vadd.f32 %v2589_v43, %v2519_v2 }
0x1612   :  { %v4660_v35 = vmul.f32 -1.442695, %v2592_v53 }
0x1614   :  { %5442 = vpow2.f32 %v4660_v35 }
0x161e   :  { %v5443_v56 = vpop.eup %5442 }
0x161f   :  { %v2596_v9 = vadd.f32 1.0, %v5443_v56 }
0x1621   :  { %5444 = vrcp.f32 %v2596_v9 }
0x162b   :  { %v5445_v52 = vpop.eup %5444 }
0x162c   :  { %v2610_v14 = vsub.f32 1.0, %v5445_v52  ;;  %v2616_v22 = vmul.f32 %v5445_v52, %v2511_v48 }
0x1682   :  { %v2601_v20 = vpop.permute.xlu1 %2600 }
0x1683   :  { %v2603_v41 = vmul.f32 %v5445_v52, %v2601_v20 }
0x1685   :  { %2605 = vrot.lane.b32.xlu1 %v2603_v41, %s5624_s0 }
0x16f7   :  { %v2606_v8 = vpop.permute.xlu1 %2605 }
0x16f8   :  { %v2608_v54 = vadd.f32 %v2606_v8, %v2519_v2 }
0x16fa   :  { %5446 = vtanh.f32 %v2608_v54 }
0x1704   :  { %v5447_v24 = vpop.eup %5446 }
0x1705   :  { %2612 = vrot.lane.b32.xlu0 %v5447_v24, %s5623_s27  ;;  %v2731_v24 = vld [vmem:[#allocation2 + $0x38] sm:$0xff] }
0x1777   :  { %v2613_v32 = vpop.permute.xlu0 %2612 }
0x1778   :  { %v2615_v50 = vmul.f32 %v2613_v32, %v2610_v14 }
0x177a   :  { %v2617_v59 = vadd.f32 %v2616_v22, %v2615_v50 }
0x177c   :  { %2619 = vrot.lane.b32.xlu1 %v2617_v59, %s5623_s27 }
0x17ee   :  { %v2620_v1 = vpop.permute.xlu1 %2619 }
0x17ef   :  { %2623 = vst.msk [vmem:[#allocation3 + $0x28] sm:$0xff] %vm101_vm0, %v2620_v1  ;;  %5073 = vmatmul.mubr.msk.f32.vlgmr.msra.gmra.mrb[26].mxu0 %vm101_vm0, %v2620_v1 }
0x17f0   :  { %5265 = vmatpush3.bf16.msra.mxu0 %v5262_v25  ;;  %5094 = vmatprep.mubr.msk.f32.mxu0 %vm101_vm0, %v2836_v30 }
0x17f1   :  { %5267 = vmatprep.subr.bf16.mxu0 %v5266_v31 }
0x17f4   :  { %5269 = vmatpush3.bf16.msra.mxu0 %v5266_v31 }
0x17f6   :  { %v2841_v4 = vld [vmem:[#allocation3 + $0x28] sm:$0xff] }
0x17f7   :  { %5095 = vmatmul.mubr.msk.f32.vlgmr.msra.gmra.mrb[28].mxu0 %vm101_vm0, %v2837_v18  ;;  %v4665_v18 = vld [vmem:[%s7400_s1 + $0xe8] ss:$0 sm:$0xff] }
0x17f8   :  { %5097 = vmatprep.mubr.msk.f32.mxu0 %vm101_vm0, %v2838_v62  ;;  %v2853_v62 = vmul.f32 %v4665_v18, %v5804_v16 }
0x17fb   :  { %5098 = vmatmul.mubr.msk.f32.gmra.mrb[30].mxu0 %vm101_vm0, %v2839_v47  ;;  %v4674_v47 = vld [vmem:[%s7400_s1 + $0x110] ss:$0 sm:$0xff] }
0x17fc   :  { %5100 = vmatprep.mubr.msk.f32.mxu0 %vm101_vm0, %v2840_v34  ;;  %v3027_v34 = vmul.f32 %v4674_v47, %v5701_v27  ;;  %v2859_v27 = vmul.f32 %v4665_v18, %v5828_v37 }
0x17ff   :  { %5101 = vmatmul.mubr.msk.f32.gmra.mrb[32].mxu0 %vm101_vm0, %v2841_v4  ;;  %v2855_v4 = vmul.f32 %v4665_v18, %v5796_v12 }
0x18c2   :  { %v2694_v60 = vpop.f32.mrb[26].mxu0 }
0x18c3   :  { %v2695_v46 = vadd.f32 %v6505_v49, %v2694_v60  ;;  %v5074_v57 = vpop.f32.mrb[27].mxu0  ;;  %v3029_v60 = vmul.f32 %v4674_v47, %v5699_v26 }
0x18c4   :  { %v3031_v57 = vmul.f32 %v4674_v47, %v5711_v33  ;;  %v2854_v33 = vmul.f32 %v4665_v18, %v5792_v10 }
0x18c5   :  { %2706 = vrot.lane.b32.xlu0 %v2695_v46, %s5624_s0  ;;  %v2698_v0 = vadd.f32 %v2695_v46, %v2625_v5  ;;  %v2857_v46 = vmul.f32 %v4665_v18, %v5802_v15 }
0x18c7   :  { %v4662_v23 = vmul.f32 -1.442695, %v2698_v0 }
0x18c9   :  { %5448 = vpow2.f32 %v4662_v23 }
0x18ca   :  { %v6735_v11 = vpop.f32.mrb[28].mxu0 }
0x18cb   :  { %v6737_v40 = vpop.f32.mrb[29].mxu0 }
0x18ce   :  { %v6739_v39 = vpop.f32.mrb[30].mxu0 }
0x18cf   :  { %v6741_v7 = vpop.f32.mrb[31].mxu0 }
0x18d2   :  { %v6743_v51 = vpop.f32.mrb[32].mxu0 }
0x18d3   :  { %v6745_v21 = vpop.f32.mrb[33].mxu0  ;;  %v5449_v49 = vpop.eup %5448 }
0x18d4   :  { %v2702_v48 = vadd.f32 1.0, %v5449_v49 }
0x18d6   :  { %5450 = vrcp.f32 %v2702_v48 }
0x18e0   :  { %v5451_v55 = vpop.eup %5450 }
0x18e1   :  { %v2716_v35 = vsub.f32 1.0, %v5451_v55  ;;  %v2722_v9 = vmul.f32 %v5451_v55, %v2617_v59 }
0x1937   :  { %v2707_v61 = vpop.permute.xlu0 %2706 }
0x1938   :  { %v2709_v43 = vmul.f32 %v5451_v55, %v2707_v61 }
0x193a   :  { %2711 = vrot.lane.b32.xlu1 %v2709_v43, %s5624_s0 }
0x19ac   :  { %v2712_v63 = vpop.permute.xlu1 %2711 }
0x19ad   :  { %v2714_v2 = vadd.f32 %v2712_v63, %v2625_v5  ;;  %v3033_v5 = vmul.f32 %v4674_v47, %v5735_v44  ;;  %v6787_v63 = vld [vmem:[%s7400_s1 + $0x138] ss:$0 sm:$0xff] }
0x19af   :  { %5452 = vtanh.f32 %v2714_v2  ;;  %v3028_v2 = vmul.f32 %v4674_v47, %v5705_v29  ;;  %v3030_v29 = vmul.f32 %v4674_v47, %v5703_v28  ;;  %v3034_v28 = vmul.f32 %v4674_v47, %v5741_v45 }
0x19b9   :  { %v5453_v53 = vpop.eup %5452 }
0x19ba   :  { %2718 = vrot.lane.b32.xlu0 %v5453_v53, %s5623_s27 }
0x1a2c   :  { %v2719_v56 = vpop.permute.xlu0 %2718 }
0x1a2d   :  { %v2721_v52 = vmul.f32 %v2719_v56, %v2716_v35  ;;  %v2856_v56 = vmul.f32 %v4665_v18, %v5798_v13 }
0x1a2f   :  { %v2723_v20 = vadd.f32 %v2722_v9, %v2721_v52 }
0x1a31   :  { %2725 = vrot.lane.b32.xlu1 %v2723_v20, %s5623_s27 }
0x1aa3   :  { %v2726_v41 = vpop.permute.xlu1 %2725 }
0x1aa4   :  { %2729 = vst.msk [vmem:[#allocation3 + $0x30] sm:$0xff] %vm101_vm0, %v2726_v41  ;;  %5084 = vmatmul.mubr.msk.f32.vlgmr.msra.gmra.mrb[26].mxu1 %vm101_vm0, %v2726_v41 }
0x1aab   :  { %v2842_v8 = vld [vmem:[#allocation3 + $0x30] sm:$0xff] }
0x1aac   :  { %5103 = vmatprep.mubr.msk.f32.mxu0 %vm101_vm0, %v2842_v8 }
0x1b77   :  { %v2800_v54 = vpop.f32.mrb[26].mxu1 }
0x1b78   :  { %v2801_v42 = vadd.f32 %v5621_v58, %v2800_v54  ;;  %v5085_v25 = vpop.f32.mrb[27].mxu1  ;;  %v2858_v54 = vmul.f32 %v4665_v18, %v5806_v17  ;;  %v2860_v58 = vmul.f32 %v4665_v18, %v5873_v3 }
0x1b7a   :  { %2812 = vrot.lane.b32.xlu0 %v2801_v42, %s5624_s0  ;;  %v2804_v14 = vadd.f32 %v2801_v42, %v2731_v24 }
0x1b7c   :  { %v4664_v32 = vmul.f32 -1.442695, %v2804_v14 }
0x1b7e   :  { %5454 = vpow2.f32 %v4664_v32 }
0x1b88   :  { %v5455_v22 = vpop.eup %5454 }
0x1b89   :  { %v2808_v50 = vadd.f32 1.0, %v5455_v22 }
0x1b8b   :  { %5456 = vrcp.f32 %v2808_v50 }
0x1b95   :  { %v5457_v59 = vpop.eup %5456 }
0x1b96   :  { %v2822_v0 = vsub.f32 1.0, %v5457_v59  ;;  %v2828_v23 = vmul.f32 %v5457_v59, %v2723_v20 }
0x1bec   :  { %v2813_v36 = vpop.permute.xlu0 %2812 }
0x1bed   :  { %v2815_v19 = vmul.f32 %v5457_v59, %v2813_v36 }
0x1bef   :  { %2817 = vrot.lane.b32.xlu1 %v2815_v19, %s5624_s0 }
0x1c61   :  { %v2818_v31 = vpop.permute.xlu1 %2817 }
0x1c62   :  { %v2820_v1 = vadd.f32 %v2818_v31, %v2731_v24 }
0x1c64   :  { %5458 = vtanh.f32 %v2820_v1 }
0x1c6e   :  { %v5459_v30 = vpop.eup %5458 }
0x1c6f   :  { %2824 = vrot.lane.b32.xlu0 %v5459_v30, %s5623_s27 }
0x1c73   :  { %2869 = vrot.lane.b32.xlu0 %v2853_v62, %s5626_s4 }
0x1c77   :  { %3043 = vrot.lane.b32.xlu0 %v3027_v34, %s5626_s4 }
0x1c7b   :  { %2873 = vrot.lane.b32.xlu0 %v2855_v4, %s5626_s4 }
0x1c7f   :  { %3047 = vrot.lane.b32.xlu0 %v3029_v60, %s5626_s4 }
0x1c83   :  { %2877 = vrot.lane.b32.xlu0 %v2857_v46, %s5626_s4 }
0x1c87   :  { %3051 = vrot.lane.b32.xlu0 %v3031_v57, %s5626_s4 }
0x1c8b   :  { %2881 = vrot.lane.b32.xlu0 %v2859_v27, %s5626_s4 }
0x1c8f   :  { %3055 = vrot.lane.b32.xlu0 %v3033_v5, %s5626_s4 }
0x1ce1   :  { %v2825_v26 = vpop.permute.xlu0 %2824 }
0x1ce2   :  { %v2827_v49 = vmul.f32 %v2825_v26, %v2822_v0 }
0x1ce4   :  { %v2829_v48 = vadd.f32 %v2828_v23, %v2827_v49 }
0x1ce5   :  { %v2870_v55 = vpop.permute.xlu0 %2869 }
0x1ce6   :  { %2831 = vrot.lane.b32.xlu1 %v2829_v48, %s5623_s27  ;;  %v2984_v61 = vadd.f32 %v6737_v40, %v2870_v55 }
0x1ce9   :  { %v3044_v43 = vpop.permute.xlu0 %3043 }
0x1cea   :  { %v3067_v44 = vadd.f32 %v3044_v43, %v2984_v61  ;;  %2871 = vrot.lane.b32.xlu1 %v2854_v33, %s5626_s4 }
0x1cec   :  { %v6792_v53 = vadd.f32 %v6787_v63, %v3067_v44 }
0x1ced   :  { %v2874_v35 = vpop.permute.xlu0 %2873 }
0x1cee   :  { %3045 = vrot.lane.b32.xlu1 %v3028_v2, %s5626_s4  ;;  %v3088_v40 = vsel %vm101_vm0, %v6792_v53, 0.0  ;;  %v2994_v9 = vadd.f32 %v6741_v7, %v2874_v35  ;;  %v3032_v7 = vmul.f32 %v4674_v47, %v5725_v38 }
0x1cef   :  { %3089 = vadd.xlane.f32.xlu0 %v3088_v40 }
0x1cf1   :  { %v3048_v52 = vpop.permute.xlu0 %3047 }
0x1cf2   :  { %v3069_v20 = vadd.f32 %v3048_v52, %v2994_v9  ;;  %2875 = vrot.lane.b32.xlu1 %v2856_v56, %s5626_s4 }
0x1cf4   :  { %v6802_v41 = vadd.f32 %v6787_v63, %v3069_v20 }
0x1cf5   :  { %v2878_v42 = vpop.permute.xlu0 %2877 }
0x1cf6   :  { %3049 = vrot.lane.b32.xlu1 %v3030_v29, %s5626_s4  ;;  %v3094_v8 = vsel %vm101_vm0, %v6802_v41, 0.0  ;;  %v3004_v32 = vadd.f32 %v6745_v21, %v2878_v42 }
0x1cf7   :  { %3095 = vadd.xlane.f32.xlu0 %v3094_v8 }
0x1cf9   :  { %v3052_v14 = vpop.permute.xlu0 %3051 }
0x1cfa   :  { %2879 = vrot.lane.b32.xlu1 %v2858_v54, %s5626_s4  ;;  %v3071_v59 = vadd.f32 %v3052_v14, %v3004_v32 }
0x1cfc   :  { %v3084_v1 = vadd.f32 %v6787_v63, %v3071_v59 }
0x1cfe   :  { %3053 = vrot.lane.b32.xlu1 %v3032_v7, %s5626_s4 }
0x1d02   :  { %2883 = vrot.lane.b32.xlu1 %v2860_v58, %s5626_s4 }
0x1d06   :  { %3057 = vrot.lane.b32.xlu1 %v3034_v28, %s5626_s4 }
0x1d58   :  { %v2832_v25 = vpop.permute.xlu1 %2831 }
0x1d59   :  { %2835 = vst.msk [vmem:[#allocation3 + $0x38] sm:$0xff] %vm101_vm0, %v2832_v25 }
0x1d5c   :  { %v2872_v24 = vpop.permute.xlu1 %2871 }
0x1d5d   :  { %v2989_v38 = vadd.f32 %v6735_v11, %v2872_v24  ;;  %v3100_v11 = vsel %vm101_vm0, %v3084_v1, 0.0 }
0x1d60   :  { %v3046_v22 = vpop.permute.xlu1 %3045  ;;  %v2843_v50 = vld [vmem:[#allocation3 + $0x38] sm:$0xff] }
0x1d61   :  { %v3068_v36 = vadd.f32 %v3046_v22, %v2989_v38  ;;  %5104 = vmatmul.mubr.msk.f32.gmra.mrb[34].mxu0 %vm101_vm0, %v2843_v50 }
0x1d63   :  { %v3081_v45 = vadd.f32 %v6787_v63, %v3068_v36 }
0x1d64   :  { %v2876_v19 = vpop.permute.xlu1 %2875 }
0x1d65   :  { %v3091_v31 = vsel %vm101_vm0, %v3081_v45, 0.0  ;;  %v2999_v30 = vadd.f32 %v6739_v39, %v2876_v19  ;;  %v2882_v39 = vpop.permute.xlu0 %2881 }
0x1d66   :  { %3092 = vadd.xlane.f32.xlu1 %v3091_v31 }
0x1d68   :  { %v3050_v18 = vpop.permute.xlu1 %3049 }
0x1d69   :  { %v3070_v21 = vadd.f32 %v3050_v18, %v2999_v30  ;;  %v3056_v0 = vpop.permute.xlu0 %3055 }
0x1d6a   :  { %3101 = vadd.xlane.f32.xlu1 %v3100_v11 }
0x1d6b   :  { %v3083_v62 = vadd.f32 %v6787_v63, %v3070_v21 }
0x1d6c   :  { %v2880_v47 = vpop.permute.xlu1 %2879 }
0x1d6d   :  { %v3097_v34 = vsel %vm101_vm0, %v3083_v62, 0.0  ;;  %v3009_v4 = vadd.f32 %v6743_v51, %v2880_v47 }
0x1d6e   :  { %3098 = vadd.xlane.f32.xlu0 %v3097_v34 }
0x1d70   :  { %v3054_v60 = vpop.permute.xlu1 %3053 }
0x1d71   :  { %v3072_v46 = vadd.f32 %v3054_v60, %v3009_v4 }
0x1d73   :  { %v3085_v57 = vadd.f32 %v6787_v63, %v3072_v46 }
0x1d74   :  { %v2884_v5 = vpop.permute.xlu1 %2883 }
0x1d75   :  { %v3103_v27 = vsel %vm101_vm0, %v3085_v57, 0.0 }
0x1d76   :  { %3104 = vadd.xlane.f32.xlu0 %v3103_v27 }
0x1d78   :  { %v3058_v26 = vpop.permute.xlu1 %3057 }
0x1d7c   :  { %v3090_v23 = vpop.xlane.xlu0 %3089 }
0x1d7d   :  { %v3112_v33 = vmul.f32 0.03125, %v3090_v23  ;;  %v3242_v23 = vld [vmem:[%s7400_s1 + $0x158] sm:$0xff] }
0x1d7f   :  { %v6832_v9 = vsub.f32 %v6792_v53, %v3112_v33 }
0x1d81   :  { %v3128_v32 = vmul.f32 %v6832_v9, %v6832_v9 }
0x1d84   :  { %v3096_v49 = vpop.xlane.xlu0 %3095 }
0x1d85   :  { %v3114_v52 = vmul.f32 0.03125, %v3096_v49 }
0x1d87   :  { %v6842_v24 = vsub.f32 %v6802_v41, %v3114_v52  ;;  %v3136_v41 = vsel %vm101_vm0, %v3128_v32, 0.0 }
0x1d89   :  { %v3130_v36 = vmul.f32 %v6842_v24, %v6842_v24 }
0x1d8b   :  { %v3142_v31 = vsel %vm101_vm0, %v3130_v36, 0.0 }
0x1df3   :  { %v3093_v48 = vpop.xlane.xlu1 %3092 }
0x1df4   :  { %v3113_v55 = vmul.f32 0.03125, %v3093_v48 }
0x1df6   :  { %v6829_v35 = vsub.f32 %v3081_v45, %v3113_v55 }
0x1df7   :  { %v3102_v8 = vpop.xlane.xlu1 %3101 }
0x1df8   :  { %v3129_v25 = vmul.f32 %v6829_v35, %v6829_v35  ;;  %v3116_v53 = vmul.f32 0.03125, %v3102_v8 }
0x1dfa   :  { %v3139_v22 = vsel %vm101_vm0, %v3129_v25, 0.0  ;;  %v6852_v59 = vsub.f32 %v3084_v1, %v3116_v53 }
0x1dfb   :  { %v3099_v61 = vpop.xlane.xlu0 %3098 }
0x1dfc   :  { %v3115_v40 = vmul.f32 0.03125, %v3099_v61  ;;  %v3132_v30 = vmul.f32 %v6852_v59, %v6852_v59 }
0x1dfe   :  { %v6836_v58 = vsub.f32 %v3083_v62, %v3115_v40  ;;  %v3148_v18 = vsel %vm101_vm0, %v3132_v30, 0.0 }
0x1e00   :  { %v3131_v50 = vmul.f32 %v6836_v58, %v6836_v58 }
0x1e02   :  { %v3145_v45 = vsel %vm101_vm0, %v3131_v50, 0.0 }
0x1e03   :  { %v3105_v20 = vpop.xlane.xlu0 %3104 }
0x1e04   :  { %v3117_v28 = vmul.f32 0.03125, %v3105_v20 }
0x1e06   :  { %v6847_v38 = vsub.f32 %v3085_v57, %v3117_v28 }
0x1e08   :  { %v3133_v19 = vmul.f32 %v6847_v38, %v6847_v38 }
0x1e0a   :  { %v3151_v1 = vsel %vm101_vm0, %v3133_v19, 0.0 }
0x1e34   :  { %v5105_v43 = vpop.f32.mrb[34].mxu0 }
0x1e35   :  { %v3019_v44 = vadd.f32 %v5105_v43, %v2884_v5  ;;  %v3013_v51 = vpop.f32.mrb[35].mxu0  ;;  %v3240_v5 = vld [vmem:[%s7400_s1 + $0x148] sm:$0xff] }
0x1e36   :  { %v3014_v2 = vadd.f32 %v3013_v51, %v2882_v39  ;;  %v3239_v39 = vld [vmem:[%s7400_s1 + $0x140] sm:$0xff] }
0x1e37   :  { %v3074_v56 = vadd.f32 %v3058_v26, %v3019_v44  ;;  %v5270_v26 = vpack.c.bf16 %v3240_v5, %v3239_v39 }
0x1e38   :  { %v3073_v29 = vadd.f32 %v3056_v0, %v3014_v2  ;;  %v3241_v0 = vld [vmem:[%s7400_s1 + $0x150] sm:$0xff] }
0x1e39   :  { %v3087_v54 = vadd.f32 %v6787_v63, %v3074_v56  ;;  %v5274_v49 = vpack.c.bf16 %v3242_v23, %v3241_v0  ;;  %5271 = vmatprep.subr.bf16.mxu1 %v5270_v26 }
0x1e3a   :  { %v3086_v7 = vadd.f32 %v6787_v63, %v3073_v29  ;;  %5273 = vmatpush3.bf16.msra.mxu1 %v5270_v26 }
0x1e3b   :  { %v3109_v42 = vsel %vm101_vm0, %v3087_v54, 0.0  ;;  %5275 = vmatprep.subr.bf16.mxu1 %v5274_v49 }
0x1e3c   :  { %3110 = vadd.xlane.f32.xlu0 %v3109_v42  ;;  %v3106_v14 = vsel %vm101_vm0, %v3086_v7, 0.0 }
0x1e3d   :  { %3107 = vadd.xlane.f32.xlu1 %v3106_v14 }
0x1e3e   :  { %5277 = vmatpush3.bf16.msra.mxu1 %v5274_v49 }
0x1e40   :  { %3140 = vadd.xlane.f32.xlu0 %v3139_v22 }
0x1e41   :  { %3137 = vadd.xlane.f32.xlu1 %v3136_v41 }
0x1e44   :  { %3146 = vadd.xlane.f32.xlu0 %v3145_v45 }
0x1e45   :  { %3143 = vadd.xlane.f32.xlu1 %v3142_v31 }
0x1e48   :  { %3152 = vadd.xlane.f32.xlu0 %v3151_v1 }
0x1e49   :  { %3149 = vadd.xlane.f32.xlu1 %v3148_v18 }
0x1ec9   :  { %v3111_v21 = vpop.xlane.xlu0 %3110 }
0x1eca   :  { %v3119_v11 = vmul.f32 0.03125, %v3111_v21  ;;  %v3108_v62 = vpop.xlane.xlu1 %3107 }
0x1ecb   :  { %v3118_v47 = vmul.f32 0.03125, %v3108_v62 }
0x1ecc   :  { %v6865_v34 = vsub.f32 %v3087_v54, %v3119_v11 }
0x1ecd   :  { %v6867_v4 = vsub.f32 %v3086_v7, %v3118_v47  ;;  %v3141_v55 = vpop.xlane.xlu0 %3140 }
0x1ece   :  { %v3135_v60 = vmul.f32 %v6865_v34, %v6865_v34  ;;  %v3138_v48 = vpop.xlane.xlu1 %3137  ;;  %v3161_v43 = vmul.f32 0.03125, %v3141_v55 }
0x1ecf   :  { %v3134_v46 = vmul.f32 %v6867_v4, %v6867_v4  ;;  %v3160_v44 = vmul.f32 0.03125, %v3138_v48 }
0x1ed0   :  { %v3157_v57 = vsel %vm101_vm0, %v3135_v60, 0.0  ;;  %v3169_v52 = vadd.f32 1e-05, %v3161_v43 }
0x1ed1   :  { %3158 = vadd.xlane.f32.xlu0 %v3157_v57  ;;  %v3154_v27 = vsel %vm101_vm0, %v3134_v46, 0.0  ;;  %v3147_v61 = vpop.xlane.xlu0 %3146  ;;  %v3168_v29 = vadd.f32 1e-05, %v3160_v44 }
0x1ed2   :  { %3155 = vadd.xlane.f32.xlu1 %v3154_v27  ;;  %v3144_v33 = vpop.xlane.xlu1 %3143  ;;  %v3163_v2 = vmul.f32 0.03125, %v3147_v61  ;;  %5460 = vrsqrt.f32 %v3169_v52 }
0x1ed3   :  { %v3162_v40 = vmul.f32 0.03125, %v3144_v33  ;;  %5462 = vrsqrt.f32 %v3168_v29 }
0x1ed4   :  { %v3171_v8 = vadd.f32 1e-05, %v3163_v2 }
0x1ed5   :  { %v3153_v56 = vpop.xlane.xlu0 %3152  ;;  %v3170_v7 = vadd.f32 1e-05, %v3162_v40 }
0x1ed6   :  { %v3150_v51 = vpop.xlane.xlu1 %3149  ;;  %v3165_v54 = vmul.f32 0.03125, %v3153_v56  ;;  %5464 = vrsqrt.f32 %v3171_v8 }
0x1ed7   :  { %v3164_v20 = vmul.f32 0.03125, %v3150_v51  ;;  %5466 = vrsqrt.f32 %v3170_v7 }
0x1ed8   :  { %v3173_v28 = vadd.f32 1e-05, %v3165_v54 }
0x1edc   :  { %v5461_v42 = vpop.eup %5460 }
0x1edd   :  { %v5463_v25 = vpop.eup %5462  ;;  %v3185_v31 = vmul.f32 %v5461_v42, %v6829_v35 }
0x1ede   :  { %v3184_v1 = vmul.f32 %v5463_v25, %v6832_v9 }
0x1ee0   :  { %v5465_v53 = vpop.eup %5464 }
0x1ee1   :  { %v5467_v32 = vpop.eup %5466  ;;  %v3187_v62 = vmul.f32 %v5465_v53, %v6836_v58 }
0x1ee2   :  { %v3186_v18 = vmul.f32 %v5467_v32, %v6842_v24 }
0x1ee3   :  { %3193 = vrot.lane.b32.xlu1 %v6787_v63, %s5623_s27 }
0x1ee7   :  { %3204 = vrot.lane.b32.xlu0 %v6787_v63, %s5624_s0  ;;  %3243 = vrot.lane.b32.xlu1 %v6787_v63, %s5626_s4  ;;  %v3172_v63 = vadd.f32 1e-05, %v3164_v20 }
0x1ee9   :  { %5468 = vrsqrt.f32 %v3172_v63 }
0x1eea   :  { %5470 = vrsqrt.f32 %v3173_v28 }
0x1ef3   :  { %v5469_v41 = vpop.eup %5468 }
0x1ef4   :  { %v5471_v19 = vpop.eup %5470  ;;  %v3188_v47 = vmul.f32 %v5469_v41, %v6852_v59 }
0x1ef5   :  { %v3189_v35 = vmul.f32 %v5471_v19, %v6847_v38 }
0x1f5e   :  { %v3159_v14 = vpop.xlane.xlu0 %3158 }
0x1f5f   :  { %v3167_v22 = vmul.f32 0.03125, %v3159_v14  ;;  %v3156_v50 = vpop.xlane.xlu1 %3155 }
0x1f60   :  { %v3166_v36 = vmul.f32 0.03125, %v3156_v50 }
0x1f61   :  { %v3175_v45 = vadd.f32 1e-05, %v3167_v22 }
0x1f62   :  { %v3174_v30 = vadd.f32 1e-05, %v3166_v36  ;;  %v3205_v11 = vpop.permute.xlu0 %3204 }
0x1f63   :  { %5472 = vrsqrt.f32 %v3175_v45  ;;  %v3194_v21 = vpop.permute.xlu1 %3193 }
0x1f64   :  { %5474 = vrsqrt.f32 %v3174_v30  ;;  %v3196_v60 = vmul.f32 %v3194_v21, %v3184_v1  ;;  %v3197_v46 = vmul.f32 %v3194_v21, %v3185_v31  ;;  %v3198_v57 = vmul.f32 %v3194_v21, %v3186_v18 }
0x1f65   :  { %v3199_v27 = vmul.f32 %v3194_v21, %v3187_v62  ;;  %v3200_v39 = vmul.f32 %v3194_v21, %v3188_v47  ;;  %v3201_v23 = vmul.f32 %v3194_v21, %v3189_v35 }
0x1f66   :  { %v3207_v5 = vadd.f32 %v3205_v11, %v3196_v60  ;;  %v3208_v0 = vadd.f32 %v3205_v11, %v3197_v46  ;;  %v3209_v9 = vadd.f32 %v3205_v11, %v3198_v57 }
0x1f67   :  { %v3210_v26 = vadd.f32 %v3205_v11, %v3199_v27  ;;  %v3211_v24 = vadd.f32 %v3205_v11, %v3200_v39  ;;  %v3212_v61 = vadd.f32 %v3205_v11, %v3201_v23  ;;  %v3244_v25 = vpop.permute.xlu1 %3243 }
0x1f68   :  { %vm3215_vm3 = vcmp.ge.f32.partialorder %v3207_v5, 0.0  ;;  %v3223_v49 = vmul.f32 0.01, %v3207_v5  ;;  %vm3216_vm7 = vcmp.ge.f32.partialorder %v3208_v0, 0.0  ;;  %v3224_v58 = vmul.f32 0.01, %v3208_v0 }
0x1f69   :  { %vm3217_vm8 = vcmp.ge.f32.partialorder %v3209_v9, 0.0  ;;  %v3225_v59 = vmul.f32 0.01, %v3209_v9  ;;  %v3226_v33 = vmul.f32 0.01, %v3210_v26  ;;  %vm3218_vm9 = vcmp.ge.f32.partialorder %v3210_v26, 0.0 }
0x1f6a   :  { %v3231_v48 = vsel %vm3215_vm3, %v3207_v5, %v3223_v49  ;;  %v3232_v55 = vsel %vm3216_vm7, %v3208_v0, %v3224_v58  ;;  %v3227_v43 = vmul.f32 0.01, %v3211_v24  ;;  %vm3219_vm10 = vcmp.ge.f32.partialorder %v3211_v24, 0.0 }
0x1f6b   :  { %5114 = vmatprep.mubr.msk.f32.mxu1 %vm101_vm0, %v3231_v48  ;;  %v3233_v38 = vsel %vm3217_vm8, %v3209_v9, %v3225_v59  ;;  %v3234_v40 = vsel %vm3218_vm9, %v3210_v26, %v3226_v33  ;;  %v3228_v56 = vmul.f32 0.01, %v3212_v61  ;;  %vm3220_vm11 = vcmp.ge.f32.partialorder %v3212_v61, 0.0 }
0x1f6c   :  { %5115 = vmatmul.mubr.msk.f32.vlgmr.msra.gmra.mrb[28].mxu1 %vm101_vm0, %v3232_v55  ;;  %v3235_v20 = vsel %vm3219_vm10, %v3211_v24, %v3227_v43 }
0x1f6d   :  { %v5473_v44 = vpop.eup %5472  ;;  %5117 = vmatprep.mubr.msk.f32.mxu1 %vm101_vm0, %v3233_v38  ;;  %v3236_v7 = vsel %vm3220_vm11, %v3212_v61, %v3228_v56 }
0x1f6e   :  { %v5475_v51 = vpop.eup %5474  ;;  %v3191_v2 = vmul.f32 %v5473_v44, %v6865_v34 }
0x1f6f   :  { %v3190_v52 = vmul.f32 %v5475_v51, %v6867_v4 }
0x1f70   :  { %5118 = vmatmul.mubr.msk.f32.gmra.mrb[30].mxu1 %vm101_vm0, %v3234_v40  ;;  %v3203_v29 = vmul.f32 %v3194_v21, %v3191_v2 }
0x1f71   :  { %5120 = vmatprep.mubr.msk.f32.mxu1 %vm101_vm0, %v3235_v20  ;;  %v3202_v8 = vmul.f32 %v3194_v21, %v3190_v52 }
0x1f72   :  { %v3214_v54 = vadd.f32 %v3205_v11, %v3203_v29 }
0x1f73   :  { %v3213_v63 = vadd.f32 %v3205_v11, %v3202_v8 }
0x1f74   :  { %5121 = vmatmul.mubr.msk.f32.gmra.mrb[32].mxu1 %vm101_vm0, %v3236_v7  ;;  %v3230_v28 = vmul.f32 0.01, %v3214_v54  ;;  %vm3222_vm13 = vcmp.ge.f32.partialorder %v3214_v54, 0.0 }
0x1f75   :  { %vm3221_vm12 = vcmp.ge.f32.partialorder %v3213_v63, 0.0  ;;  %v3229_v34 = vmul.f32 0.01, %v3213_v63 }
0x1f76   :  { %v3238_v4 = vsel %vm3222_vm13, %v3214_v54, %v3230_v28 }
0x1f77   :  { %v3237_v42 = vsel %vm3221_vm12, %v3213_v63, %v3229_v34 }
0x1f78   :  { %5123 = vmatprep.mubr.msk.f32.mxu1 %vm101_vm0, %v3237_v42 }
0x1f79   :  { %5124 = vmatmul.mubr.msk.f32.gmra.mrb[34].mxu1 %vm101_vm0, %v3238_v4 }
0x203f   :  { %v5116_v53 = vpop.f32.mrb[28].mxu1 }
0x2040   :  { %v3342_v14 = vadd.f32 %v5116_v53, %v3244_v25  ;;  %v3336_v32 = vpop.f32.mrb[29].mxu1 }
0x2041   :  { %v3337_v22 = vadd.f32 %v3336_v32, %v3244_v25 }
0x2042   :  { %v3378_v50 = vsel %vm101_vm0, %v3342_v14, 0.0 }
0x2043   :  { %3379 = vadd.xlane.f32.xlu0 %v3378_v50  ;;  %v5119_v41 = vpop.f32.mrb[30].mxu1  ;;  %v3375_v36 = vsel %vm101_vm0, %v3337_v22, 0.0 }
0x2044   :  { %v3352_v45 = vadd.f32 %v5119_v41, %v3244_v25  ;;  %v3346_v19 = vpop.f32.mrb[31].mxu1  ;;  %3376 = vadd.xlane.f32.xlu1 %v3375_v36 }
0x2045   :  { %v3347_v31 = vadd.f32 %v3346_v19, %v3244_v25 }
0x2046   :  { %v3384_v30 = vsel %vm101_vm0, %v3352_v45, 0.0 }
0x2047   :  { %v5122_v1 = vpop.f32.mrb[32].mxu1  ;;  %v3381_v18 = vsel %vm101_vm0, %v3347_v31, 0.0 }
0x2048   :  { %v3362_v21 = vadd.f32 %v5122_v1, %v3244_v25  ;;  %v3356_v11 = vpop.f32.mrb[33].mxu1  ;;  %3382 = vadd.xlane.f32.xlu0 %v3381_v18  ;;  %3385 = vadd.xlane.f32.xlu1 %v3384_v30  ;;  %v3528_v30 = vld [vmem:[%s7400_s1 + $0x168] sm:$0xff]  ;;  %v3529_v1 = vld [vmem:[%s7400_s1 + $0x170] sm:$0xff] }
0x2049   :  { %v3357_v62 = vadd.f32 %v3356_v11, %v3244_v25  ;;  %v5278_v18 = vpack.c.bf16 %v3529_v1, %v3528_v30  ;;  %v3531_v11 = vld [vmem:[%s7400_s1 + $0x180] sm:$0xff] }
0x204a   :  { %v3390_v47 = vsel %vm101_vm0, %v3362_v21, 0.0 }
0x204b   :  { %v3387_v60 = vsel %vm101_vm0, %v3357_v62, 0.0  ;;  %5279 = vmatprep.subr.bf16.mxu0 %v5278_v18 }
0x204c   :  { %v5125_v46 = vpop.f32.mrb[34].mxu1  ;;  %3388 = vadd.xlane.f32.xlu0 %v3387_v60  ;;  %3391 = vadd.xlane.f32.xlu1 %v3390_v47 }
0x204d   :  { %v3372_v57 = vadd.f32 %v5125_v46, %v3244_v25  ;;  %v3366_v27 = vpop.f32.mrb[35].mxu1  ;;  %5281 = vmatpush3.bf16.msra.mxu0 %v5278_v18 }
0x204e   :  { %v3367_v39 = vadd.f32 %v3366_v27, %v3244_v25 }
0x204f   :  { %v3396_v35 = vsel %vm101_vm0, %v3372_v57, 0.0 }
0x2050   :  { %3397 = vadd.xlane.f32.xlu1 %v3396_v35  ;;  %v3393_v5 = vsel %vm101_vm0, %v3367_v39, 0.0 }
0x2051   :  { %3394 = vadd.xlane.f32.xlu0 %v3393_v5 }
0x20d0   :  { %v3380_v0 = vpop.xlane.xlu0 %3379 }
0x20d1   :  { %v3400_v9 = vmul.f32 0.03125, %v3380_v0  ;;  %v3377_v26 = vpop.xlane.xlu1 %3376 }
0x20d2   :  { %v3399_v24 = vmul.f32 0.03125, %v3377_v26 }
0x20d3   :  { %v6917_v23 = vsub.f32 %v3342_v14, %v3400_v9 }
0x20d4   :  { %v6919_v49 = vsub.f32 %v3337_v22, %v3399_v24 }
0x20d5   :  { %v3383_v58 = vpop.xlane.xlu0 %3382  ;;  %v3386_v59 = vpop.xlane.xlu1 %3385  ;;  %v3416_v48 = vmul.f32 %v6917_v23, %v6917_v23 }
0x20d6   :  { %v3401_v55 = vmul.f32 0.03125, %v3383_v58  ;;  %v3402_v33 = vmul.f32 0.03125, %v3386_v59  ;;  %v3415_v61 = vmul.f32 %v6919_v49, %v6919_v49 }
0x20d7   :  { %v3426_v38 = vsel %vm101_vm0, %v3416_v48, 0.0 }
0x20d8   :  { %v6926_v43 = vsub.f32 %v3347_v31, %v3401_v55  ;;  %v6928_v44 = vsub.f32 %v3352_v45, %v3402_v33  ;;  %3427 = vadd.xlane.f32.xlu1 %v3426_v38  ;;  %v3423_v51 = vsel %vm101_vm0, %v3415_v61, 0.0  ;;  %v6960_v31 = vld [vmem:[%s7400_s1 + $0x160] ss:$0 sm:$0xff] }
0x20d9   :  { %v3389_v2 = vpop.xlane.xlu0 %3388  ;;  %3424 = vadd.xlane.f32.xlu0 %v3423_v51  ;;  %v3392_v40 = vpop.xlane.xlu1 %3391 }
0x20da   :  { %v3403_v56 = vmul.f32 0.03125, %v3389_v2  ;;  %v3404_v52 = vmul.f32 0.03125, %v3392_v40  ;;  %v3417_v20 = vmul.f32 %v6926_v43, %v6926_v43  ;;  %v3418_v29 = vmul.f32 %v6928_v44, %v6928_v44 }
0x20dc   :  { %v6935_v8 = vsub.f32 %v3357_v62, %v3403_v56  ;;  %v6937_v54 = vsub.f32 %v3362_v21, %v3404_v52  ;;  %v3429_v7 = vsel %vm101_vm0, %v3417_v20, 0.0  ;;  %v3432_v63 = vsel %vm101_vm0, %v3418_v29, 0.0  ;;  %v3530_v21 = vld [vmem:[%s7400_s1 + $0x178] sm:$0xff] }
0x20dd   :  { %3430 = vadd.xlane.f32.xlu0 %v3429_v7  ;;  %3433 = vadd.xlane.f32.xlu1 %v3432_v63  ;;  %v3398_v28 = vpop.xlane.xlu1 %3397  ;;  %v5282_v62 = vpack.c.bf16 %v3531_v11, %v3530_v21 }
0x20de   :  { %v3406_v34 = vmul.f32 0.03125, %v3398_v28  ;;  %v3395_v42 = vpop.xlane.xlu0 %3394  ;;  %v3419_v4 = vmul.f32 %v6935_v8, %v6935_v8  ;;  %v3420_v25 = vmul.f32 %v6937_v54, %v6937_v54 }
0x20df   :  { %v3405_v53 = vmul.f32 0.03125, %v3395_v42  ;;  %5283 = vmatprep.subr.bf16.mxu0 %v5282_v62 }
0x20e0   :  { %v6945_v14 = vsub.f32 %v3372_v57, %v3406_v34  ;;  %v3435_v32 = vsel %vm101_vm0, %v3419_v4, 0.0  ;;  %v3438_v22 = vsel %vm101_vm0, %v3420_v25, 0.0  ;;  %5285 = vmatpush3.bf16.msra.mxu0 %v5282_v62 }
0x20e1   :  { %v6949_v50 = vsub.f32 %v3367_v39, %v3405_v53  ;;  %3436 = vadd.xlane.f32.xlu0 %v3435_v32  ;;  %3439 = vadd.xlane.f32.xlu1 %v3438_v22 }
0x20e2   :  { %v3422_v41 = vmul.f32 %v6945_v14, %v6945_v14 }
0x20e3   :  { %v3421_v36 = vmul.f32 %v6949_v50, %v6949_v50 }
0x20e4   :  { %v3444_v45 = vsel %vm101_vm0, %v3422_v41, 0.0 }
0x20e5   :  { %3445 = vadd.xlane.f32.xlu1 %v3444_v45  ;;  %v3441_v19 = vsel %vm101_vm0, %v3421_v36, 0.0 }
0x20e6   :  { %3442 = vadd.xlane.f32.xlu0 %v3441_v19 }
0x20f6   :  { %3532 = vrot.lane.b32.xlu1 %v6960_v31, %s5624_s0 }
0x20fc   :  { %3493 = vrot.lane.b32.xlu0 %v6960_v31, %s5623_s27 }
0x2165   :  { %v3428_v47 = vpop.xlane.xlu1 %3427 }
0x2166   :  { %v3448_v60 = vmul.f32 0.03125, %v3428_v47  ;;  %v3425_v46 = vpop.xlane.xlu0 %3424 }
0x2167   :  { %v3447_v57 = vmul.f32 0.03125, %v3425_v46 }
0x2168   :  { %v3456_v27 = vadd.f32 1e-05, %v3448_v60 }
0x2169   :  { %v3455_v39 = vadd.f32 1e-05, %v3447_v57 }
0x216a   :  { %5476 = vrsqrt.f32 %v3456_v27  ;;  %v3431_v35 = vpop.xlane.xlu0 %3430  ;;  %v3434_v5 = vpop.xlane.xlu1 %3433 }
0x216b   :  { %5478 = vrsqrt.f32 %v3455_v39  ;;  %v3449_v0 = vmul.f32 0.03125, %v3431_v35  ;;  %v3450_v9 = vmul.f32 0.03125, %v3434_v5 }
0x216d   :  { %v3457_v26 = vadd.f32 1e-05, %v3449_v0  ;;  %v3458_v24 = vadd.f32 1e-05, %v3450_v9 }
0x216e   :  { %v3437_v58 = vpop.xlane.xlu0 %3436  ;;  %v3440_v59 = vpop.xlane.xlu1 %3439 }
0x216f   :  { %5480 = vrsqrt.f32 %v3457_v26  ;;  %v3451_v48 = vmul.f32 0.03125, %v3437_v58  ;;  %v3452_v55 = vmul.f32 0.03125, %v3440_v59 }
0x2170   :  { %5482 = vrsqrt.f32 %v3458_v24 }
0x2171   :  { %v3459_v33 = vadd.f32 1e-05, %v3451_v48  ;;  %v3460_v61 = vadd.f32 1e-05, %v3452_v55 }
0x2172   :  { %v3446_v38 = vpop.xlane.xlu1 %3445 }
0x2173   :  { %5484 = vrsqrt.f32 %v3459_v33  ;;  %v3454_v51 = vmul.f32 0.03125, %v3446_v38  ;;  %v3443_v2 = vpop.xlane.xlu0 %3442 }
0x2174   :  { %v5477_v40 = vpop.eup %5476  ;;  %5486 = vrsqrt.f32 %v3460_v61  ;;  %v3453_v56 = vmul.f32 0.03125, %v3443_v2 }
0x2175   :  { %v5479_v52 = vpop.eup %5478  ;;  %v3472_v20 = vmul.f32 %v5477_v40, %v6917_v23  ;;  %v3462_v29 = vadd.f32 1e-05, %v3454_v51 }
0x2176   :  { %v3461_v7 = vadd.f32 1e-05, %v3453_v56  ;;  %v3471_v63 = vmul.f32 %v5479_v52, %v6919_v49  ;;  %v3533_v51 = vpop.permute.xlu1 %3532 }
0x2177   :  { %v3485_v28 = vmul.f32 %v6960_v31, %v3472_v20  ;;  %5488 = vrsqrt.f32 %v3462_v29  ;;  %v3494_v34 = vpop.permute.xlu0 %3493 }
0x2178   :  { %5490 = vrsqrt.f32 %v3461_v7  ;;  %v3484_v42 = vmul.f32 %v6960_v31, %v3471_v63 }
0x2179   :  { %v5481_v4 = vpop.eup %5480  ;;  %v3497_v25 = vadd.f32 %v3494_v34, %v3485_v28 }
0x217a   :  { %v5483_v53 = vpop.eup %5482  ;;  %v3496_v32 = vadd.f32 %v3494_v34, %v3484_v42  ;;  %v3473_v22 = vmul.f32 %v5481_v4, %v6926_v43 }
0x217b   :  { %v3513_v41 = vmul.f32 0.01, %v3497_v25  ;;  %v3474_v23 = vmul.f32 %v5483_v53, %v6928_v44  ;;  %vm3505_vm15 = vcmp.ge.f32.partialorder %v3497_v25, 0.0 }
0x217c   :  { %vm3504_vm14 = vcmp.ge.f32.partialorder %v3496_v32, 0.0  ;;  %v3512_v36 = vmul.f32 0.01, %v3496_v32  ;;  %v3486_v49 = vmul.f32 %v6960_v31, %v3473_v22 }
0x217d   :  { %v5485_v45 = vpop.eup %5484  ;;  %v3487_v19 = vmul.f32 %v6960_v31, %v3474_v23  ;;  %v3521_v11 = vsel %vm3505_vm15, %v3497_v25, %v3513_v41 }
0x217e   :  { %v5487_v30 = vpop.eup %5486  ;;  %v3520_v1 = vsel %vm3504_vm14, %v3496_v32, %v3512_v36  ;;  %v3498_v18 = vadd.f32 %v3494_v34, %v3486_v49  ;;  %v3475_v21 = vmul.f32 %v5485_v45, %v6935_v8 }
0x217f   :  { %5134 = vmatprep.mubr.msk.f32.mxu0 %vm101_vm0, %v3520_v1  ;;  %v3499_v43 = vadd.f32 %v3494_v34, %v3487_v19  ;;  %v3476_v62 = vmul.f32 %v5487_v30, %v6937_v54 }
0x2180   :  { %5135 = vmatmul.mubr.msk.f32.vlgmr.msra.gmra.mrb[36].mxu0 %vm101_vm0, %v3521_v11  ;;  %vm3506_vm1 = vcmp.ge.f32.partialorder %v3498_v18, 0.0  ;;  %v3514_v44 = vmul.f32 0.01, %v3498_v18  ;;  %v3488_v47 = vmul.f32 %v6960_v31, %v3475_v21 }
0x2181   :  { %v5489_v60 = vpop.eup %5488  ;;  %vm3507_vm2 = vcmp.ge.f32.partialorder %v3499_v43, 0.0  ;;  %v3515_v46 = vmul.f32 0.01, %v3499_v43  ;;  %v3489_v57 = vmul.f32 %v6960_v31, %v3476_v62 }
0x2182   :  { %v5491_v27 = vpop.eup %5490  ;;  %v3522_v39 = vsel %vm3506_vm1, %v3498_v18, %v3514_v44  ;;  %v3500_v8 = vadd.f32 %v3494_v34, %v3488_v47  ;;  %v3478_v35 = vmul.f32 %v5489_v60, %v6945_v14 }
0x2183   :  { %5137 = vmatprep.mubr.msk.f32.mxu0 %vm101_vm0, %v3522_v39  ;;  %v3523_v5 = vsel %vm3507_vm2, %v3499_v43, %v3515_v46  ;;  %v3501_v54 = vadd.f32 %v3494_v34, %v3489_v57  ;;  %v3477_v0 = vmul.f32 %v5491_v27, %v6949_v50 }
0x2184   :  { %5138 = vmatmul.mubr.msk.f32.gmra.mrb[38].mxu0 %vm101_vm0, %v3523_v5  ;;  %vm3508_vm4 = vcmp.ge.f32.partialorder %v3500_v8, 0.0  ;;  %v3516_v9 = vmul.f32 0.01, %v3500_v8  ;;  %v3491_v26 = vmul.f32 %v6960_v31, %v3478_v35 }
0x2185   :  { %vm3509_vm5 = vcmp.ge.f32.partialorder %v3501_v54, 0.0  ;;  %v3517_v24 = vmul.f32 0.01, %v3501_v54  ;;  %v3490_v58 = vmul.f32 %v6960_v31, %v3477_v0 }
0x2186   :  { %v3524_v59 = vsel %vm3508_vm4, %v3500_v8, %v3516_v9  ;;  %v3503_v48 = vadd.f32 %v3494_v34, %v3491_v26 }
0x2187   :  { %5140 = vmatprep.mubr.msk.f32.mxu0 %vm101_vm0, %v3524_v59  ;;  %v3525_v14 = vsel %vm3509_vm5, %v3501_v54, %v3517_v24  ;;  %v3502_v55 = vadd.f32 %v3494_v34, %v3490_v58 }
0x2188   :  { %5141 = vmatmul.mubr.msk.f32.gmra.mrb[40].mxu0 %vm101_vm0, %v3525_v14  ;;  %v3519_v33 = vmul.f32 0.01, %v3503_v48  ;;  %vm3511_vm3 = vcmp.ge.f32.partialorder %v3503_v48, 0.0 }
0x2189   :  { %vm3510_vm6 = vcmp.ge.f32.partialorder %v3502_v55, 0.0  ;;  %v3518_v50 = vmul.f32 0.01, %v3502_v55 }
0x218a   :  { %v3527_v38 = vsel %vm3511_vm3, %v3503_v48, %v3519_v33 }
0x218b   :  { %v3526_v61 = vsel %vm3510_vm6, %v3502_v55, %v3518_v50 }
0x218c   :  { %5143 = vmatprep.mubr.msk.f32.mxu0 %vm101_vm0, %v3526_v61 }
0x218d   :  { %5144 = vmatmul.mubr.msk.f32.gmra.mrb[42].mxu0 %vm101_vm0, %v3527_v38 }
0x2253   :  { %v5136_v2 = vpop.f32.mrb[36].mxu0 }
0x2254   :  { %v3625_v40 = vpop.f32.mrb[37].mxu0  ;;  %v3631_v56 = vadd.f32 %v5136_v2, %v3533_v51 }
0x2255   :  { %v3626_v52 = vadd.f32 %v3625_v40, %v3533_v51 }
0x2256   :  { %v3667_v20 = vsel %vm101_vm0, %v3631_v56, 0.0 }
0x2257   :  { %v5139_v29 = vpop.f32.mrb[38].mxu0  ;;  %3668 = vadd.xlane.f32.xlu0 %v3667_v20  ;;  %v3664_v7 = vsel %vm101_vm0, %v3626_v52, 0.0 }
0x2258   :  { %v3641_v63 = vadd.f32 %v5139_v29, %v3533_v51  ;;  %v3635_v28 = vpop.f32.mrb[39].mxu0  ;;  %3665 = vadd.xlane.f32.xlu1 %v3664_v7 }
0x2259   :  { %v3636_v34 = vadd.f32 %v3635_v28, %v3533_v51 }
0x225a   :  { %v3673_v42 = vsel %vm101_vm0, %v3641_v63, 0.0 }
0x225b   :  { %v5142_v4 = vpop.f32.mrb[40].mxu0  ;;  %v3670_v25 = vsel %vm101_vm0, %v3636_v34, 0.0 }
0x225c   :  { %v3651_v53 = vadd.f32 %v5142_v4, %v3533_v51  ;;  %v3645_v32 = vpop.f32.mrb[41].mxu0  ;;  %3671 = vadd.xlane.f32.xlu0 %v3670_v25  ;;  %3674 = vadd.xlane.f32.xlu1 %v3673_v42 }
0x225d   :  { %v3646_v22 = vadd.f32 %v3645_v32, %v3533_v51 }
0x225e   :  { %v3679_v41 = vsel %vm101_vm0, %v3651_v53, 0.0 }
0x225f   :  { %v3676_v23 = vsel %vm101_vm0, %v3646_v22, 0.0 }
0x2260   :  { %v5145_v36 = vpop.f32.mrb[42].mxu0  ;;  %3677 = vadd.xlane.f32.xlu0 %v3676_v23  ;;  %3680 = vadd.xlane.f32.xlu1 %v3679_v41  ;;  %v7055_v41 = vld [vmem:[%s7400_s1 + $0x188] ss:$0 sm:$0xff] }
0x2261   :  { %v3661_v49 = vadd.f32 %v5145_v36, %v3533_v51  ;;  %v3655_v45 = vpop.f32.mrb[43].mxu0 }
0x2262   :  { %v3656_v19 = vadd.f32 %v3655_v45, %v3533_v51 }
0x2263   :  { %v3685_v30 = vsel %vm101_vm0, %v3661_v49, 0.0 }
0x2264   :  { %3686 = vadd.xlane.f32.xlu1 %v3685_v30  ;;  %v3682_v1 = vsel %vm101_vm0, %v3656_v19, 0.0  ;;  %v3818_v30 = vld [vmem:[%s7400_s1 + $0x1a0] sm:$0xff] }
0x2265   :  { %3683 = vadd.xlane.f32.xlu0 %v3682_v1  ;;  %v3819_v1 = vld [vmem:[%s7400_s1 + $0x1a8] sm:$0xff] }
0x22e4   :  { %v3669_v18 = vpop.xlane.xlu0 %3668 }
0x22e5   :  { %v3689_v21 = vmul.f32 0.03125, %v3669_v18  ;;  %v3666_v11 = vpop.xlane.xlu1 %3665 }
0x22e6   :  { %v3688_v43 = vmul.f32 0.03125, %v3666_v11 }
0x22e7   :  { %v7010_v62 = vsub.f32 %v3631_v56, %v3689_v21  ;;  %v4121_v56 = vlaneseq }
0x22e8   :  { %v7012_v44 = vsub.f32 %v3626_v52, %v3688_v43 }
0x22e9   :  { %v3672_v47 = vpop.xlane.xlu0 %3671  ;;  %v3675_v60 = vpop.xlane.xlu1 %3674  ;;  %v3705_v46 = vmul.f32 %v7010_v62, %v7010_v62 }
0x22ea   :  { %v3690_v57 = vmul.f32 0.03125, %v3672_v47  ;;  %v3691_v27 = vmul.f32 0.03125, %v3675_v60  ;;  %v3704_v39 = vmul.f32 %v7012_v44, %v7012_v44 }
0x22eb   :  { %v3715_v8 = vsel %vm101_vm0, %v3705_v46, 0.0 }
0x22ec   :  { %v7019_v35 = vsub.f32 %v3636_v34, %v3690_v57  ;;  %v7021_v5 = vsub.f32 %v3641_v63, %v3691_v27  ;;  %3716 = vadd.xlane.f32.xlu1 %v3715_v8  ;;  %v3712_v54 = vsel %vm101_vm0, %v3704_v39, 0.0  ;;  %v4122_v34 = vand.u32 127, %v4121_v56 }
0x22ed   :  { %v3678_v0 = vpop.xlane.xlu0 %3677  ;;  %3713 = vadd.xlane.f32.xlu0 %v3712_v54  ;;  %v3681_v9 = vpop.xlane.xlu1 %3680 }
0x22ee   :  { %v3692_v26 = vmul.f32 0.03125, %v3678_v0  ;;  %v3693_v24 = vmul.f32 0.03125, %v3681_v9  ;;  %v3706_v58 = vmul.f32 %v7019_v35, %v7019_v35  ;;  %v3707_v59 = vmul.f32 %v7021_v5, %v7021_v5 }
0x22ef   :  { %v4123_v25 = vadd.s32 1, %v4122_v34 }
0x22f0   :  { %v7028_v48 = vsub.f32 %v3646_v22, %v3692_v26  ;;  %v7030_v14 = vsub.f32 %v3651_v53, %v3693_v24  ;;  %v3718_v55 = vsel %vm101_vm0, %v3706_v58, 0.0  ;;  %v3721_v33 = vsel %vm101_vm0, %v3707_v59, 0.0 }
0x22f1   :  { %3719 = vadd.xlane.f32.xlu0 %v3718_v55  ;;  %3722 = vadd.xlane.f32.xlu1 %v3721_v33  ;;  %v3687_v50 = vpop.xlane.xlu1 %3686  ;;  %v4124_v53 = vcvt.s32.f32 %v4123_v25 }
0x22f2   :  { %v3695_v61 = vmul.f32 0.03125, %v3687_v50  ;;  %v3684_v38 = vpop.xlane.xlu0 %3683  ;;  %v3708_v51 = vmul.f32 %v7028_v48, %v7028_v48  ;;  %v3709_v2 = vmul.f32 %v7030_v14, %v7030_v14 }
0x22f3   :  { %v3694_v40 = vmul.f32 0.03125, %v3684_v38  ;;  %v4125_v32 = vmul.f32 %v4124_v53, %v5804_v16  ;;  %v4127_v22 = vmul.f32 %v4124_v53, %v5796_v12  ;;  %v4126_v23 = vmul.f32 %v4124_v53, %v5792_v10  ;;  %v3817_v16 = vld [vmem:[%s7400_s1 + $0x198] sm:$0xff] }
0x22f4   :  { %v7038_v52 = vsub.f32 %v3661_v49, %v3695_v61  ;;  %v3724_v20 = vsel %vm101_vm0, %v3708_v51, 0.0  ;;  %v3727_v29 = vsel %vm101_vm0, %v3709_v2, 0.0  ;;  %v3816_v49 = vld [vmem:[%s7400_s1 + $0x190] sm:$0xff]  ;;  %v4129_v12 = vmul.f32 %v4124_v53, %v5802_v15  ;;  %s5631_s1 = smov 127  }
0x22f5   :  { %v7042_v7 = vsub.f32 %v3656_v19, %v3694_v40  ;;  %3725 = vadd.xlane.f32.xlu0 %v3724_v20  ;;  %3728 = vadd.xlane.f32.xlu1 %v3727_v29  ;;  %vm4133_vm7 = vcmp.lt.f32.partialorder %v4125_v32, 8000.0  ;;  %vm4135_vm8 = vcmp.lt.f32.partialorder %v4127_v22, 8000.0  ;;  %v5286_v45 = vpack.c.bf16 %v3817_v16, %v3816_v49 }
0x22f6   :  { %v3711_v63 = vmul.f32 %v7038_v52, %v7038_v52  ;;  %v4702_v36 = vsel %vm4133_vm7, 1.0, %v5629_v6  ;;  %vm4134_vm9 = vcmp.lt.f32.partialorder %v4126_v23, 8000.0  ;;  %v4128_v10 = vmul.f32 %v4124_v53, %v5798_v13 }
0x22f7   :  { %v3710_v28 = vmul.f32 %v7042_v7, %v7042_v7  ;;  %v4157_v19 = vadd.f32 0.0001, %v4702_v36  ;;  %5287 = vmatprep.subr.bf16.mxu1 %v5286_v45  ;;  %v4704_v18 = vsel %vm4135_vm8, 1.0, %v5629_v6  ;;  %v5290_v15 = vpack.c.bf16 %v3819_v1, %v3818_v30 }
0x22f8   :  { %v3733_v42 = vsel %vm101_vm0, %v3711_v63, 0.0  ;;  %5289 = vmatpush3.bf16.msra.mxu1 %v5286_v45  ;;  %vm4137_vm10 = vcmp.lt.f32.partialorder %v4129_v12, 8000.0  ;;  %v4131_v21 = vmul.f32 %v4124_v53, %v5828_v37  ;;  %v4703_v13 = vsel %vm4134_vm9, 1.0, %v5629_v6 }
0x22f9   :  { %3734 = vadd.xlane.f32.xlu1 %v3733_v42  ;;  %v3730_v4 = vsel %vm101_vm0, %v3710_v28, 0.0  ;;  %5291 = vmatprep.subr.bf16.mxu1 %v5290_v15  ;;  %vm4136_vm11 = vcmp.lt.f32.partialorder %v4128_v10, 8000.0  ;;  %v4130_v11 = vmul.f32 %v4124_v53, %v5806_v17  ;;  %v4159_v43 = vadd.f32 0.0001, %v4704_v18 }
0x22fa   :  { %3731 = vadd.xlane.f32.xlu0 %v3730_v4  ;;  %v4706_v47 = vsel %vm4137_vm10, 1.0, %v5629_v6  ;;  %vm4139_vm12 = vcmp.lt.f32.partialorder %v4131_v21, 8000.0  ;;  %v4158_v60 = vadd.f32 0.0001, %v4703_v13  ;;  %v4705_v37 = vsel %vm4136_vm11, 1.0, %v5629_v6 }
0x22fb   :  { %vm4138_vm13 = vcmp.lt.f32.partialorder %v4130_v11, 8000.0  ;;  %v4132_v46 = vmul.f32 %v4124_v53, %v5873_v3  ;;  %v4161_v57 = vadd.f32 0.0001, %v4706_v47  ;;  %v4708_v27 = vsel %vm4139_vm12, 1.0, %v5629_v6 }
0x22fc   :  { %5293 = vmatpush3.bf16.msra.mxu1 %v5290_v15  ;;  %v4160_v17 = vadd.f32 0.0001, %v4705_v37  ;;  %v4163_v39 = vadd.f32 0.0001, %v4708_v27 }
0x22fd   :  { %vm4140_vm14 = vcmp.lt.f32.partialorder %v4132_v46, 8000.0 }
0x22fe   :  { %v4709_v54 = vsel %vm4140_vm14, 1.0, %v5629_v6 }
0x22ff   :  { %v4164_v0 = vadd.f32 0.0001, %v4709_v54 }
0x230a   :  { %3821 = vrot.lane.b32.xlu1 %v7055_v41, %s5623_s27  ;;  %s5630_s27 = smov 1  }
0x230e   :  { %4173 = vrot.lane.b32.xlu1 %v4157_v19, %s5630_s27 }
0x2310   :  { %3768 = vrot.lane.b32.xlu0 %v6960_v31, %s5626_s4  ;;  %v4707_v31 = vsel %vm4138_vm13, 1.0, %v5629_v6 }
0x2311   :  { %v4162_v8 = vadd.f32 0.0001, %v4707_v31 }
0x2312   :  { %4177 = vrot.lane.b32.xlu1 %v4159_v43, %s5630_s27 }
0x2314   :  { %4175 = vrot.lane.b32.xlu0 %v4158_v60, %s5630_s27 }
0x2316   :  { %4181 = vrot.lane.b32.xlu1 %v4161_v57, %s5630_s27 }
0x2318   :  { %4179 = vrot.lane.b32.xlu0 %v4160_v17, %s5630_s27 }
0x231a   :  { %4185 = vrot.lane.b32.xlu1 %v4163_v39, %s5630_s27 }
0x231c   :  { %4183 = vrot.lane.b32.xlu0 %v4162_v8, %s5630_s27 }
0x2320   :  { %4187 = vrot.lane.b32.xlu0 %v4164_v0, %s5630_s27 }
0x2379   :  { %v3717_v9 = vpop.xlane.xlu1 %3716 }
0x237a   :  { %v3737_v3 = vmul.f32 0.03125, %v3717_v9  ;;  %v3714_v26 = vpop.xlane.xlu0 %3713 }
0x237b   :  { %v3736_v24 = vmul.f32 0.03125, %v3714_v26 }
0x237c   :  { %v3745_v58 = vadd.f32 1e-05, %v3737_v3 }
0x237d   :  { %v3744_v59 = vadd.f32 1e-05, %v3736_v24 }
0x237e   :  { %5492 = vrsqrt.f32 %v3745_v58  ;;  %v3720_v55 = vpop.xlane.xlu0 %3719  ;;  %v3723_v33 = vpop.xlane.xlu1 %3722 }
0x237f   :  { %5494 = vrsqrt.f32 %v3744_v59  ;;  %v3738_v50 = vmul.f32 0.03125, %v3720_v55  ;;  %v3739_v61 = vmul.f32 0.03125, %v3723_v33 }
0x2381   :  { %v3746_v38 = vadd.f32 1e-05, %v3738_v50  ;;  %v3747_v51 = vadd.f32 1e-05, %v3739_v61 }
0x2382   :  { %v3726_v2 = vpop.xlane.xlu0 %3725  ;;  %v3729_v40 = vpop.xlane.xlu1 %3728 }
0x2383   :  { %5496 = vrsqrt.f32 %v3746_v38  ;;  %v3740_v6 = vmul.f32 0.03125, %v3726_v2  ;;  %v3741_v56 = vmul.f32 0.03125, %v3729_v40 }
0x2384   :  { %5498 = vrsqrt.f32 %v3747_v51 }
0x2385   :  { %v3748_v20 = vadd.f32 1e-05, %v3740_v6  ;;  %v3749_v29 = vadd.f32 1e-05, %v3741_v56 }
0x2386   :  { %v3735_v63 = vpop.xlane.xlu1 %3734 }
0x2387   :  { %5500 = vrsqrt.f32 %v3748_v20  ;;  %v3743_v28 = vmul.f32 0.03125, %v3735_v63  ;;  %v3732_v34 = vpop.xlane.xlu0 %3731 }
0x2388   :  { %v5493_v42 = vpop.eup %5492  ;;  %5502 = vrsqrt.f32 %v3749_v29  ;;  %v3742_v4 = vmul.f32 0.03125, %v3732_v34 }
0x2389   :  { %v5495_v25 = vpop.eup %5494  ;;  %v3761_v53 = vmul.f32 %v5493_v42, %v7010_v62  ;;  %v3751_v32 = vadd.f32 1e-05, %v3743_v28 }
0x238a   :  { %v3750_v22 = vadd.f32 1e-05, %v3742_v4  ;;  %v3760_v23 = vmul.f32 %v5495_v25, %v7012_v44  ;;  %v7111_v38 = vpop.permute.xlu1 %3821 }
0x238b   :  { %5504 = vrsqrt.f32 %v3751_v32  ;;  %v3769_v36 = vpop.permute.xlu0 %3768 }
0x238c   :  { %5506 = vrsqrt.f32 %v3750_v22  ;;  %v3771_v49 = vmul.f32 %v3769_v36, %v3760_v23  ;;  %v3772_v16 = vmul.f32 %v3769_v36, %v3761_v53 }
0x238d   :  { %v5497_v12 = vpop.eup %5496 }
0x238e   :  { %v5499_v45 = vpop.eup %5498  ;;  %v3784_v10 = vadd.f32 %v7055_v41, %v3771_v49  ;;  %v3785_v19 = vadd.f32 %v7055_v41, %v3772_v16  ;;  %v3762_v30 = vmul.f32 %v5497_v12, %v7019_v35 }
0x238f   :  { %v3763_v1 = vmul.f32 %v5499_v45, %v7021_v5 }
0x2390   :  { %vm3792_vm15 = vcmp.ge.f32.partialorder %v3784_v10, 0.0  ;;  %v3800_v62 = vmul.f32 0.01, %v3784_v10  ;;  %vm3793_vm1 = vcmp.ge.f32.partialorder %v3785_v19, 0.0  ;;  %v3801_v18 = vmul.f32 0.01, %v3785_v19 }
0x2391   :  { %v5501_v44 = vpop.eup %5500  ;;  %v3773_v15 = vmul.f32 %v3769_v36, %v3762_v30  ;;  %v3774_v21 = vmul.f32 %v3769_v36, %v3763_v1 }
0x2392   :  { %v5503_v13 = vpop.eup %5502  ;;  %v3808_v11 = vsel %vm3792_vm15, %v3784_v10, %v3800_v62  ;;  %v3809_v43 = vsel %vm3793_vm1, %v3785_v19, %v3801_v18  ;;  %v3764_v47 = vmul.f32 %v5501_v44, %v7028_v48  ;;  %vm4237_vm15 = vcmask 130048  }
0x2393   :  { %5154 = vmatprep.mubr.msk.f32.mxu1 %vm101_vm0, %v3808_v11  ;;  %v3786_v60 = vadd.f32 %v7055_v41, %v3773_v15  ;;  %v3787_v35 = vadd.f32 %v7055_v41, %v3774_v21  ;;  %v3765_v5 = vmul.f32 %v5503_v13, %v7030_v14 }
0x2394   :  { %5155 = vmatmul.mubr.msk.f32.vlgmr.msra.gmra.mrb[36].mxu1 %vm101_vm0, %v3809_v43  ;;  %v3775_v37 = vmul.f32 %v3769_v36, %v3764_v47 }
0x2395   :  { %v5505_v46 = vpop.eup %5504  ;;  %vm3794_vm2 = vcmp.ge.f32.partialorder %v3786_v60, 0.0  ;;  %v3802_v57 = vmul.f32 0.01, %v3786_v60  ;;  %vm3795_vm4 = vcmp.ge.f32.partialorder %v3787_v35, 0.0  ;;  %v3803_v27 = vmul.f32 0.01, %v3787_v35 }
0x2396   :  { %v5507_v17 = vpop.eup %5506  ;;  %v3788_v31 = vadd.f32 %v7055_v41, %v3775_v37  ;;  %v3776_v48 = vmul.f32 %v3769_v36, %v3765_v5  ;;  %v3767_v39 = vmul.f32 %v5505_v46, %v7038_v52 }
0x2397   :  { %v3810_v8 = vsel %vm3794_vm2, %v3786_v60, %v3802_v57  ;;  %v3811_v54 = vsel %vm3795_vm4, %v3787_v35, %v3803_v27  ;;  %v3766_v0 = vmul.f32 %v5507_v17, %v7042_v7 }
0x2398   :  { %5157 = vmatprep.mubr.msk.f32.mxu1 %vm101_vm0, %v3810_v8  ;;  %vm3796_vm5 = vcmp.ge.f32.partialorder %v3788_v31, 0.0  ;;  %v3804_v14 = vmul.f32 0.01, %v3788_v31  ;;  %v3789_v9 = vadd.f32 %v7055_v41, %v3776_v48  ;;  %v3778_v3 = vmul.f32 %v3769_v36, %v3767_v39 }
0x2399   :  { %5158 = vmatmul.mubr.msk.f32.gmra.mrb[38].mxu1 %vm101_vm0, %v3811_v54  ;;  %v3777_v26 = vmul.f32 %v3769_v36, %v3766_v0 }
0x239a   :  { %v3812_v24 = vsel %vm3796_vm5, %v3788_v31, %v3804_v14  ;;  %vm3797_vm6 = vcmp.ge.f32.partialorder %v3789_v9, 0.0  ;;  %v3805_v58 = vmul.f32 0.01, %v3789_v9  ;;  %v3791_v59 = vadd.f32 %v7055_v41, %v3778_v3 }
0x239b   :  { %5160 = vmatprep.mubr.msk.f32.mxu1 %vm101_vm0, %v3812_v24  ;;  %v3790_v52 = vadd.f32 %v7055_v41, %v3777_v26 }
0x239c   :  { %v3813_v7 = vsel %vm3797_vm6, %v3789_v9, %v3805_v58  ;;  %v3807_v55 = vmul.f32 0.01, %v3791_v59  ;;  %vm3799_vm7 = vcmp.ge.f32.partialorder %v3791_v59, 0.0 }
0x239d   :  { %5161 = vmatmul.mubr.msk.f32.gmra.mrb[40].mxu1 %vm101_vm0, %v3813_v7  ;;  %vm3798_vm3 = vcmp.ge.f32.partialorder %v3790_v52, 0.0  ;;  %v3806_v33 = vmul.f32 0.01, %v3790_v52 }
0x239e   :  { %v3815_v61 = vsel %vm3799_vm7, %v3791_v59, %v3807_v55 }
0x239f   :  { %v3814_v50 = vsel %vm3798_vm3, %v3790_v52, %v3806_v33 }
0x23a0   :  { %5163 = vmatprep.mubr.msk.f32.mxu1 %vm101_vm0, %v3814_v50 }
0x23a1   :  { %5164 = vmatmul.mubr.msk.f32.gmra.mrb[42].mxu1 %vm101_vm0, %v3815_v61 }
0x2467   :  { %v5156_v51 = vpop.f32.mrb[36].mxu1 }
0x2468   :  { %v7114_v2 = vadd.f32 %v5156_v51, %v7111_v38  ;;  %v3914_v41 = vpop.f32.mrb[37].mxu1 }
0x2469   :  { %v7117_v40 = vadd.f32 %v3914_v41, %v7111_v38 }
0x246a   :  { %v3970_v6 = vand.u32 2147483647, %v7114_v2  ;;  %v3954_v5 = vsub.f32 0.0, %v7114_v2 }
0x246b   :  { %v3969_v56 = vand.u32 2147483647, %v7117_v40  ;;  %v3953_v57 = vsub.f32 0.0, %v7117_v40 }
0x246c   :  { %v3978_v20 = vsub.f32 0.0, %v3970_v6  ;;  %v5159_v29 = vpop.f32.mrb[38].mxu1  ;;  %v3962_v54 = vmax.f32 %v3954_v5, 0.0 }
0x246d   :  { %v3977_v63 = vsub.f32 0.0, %v3969_v56  ;;  %v3924_v28 = vpop.f32.mrb[39].mxu1  ;;  %v7122_v42 = vadd.f32 %v5159_v29, %v7111_v38  ;;  %v3961_v9 = vmax.f32 %v3953_v57, 0.0 }
0x246e   :  { %v3987_v34 = vmul.f32 1.442695, %v3978_v20  ;;  %v7125_v25 = vadd.f32 %v3924_v28, %v7111_v38 }
0x246f   :  { %v3985_v4 = vmul.f32 1.442695, %v3977_v63  ;;  %v3972_v53 = vand.u32 2147483647, %v7122_v42  ;;  %v3956_v58 = vsub.f32 0.0, %v7122_v42 }
0x2470   :  { %5508 = vpow2.f32 %v3987_v34  ;;  %v5162_v32 = vpop.f32.mrb[40].mxu1  ;;  %v3971_v36 = vand.u32 2147483647, %v7125_v25  ;;  %v3955_v56 = vsub.f32 0.0, %v7125_v25 }
0x2471   :  { %5510 = vpow2.f32 %v3985_v4  ;;  %v3934_v22 = vpop.f32.mrb[41].mxu1  ;;  %v3980_v23 = vsub.f32 0.0, %v3972_v53  ;;  %v7130_v12 = vadd.f32 %v5162_v32, %v7111_v38  ;;  %v3964_v53 = vmax.f32 %v3956_v58, 0.0 }
0x2472   :  { %v3979_v16 = vsub.f32 0.0, %v3971_v36  ;;  %v7141_v51 = vadd.f32 %v3934_v22, %v7111_v38 }
0x2473   :  { %v3991_v49 = vmul.f32 1.442695, %v3980_v23  ;;  %v3974_v30 = vand.u32 2147483647, %v7130_v12 }
0x2474   :  { %v7132_v45 = vpop.f32.mrb[42].mxu1  ;;  %v3989_v19 = vmul.f32 1.442695, %v3979_v16  ;;  %v3973_v22 = vand.u32 2147483647, %v7141_v51 }
0x2475   :  { %v7134_v10 = vpop.f32.mrb[43].mxu1  ;;  %5512 = vpow2.f32 %v3991_v49  ;;  %v3982_v62 = vsub.f32 0.0, %v3974_v30 }
0x2476   :  { %5514 = vpow2.f32 %v3989_v19  ;;  %v3963_v19 = vmax.f32 %v3955_v56, 0.0 }
0x2477   :  { %v3995_v21 = vmul.f32 1.442695, %v3982_v62 }
0x247a   :  { %v5509_v1 = vpop.eup %5508 }
0x247b   :  { %v5511_v18 = vpop.eup %5510  ;;  %v4010_v44 = vadd.f32 1.0, %v5509_v1  ;;  %v4013_v11 = vmul.f32 -0.5, %v5509_v1  ;;  %v4016_v46 = vand.u32 2147483647, %v5509_v1 }
0x247c   :  { %v4001_v15 = vadd.f32 1.0, %v5511_v18  ;;  %v4004_v43 = vmul.f32 -0.5, %v5511_v18  ;;  %v4007_v17 = vand.u32 2147483647, %v5511_v18 }
0x247d   :  { %5516 = vlog2.f32 %v4010_v44  ;;  %v4014_v37 = vadd.f32 1.0, %v4013_v11  ;;  %vm4017_vm0 = vcmp.lt.f32.partialorder %v4016_v46, 0.0004427343 }
0x247e   :  { %5518 = vlog2.f32 %v4001_v15  ;;  %v4005_v27 = vadd.f32 1.0, %v4004_v43  ;;  %vm4008_vm8 = vcmp.lt.f32.partialorder %v4007_v17, 0.0004427343  ;;  %v3981_v15 = vsub.f32 0.0, %v3973_v22 }
0x247f   :  { %v5513_v13 = vpop.eup %5512  ;;  %5520 = vpow2.f32 %v3995_v21  ;;  %v4015_v14 = vmul.f32 %v5509_v1, %v4014_v37 }
0x2480   :  { %v4028_v47 = vadd.f32 1.0, %v5513_v13  ;;  %v5515_v60 = vpop.eup %5514  ;;  %v4031_v31 = vmul.f32 -0.5, %v5513_v13  ;;  %v4006_v26 = vmul.f32 %v5511_v18, %v4005_v27  ;;  %v4034_v55 = vand.u32 2147483647, %v5513_v13 }
0x2481   :  { %v4019_v35 = vadd.f32 1.0, %v5515_v60  ;;  %v4022_v39 = vmul.f32 -0.5, %v5515_v60  ;;  %v4025_v20 = vand.u32 2147483647, %v5515_v60  ;;  %v3993_v43 = vmul.f32 1.442695, %v3981_v15 }
0x2482   :  { %5522 = vlog2.f32 %v4028_v47  ;;  %v4032_v59 = vadd.f32 1.0, %v4031_v31  ;;  %vm4035_vm9 = vcmp.lt.f32.partialorder %v4034_v55, 0.0004427343 }
0x2483   :  { %5524 = vlog2.f32 %v4019_v35  ;;  %v4023_v33 = vadd.f32 1.0, %v4022_v39  ;;  %vm4026_vm10 = vcmp.lt.f32.partialorder %v4025_v20, 0.0004427343 }
0x2484   :  { %v4033_v34 = vmul.f32 %v5513_v13, %v4032_v59 }
0x2485   :  { %v4024_v32 = vmul.f32 %v5515_v60, %v4023_v33  ;;  %v3958_v60 = vsub.f32 0.0, %v7130_v12 }
0x2487   :  { %v5517_v48 = vpop.eup %5516  ;;  %v3966_v57 = vmax.f32 %v3958_v60, 0.0 }
0x2488   :  { %v5519_v8 = vpop.eup %5518  ;;  %v4012_v0 = vmul.f32 0.6931472, %v5517_v48 }
0x2489   :  { %v4003_v3 = vmul.f32 0.6931472, %v5519_v8  ;;  %v5521_v50 = vpop.eup %5520 }
0x248a   :  { %v4018_v24 = vsel %vm4017_vm0, %v4015_v14, %v4012_v0  ;;  %v4046_v29 = vadd.f32 1.0, %v5521_v50  ;;  %v4049_v62 = vmul.f32 -0.5, %v5521_v50  ;;  %v4052_v35 = vand.u32 2147483647, %v5521_v50 }
0x248b   :  { %v4074_v52 = vadd.f32 %v4018_v24, %v3962_v54  ;;  %v4009_v7 = vsel %vm4008_vm8, %v4006_v26, %v4003_v3  ;;  %v4176_v3 = vpop.permute.xlu0 %4175  ;;  %v4174_v24 = vpop.permute.xlu1 %4173  ;;  %vm4574_vm8 = vcmask 195712  }
0x248c   :  { %v4073_v61 = vadd.f32 %v4009_v7, %v3961_v9  ;;  %v5523_v41 = vpop.eup %5522  ;;  %5526 = vlog2.f32 %v4046_v29  ;;  %v4050_v11 = vadd.f32 1.0, %v4049_v62  ;;  %vm4053_vm11 = vcmp.lt.f32.partialorder %v4052_v35, 0.0004427343 }
0x248d   :  { %v4082_v6 = vmul.f32 -2.3025851, %v4074_v52  ;;  %v4030_v28 = vmul.f32 0.6931472, %v5523_v41  ;;  %v5525_v4 = vpop.eup %5524  ;;  %v7196_v35 = vadd.f32 %v7132_v45, %v7111_v38 }
0x248e   :  { %v4081_v63 = vmul.f32 -2.3025851, %v4073_v61  ;;  %v4021_v49 = vmul.f32 0.6931472, %v5525_v4  ;;  %v4051_v46 = vmul.f32 %v5521_v50, %v4050_v11  ;;  %v3957_v4 = vsub.f32 0.0, %v7141_v51 }
0x248f   :  { %v4091_v23 = vmul.f32 1.442695, %v4082_v6  ;;  %v4036_v36 = vsel %vm4035_vm9, %v4033_v34, %v4030_v28  ;;  %v4180_v41 = vpop.permute.xlu0 %4179  ;;  %v4178_v29 = vpop.permute.xlu1 %4177 }
0x2490   :  { %v4076_v16 = vadd.f32 %v4036_v36, %v3964_v53  ;;  %v4089_v30 = vmul.f32 1.442695, %v4081_v63  ;;  %v4027_v1 = vsel %vm4026_vm10, %v4024_v32, %v4021_v49  ;;  %v3965_v22 = vmax.f32 %v3957_v4, 0.0 }
0x2491   :  { %v4075_v44 = vadd.f32 %v4027_v1, %v3963_v19  ;;  %5528 = vpow2.f32 %v4091_v23 }
0x2492   :  { %v4084_v18 = vmul.f32 -2.3025851, %v4076_v16  ;;  %5530 = vpow2.f32 %v4089_v30 }
0x2493   :  { %v4083_v13 = vmul.f32 -2.3025851, %v4075_v44  ;;  %v4184_v1 = vpop.permute.xlu0 %4183  ;;  %v4182_v11 = vpop.permute.xlu1 %4181 }
0x2494   :  { %v4095_v21 = vmul.f32 1.442695, %v4084_v18 }
0x2495   :  { %v4093_v47 = vmul.f32 1.442695, %v4083_v13 }
0x2496   :  { %5532 = vpow2.f32 %v4095_v21  ;;  %v5527_v5 = vpop.eup %5526 }
0x2497   :  { %5534 = vpow2.f32 %v3993_v43  ;;  %v4048_v37 = vmul.f32 0.6931472, %v5527_v5 }
0x2498   :  { %5536 = vpow2.f32 %v4093_v47  ;;  %v7191_v47 = vadd.f32 %v7134_v10, %v7111_v38 }
0x2499   :  { %v4054_v27 = vsel %vm4053_vm11, %v4051_v46, %v4048_v37  ;;  %v3976_v37 = vand.u32 2147483647, %v7196_v35 }
0x249a   :  { %v4078_v17 = vadd.f32 %v4054_v27, %v3966_v57  ;;  %v3975_v60 = vand.u32 2147483647, %v7191_v47 }
0x249b   :  { %v5529_v31 = vpop.eup %5528  ;;  %v3984_v57 = vsub.f32 0.0, %v3976_v37 }
0x249c   :  { %v4086_v48 = vmul.f32 -2.3025851, %v4078_v17  ;;  %v5531_v39 = vpop.eup %5530  ;;  %v4106_v0 = vmul.f32 2.0, %v5529_v31  ;;  %v3983_v5 = vsub.f32 0.0, %v3975_v60 }
0x249d   :  { %v4105_v59 = vmul.f32 2.0, %v5531_v39  ;;  %v3999_v27 = vmul.f32 1.442695, %v3984_v57 }
0x249e   :  { %v4099_v54 = vmul.f32 1.442695, %v4086_v48  ;;  %v7146_v58 = vadd.f32 1e-07, %v4106_v0  ;;  %v3997_v46 = vmul.f32 1.442695, %v3983_v5 }
0x249f   :  { %v7151_v50 = vadd.f32 1e-07, %v4105_v59 }
0x24a0   :  { %v5533_v8 = vpop.eup %5532  ;;  %5538 = vpow2.f32 %v4099_v54  ;;  %v7149_v33 = vmul.f32 %v4176_v3, %v7146_v58 }
0x24a1   :  { %v5535_v14 = vpop.eup %5534  ;;  %v4108_v52 = vmul.f32 2.0, %v5533_v8  ;;  %v7160_v56 = vmul.f32 %v4174_v24, %v7151_v50 }
0x24a2   :  { %v5537_v9 = vpop.eup %5536  ;;  %v4037_v26 = vadd.f32 1.0, %v5535_v14  ;;  %v4040_v55 = vmul.f32 -0.5, %v5535_v14  ;;  %4215 = vrot.lane.b32.xlu0 %v7149_v33, %s5631_s1  ;;  %v4043_v53 = vand.u32 2147483647, %v5535_v14 }
0x24a3   :  { %v4107_v7 = vmul.f32 2.0, %v5537_v9  ;;  %v7153_v61 = vadd.f32 1e-07, %v4108_v52  ;;  %4213 = vrot.lane.b32.xlu1 %v7160_v56, %s5631_s1 }
0x24a4   :  { %5540 = vlog2.f32 %v4037_v26  ;;  %v4041_v63 = vadd.f32 1.0, %v4040_v55  ;;  %vm4044_vm12 = vcmp.lt.f32.partialorder %v4043_v53, 0.0004427343  ;;  %v3960_v55 = vsub.f32 0.0, %v7196_v35 }
0x24a5   :  { %v7155_v6 = vadd.f32 1e-07, %v4107_v7  ;;  %v7163_v20 = vmul.f32 %v4180_v41, %v7153_v61 }
0x24a6   :  { %v4042_v49 = vmul.f32 %v5535_v14, %v4041_v63  ;;  %v3959_v14 = vsub.f32 0.0, %v7191_v47 }
0x24a7   :  { %v7168_v28 = vmul.f32 %v4178_v29, %v7155_v6  ;;  %4219 = vrot.lane.b32.xlu0 %v7163_v20, %s5631_s1 }
0x24a8   :  { %v3967_v7 = vmax.f32 %v3959_v14, 0.0 }
0x24a9   :  { %4217 = vrot.lane.b32.xlu1 %v7168_v28, %s5631_s1 }
0x24aa   :  { %v5539_v34 = vpop.eup %5538 }
0x24ab   :  { %v4110_v32 = vmul.f32 2.0, %v5539_v34  ;;  %v3968_v34 = vmax.f32 %v3960_v55, 0.0 }
0x24ad   :  { %v7175_v16 = vadd.f32 1e-07, %v4110_v32  ;;  %v4188_v32 = vpop.permute.xlu0 %4187 }
0x24ae   :  { %v5541_v23 = vpop.eup %5540 }
0x24af   :  { %v4039_v36 = vmul.f32 0.6931472, %v5541_v23  ;;  %v7178_v18 = vmul.f32 %v4184_v1, %v7175_v16  ;;  %v4186_v23 = vpop.permute.xlu1 %4185 }
0x24b1   :  { %v4045_v19 = vsel %vm4044_vm12, %v4042_v49, %v4039_v36  ;;  %4223 = vrot.lane.b32.xlu0 %v7178_v18, %s5631_s1 }
0x24b2   :  { %v4077_v30 = vadd.f32 %v4045_v19, %v3965_v22 }
0x24b4   :  { %v4085_v62 = vmul.f32 -2.3025851, %v4077_v30 }
0x24b6   :  { %v4097_v44 = vmul.f32 1.442695, %v4085_v62 }
0x24b8   :  { %5542 = vpow2.f32 %v4097_v44 }
0x24b9   :  { %5544 = vpow2.f32 %v3997_v46 }
0x24ba   :  { %5546 = vpow2.f32 %v3999_v27 }
0x24c2   :  { %v5543_v15 = vpop.eup %5542 }
0x24c3   :  { %v4109_v21 = vmul.f32 2.0, %v5543_v15  ;;  %v5545_v17 = vpop.eup %5544 }
0x24c4   :  { %v4055_v31 = vadd.f32 1.0, %v5545_v17  ;;  %v5547_v48 = vpop.eup %5546  ;;  %v4058_v39 = vmul.f32 -0.5, %v5545_v17  ;;  %v4061_v38 = vand.u32 2147483647, %v5545_v17 }
0x24c5   :  { %v7182_v13 = vadd.f32 1e-07, %v4109_v21  ;;  %v4064_v10 = vadd.f32 1.0, %v5547_v48  ;;  %v4067_v0 = vmul.f32 -0.5, %v5547_v48  ;;  %v4070_v24 = vand.u32 2147483647, %v5547_v48 }
0x24c6   :  { %5548 = vlog2.f32 %v4055_v31  ;;  %v4059_v54 = vadd.f32 1.0, %v4058_v39  ;;  %vm4062_vm13 = vcmp.lt.f32.partialorder %v4061_v38, 0.0004427343 }
0x24c7   :  { %v7185_v43 = vmul.f32 %v4182_v11, %v7182_v13  ;;  %5550 = vlog2.f32 %v4064_v10  ;;  %v4068_v26 = vadd.f32 1.0, %v4067_v0  ;;  %vm4071_vm14 = vcmp.lt.f32.partialorder %v4070_v24, 0.0004427343 }
0x24c8   :  { %v4060_v3 = vmul.f32 %v5545_v17, %v4059_v54  ;;  %v7228_v54 = vadd.f32 -5.0, %v7114_v2  ;;  %v7231_v0 = vadd.f32 -5.0, %v7117_v40  ;;  %v7247_v40 = vadd.f32 -5.0, %v7130_v12 }
0x24c9   :  { %4221 = vrot.lane.b32.xlu1 %v7185_v43, %s5631_s1  ;;  %v4069_v41 = vmul.f32 %v5547_v48, %v4068_v26 }
0x24ca   :  { %v4355_v24 = vand.u32 2147483647, %v7247_v40 }
0x24d0   :  { %v5549_v8 = vpop.eup %5548 }
0x24d1   :  { %v4057_v45 = vmul.f32 0.6931472, %v5549_v8  ;;  %v5551_v9 = vpop.eup %5550 }
0x24d2   :  { %v4066_v52 = vmul.f32 0.6931472, %v5551_v9  ;;  %v7251_v9 = vadd.f32 -5.0, %v7141_v51 }
0x24d3   :  { %v4063_v59 = vsel %vm4062_vm13, %v4060_v3, %v4057_v45 }
0x24d4   :  { %v4079_v29 = vadd.f32 %v4063_v59, %v3967_v7  ;;  %v4072_v63 = vsel %vm4071_vm14, %v4069_v41, %v4066_v52  ;;  %v4354_v7 = vand.u32 2147483647, %v7251_v9 }
0x24d5   :  { %v4080_v53 = vadd.f32 %v4072_v63, %v3968_v34  ;;  %v4363_v63 = vsub.f32 0.0, %v4355_v24 }
0x24d6   :  { %v4087_v4 = vmul.f32 -2.3025851, %v4079_v29 }
0x24d7   :  { %v4088_v49 = vmul.f32 -2.3025851, %v4080_v53  ;;  %v4376_v53 = vmul.f32 1.442695, %v4363_v63 }
0x24d8   :  { %v4101_v36 = vmul.f32 1.442695, %v4087_v4  ;;  %v4362_v4 = vsub.f32 0.0, %v4354_v7 }
0x24d9   :  { %v4103_v1 = vmul.f32 1.442695, %v4088_v49 }
0x24da   :  { %5552 = vpow2.f32 %v4101_v36 }
0x24db   :  { %5554 = vpow2.f32 %v4103_v1 }
0x24e4   :  { %v5553_v60 = vpop.eup %5552 }
0x24e5   :  { %v4111_v5 = vmul.f32 2.0, %v5553_v60  ;;  %v5555_v37 = vpop.eup %5554 }
0x24e6   :  { %v4112_v57 = vmul.f32 2.0, %v5555_v37 }
0x24e7   :  { %v7205_v46 = vadd.f32 1e-07, %v4111_v5 }
0x24e8   :  { %v7210_v17 = vadd.f32 1e-07, %v4112_v57  ;;  %v4334_v57 = vsub.f32 0.0, %v7231_v0 }
0x24e9   :  { %v7208_v27 = vmul.f32 %v4186_v23, %v7205_v46 }
0x24ea   :  { %v7215_v31 = vmul.f32 %v4188_v32, %v7210_v17  ;;  %v4374_v32 = vmul.f32 1.442695, %v4362_v4 }
0x2514   :  { %v4216_v22 = vpop.permute.xlu0 %4215 }
0x2515   :  { %v4241_v19 = vsel %vm4237_vm15, %v4216_v22, 0.0  ;;  %v4214_v30 = vpop.permute.xlu1 %4213 }
0x2516   :  { %4242 = vadd.xlane.f32.xlu0 %v4241_v19  ;;  %v4238_v62 = vsel %vm4237_vm15, %v4214_v30, 0.0 }
0x2517   :  { %4239 = vadd.xlane.f32.xlu1 %v4238_v62 }
0x2519   :  { %v4220_v44 = vpop.permute.xlu0 %4219 }
0x251a   :  { %v4247_v15 = vsel %vm4237_vm15, %v4220_v44, 0.0 }
0x251b   :  { %v4218_v21 = vpop.permute.xlu1 %4217  ;;  %4248 = vadd.xlane.f32.xlu1 %v4247_v15 }
0x251c   :  { %v4244_v11 = vsel %vm4237_vm15, %v4218_v21, 0.0 }
0x251d   :  { %4245 = vadd.xlane.f32.xlu0 %v4244_v11 }
0x2523   :  { %v4224_v48 = vpop.permute.xlu0 %4223 }
0x2524   :  { %v4253_v39 = vsel %vm4237_vm15, %v4224_v48, 0.0 }
0x252c   :  { %4225 = vrot.lane.b32.xlu1 %v7208_v27, %s5631_s1 }
0x2533   :  { %4227 = vrot.lane.b32.xlu0 %v7215_v31, %s5631_s1 }
0x253b   :  { %v4222_v10 = vpop.permute.xlu1 %4221 }
0x253c   :  { %v4250_v8 = vsel %vm4237_vm15, %v4222_v10, 0.0 }
0x2550   :  { %4254 = vadd.xlane.f32.xlu1 %v4253_v39 }
0x2552   :  { %4251 = vadd.xlane.f32.xlu0 %v4250_v8 }
0x2561   :  { %4285 = vperm.xlu1 %5315, %v7146_v58   ;;  %v4351_v58 = vand.u32 2147483647, %v7228_v54 }
0x2565   :  { %4290 = vperm.xlu1 %5315, %v7155_v6   ;;  %v7237_v6 = vadd.f32 -5.0, %v7122_v42 }
0x2567   :  { %v4353_v2 = vand.u32 2147483647, %v7237_v6  ;;  %v4337_v63 = vsub.f32 0.0, %v7237_v6 }
0x2568   :  { %4280 = vperm.xlu0 %5314, %v7151_v50   ;;  %v4350_v50 = vand.u32 2147483647, %v7231_v0 }
0x2569   :  { %4300 = vperm.xlu1 %5315, %v7182_v13   ;;  %v7241_v13 = vadd.f32 -5.0, %v7125_v25  ;;  %v4361_v26 = vsub.f32 0.0, %v4353_v2 }
0x256a   :  { %v4358_v45 = vsub.f32 0.0, %v4350_v50 }
0x256b   :  { %v4352_v14 = vand.u32 2147483647, %v7241_v13  ;;  %v4372_v51 = vmul.f32 1.442695, %v4361_v26 }
0x256c   :  { %4295 = vperm.xlu0 %5314, %v7153_v61   ;;  %v4366_v59 = vmul.f32 1.442695, %v4358_v45 }
0x256d   :  { %v4360_v52 = vsub.f32 0.0, %v4352_v14  ;;  %v4342_v14 = vmax.f32 %v4334_v57, 0.0 }
0x256f   :  { %v4370_v34 = vmul.f32 1.442695, %v4360_v52 }
0x2570   :  { %4305 = vperm.xlu0 %5314, %v7175_v16   ;;  %v4359_v16 = vsub.f32 0.0, %v4351_v58 }
0x2572   :  { %v4368_v25 = vmul.f32 1.442695, %v4359_v16 }
0x2574   :  { %5556 = vpow2.f32 %v4368_v25 }
0x2575   :  { %5558 = vpow2.f32 %v4366_v59 }
0x2576   :  { %5560 = vpow2.f32 %v4372_v51 }
0x2577   :  { %5562 = vpow2.f32 %v4370_v34 }
0x2578   :  { %5564 = vpow2.f32 %v4376_v53 }
0x2579   :  { %5566 = vpow2.f32 %v4374_v32 }
0x257e   :  { %v5557_v23 = vpop.eup %5556 }
0x257f   :  { %v5559_v36 = vpop.eup %5558  ;;  %v4391_v49 = vadd.f32 1.0, %v5557_v23  ;;  %v4394_v60 = vmul.f32 -0.5, %v5557_v23  ;;  %v4397_v8 = vand.u32 2147483647, %v5557_v23 }
0x2580   :  { %v5561_v22 = vpop.eup %5560  ;;  %v4382_v19 = vadd.f32 1.0, %v5559_v36  ;;  %v4385_v5 = vmul.f32 -0.5, %v5559_v36 }
0x2581   :  { %v5563_v30 = vpop.eup %5562  ;;  %5568 = vlog2.f32 %v4391_v49  ;;  %v4409_v1 = vadd.f32 1.0, %v5561_v22  ;;  %v4395_v10 = vadd.f32 1.0, %v4394_v60  ;;  %v4412_v39 = vmul.f32 -0.5, %v5561_v22 }
0x2582   :  { %v7262_v62 = vpop.eup %5564  ;;  %5570 = vlog2.f32 %v4382_v19  ;;  %v4400_v44 = vadd.f32 1.0, %v5563_v30  ;;  %v4386_v58 = vadd.f32 1.0, %v4385_v5  ;;  %v4403_v50 = vmul.f32 -0.5, %v5563_v30 }
0x2583   :  { %v7264_v15 = vpop.eup %5566  ;;  %5572 = vlog2.f32 %v4409_v1  ;;  %v4427_v21 = vadd.f32 1.0, %v7262_v62  ;;  %v4415_v26 = vand.u32 2147483647, %v5561_v22  ;;  %v4396_v59 = vmul.f32 %v5557_v23, %v4395_v10 }
0x2584   :  { %5574 = vlog2.f32 %v4400_v44  ;;  %v4418_v11 = vadd.f32 1.0, %v7264_v15  ;;  %v4413_v52 = vadd.f32 1.0, %v4412_v39  ;;  %v4406_v7 = vand.u32 2147483647, %v5563_v30 }
0x2585   :  { %5576 = vlog2.f32 %v4427_v21  ;;  %vm7272_vm1 = vcmp.lt.f32.partialorder %v4397_v8, 0.0004427343  ;;  %vm7286_vm4 = vcmp.lt.f32.partialorder %v4415_v26, 0.0004427343  ;;  %v4336_v23 = vsub.f32 0.0, %v7241_v13 }
0x2586   :  { %5578 = vlog2.f32 %v4418_v11  ;;  %v4414_v19 = vmul.f32 %v5561_v22, %v4413_v52  ;;  %vm7291_vm5 = vcmp.lt.f32.partialorder %v4406_v7, 0.0004427343  ;;  %v4433_v11 = vand.u32 2147483647, %v7262_v62 }
0x2587   :  { %v4345_v22 = vmax.f32 %v4337_v63, 0.0  ;;  %v4338_v39 = vsub.f32 0.0, %v7251_v9 }
0x2588   :  { %vm4434_vm6 = vcmp.lt.f32.partialorder %v4433_v11, 0.0004427343 }
0x258b   :  { %v5569_v37 = vpop.eup %5568 }
0x258c   :  { %v5571_v48 = vpop.eup %5570  ;;  %v4393_v16 = vmul.f32 0.6931472, %v5569_v37 }
0x258d   :  { %v5573_v2 = vpop.eup %5572  ;;  %v4384_v25 = vmul.f32 0.6931472, %v5571_v48  ;;  %v4339_v48 = vsub.f32 0.0, %v7247_v40  ;;  %v4346_v40 = vmax.f32 %v4338_v39, 0.0 }
0x258e   :  { %v5575_v24 = vpop.eup %5574  ;;  %v4411_v34 = vmul.f32 0.6931472, %v5573_v2 }
0x258f   :  { %v5577_v4 = vpop.eup %5576 }
0x2590   :  { %v5579_v49 = vpop.eup %5578  ;;  %v4417_v37 = vsel %vm7286_vm4, %v4414_v19, %v4411_v34  ;;  %v4429_v13 = vmul.f32 0.6931472, %v5577_v4 }
0x2591   :  { %v4420_v10 = vmul.f32 0.6931472, %v5579_v49 }
0x25a3   :  { %v7233_v38 = vpop.xlane.xlu0 %4242 }
0x25a4   :  { %v7243_v61 = vpop.xlane.xlu1 %4239  ;;  %5580 = vrcp.f32 %v7233_v38  ;;  %v4344_v38 = vmax.f32 %v4336_v23, 0.0 }
0x25a5   :  { %5582 = vrcp.f32 %v7243_v61 }
0x25a8   :  { %v7255_v3 = vpop.xlane.xlu1 %4248 }
0x25aa   :  { %v7253_v42 = vpop.xlane.xlu0 %4245 }
0x25ab   :  { %5584 = vrcp.f32 %v7253_v42 }
0x25ac   :  { %v4226_v55 = vpop.permute.xlu1 %4225  ;;  %5586 = vrcp.f32 %v7255_v3 }
0x25ad   :  { %v4256_v29 = vsel %vm4237_vm15, %v4226_v55, 0.0  ;;  %v4404_v55 = vadd.f32 1.0, %v4403_v50 }
0x25ae   :  { %v4228_v12 = vpop.permute.xlu0 %4227  ;;  %4257 = vadd.xlane.f32.xlu0 %v4256_v29  ;;  %v4399_v29 = vsel %vm7272_vm1, %v4396_v59, %v4393_v16  ;;  %v5581_v61 = vpop.eup %5580 }
0x25af   :  { %v4259_v41 = vsel %vm4237_vm15, %v4228_v12, 0.0  ;;  %v4387_v12 = vmul.f32 %v5559_v36, %v4386_v58  ;;  %v4405_v21 = vmul.f32 %v5563_v30, %v4404_v55  ;;  %v4457_v58 = vadd.f32 %v4417_v37, %v4345_v22  ;;  %v5583_v42 = vpop.eup %5582 }
0x25b0   :  { %4260 = vadd.xlane.f32.xlu1 %v4259_v41  ;;  %v4421_v41 = vmul.f32 -0.5, %v7264_v15  ;;  %v4265_v0 = vmul.f32 %v5581_v61, %v7149_v33  ;;  %v4263_v63 = vmul.f32 %v5583_v42, %v7160_v56 }
0x25b1   :  { %v4465_v9 = vmul.f32 -2.3025851, %v4457_v58 }
0x25b2   :  { %v4422_v60 = vadd.f32 1.0, %v4421_v41 }
0x25b3   :  { %v4476_v7 = vmul.f32 1.442695, %v4465_v9 }
0x25b4   :  { %v4423_v50 = vmul.f32 %v7264_v15, %v4422_v60 }
0x25c1   :  { %4310 = vperm.xlu1 %5315, %v7205_v46   ;;  %v4335_v46 = vsub.f32 0.0, %v7228_v54  ;;  %v4430_v54 = vmul.f32 -0.5, %v7262_v62 }
0x25c3   :  { %v4343_v45 = vmax.f32 %v4335_v46, 0.0  ;;  %v4431_v44 = vadd.f32 1.0, %v4430_v54  ;;  %v4424_v46 = vand.u32 2147483647, %v7264_v15 }
0x25c4   :  { %4315 = vperm.xlu0 %5314, %v7210_v17   ;;  %v4388_v17 = vand.u32 2147483647, %v5559_v36  ;;  %v4402_v36 = vmul.f32 0.6931472, %v5575_v24 }
0x25c5   :  { %v4455_v6 = vadd.f32 %v4399_v29, %v4343_v45  ;;  %v4432_v30 = vmul.f32 %v7262_v62, %v4431_v44  ;;  %vm4425_vm3 = vcmp.lt.f32.partialorder %v4424_v46, 0.0004427343  ;;  %v4347_v45 = vmax.f32 %v4339_v48, 0.0  ;;  %v5585_v29 = vpop.eup %5584 }
0x25c6   :  { %vm7279_vm2 = vcmp.lt.f32.partialorder %v4388_v17, 0.0004427343  ;;  %v4408_v57 = vsel %vm7291_vm5, %v4405_v21, %v4402_v36  ;;  %v5587_v34 = vpop.eup %5586  ;;  %v4267_v36 = vmul.f32 %v5585_v29, %v7168_v28 }
0x25c7   :  { %v4390_v53 = vsel %vm7279_vm2, %v4387_v12, %v4384_v25  ;;  %v4463_v8 = vmul.f32 -2.3025851, %v4455_v6  ;;  %v4456_v17 = vadd.f32 %v4408_v57, %v4344_v38  ;;  %v4435_v2 = vsel %vm4434_vm6, %v4432_v30, %v4429_v13 }
0x25c8   :  { %v4454_v5 = vadd.f32 %v4390_v53, %v4342_v14  ;;  %v4426_v14 = vsel %vm4425_vm3, %v4423_v50, %v4420_v10  ;;  %v4459_v25 = vadd.f32 %v4435_v2, %v4347_v45  ;;  %v4269_v49 = vmul.f32 %v5587_v34, %v7163_v20 }
0x25c9   :  { %v4472_v62 = vmul.f32 1.442695, %v4463_v8  ;;  %v4464_v24 = vmul.f32 -2.3025851, %v4456_v17  ;;  %v4458_v59 = vadd.f32 %v4426_v14, %v4346_v40  ;;  %v4716_v17 = vadd.f32 -5.0, %v7191_v47 }
0x25ca   :  { %v4462_v16 = vmul.f32 -2.3025851, %v4454_v5  ;;  %v4467_v54 = vmul.f32 -2.3025851, %v4459_v25 }
0x25cb   :  { %v4474_v12 = vmul.f32 1.442695, %v4464_v24  ;;  %v4466_v55 = vmul.f32 -2.3025851, %v4458_v59  ;;  %v4356_v40 = vand.u32 2147483647, %v4716_v17 }
0x25cc   :  { %v4470_v26 = vmul.f32 1.442695, %v4462_v16  ;;  %v4480_v51 = vmul.f32 1.442695, %v4467_v54  ;;  %v4717_v16 = vadd.f32 -5.0, %v7196_v35 }
0x25cd   :  { %v4478_v4 = vmul.f32 1.442695, %v4466_v55  ;;  %v4364_v9 = vsub.f32 0.0, %v4356_v40 }
0x25ce   :  { %v4357_v14 = vand.u32 2147483647, %v4717_v16 }
0x25cf   :  { %v4378_v61 = vmul.f32 1.442695, %v4364_v9 }
0x25dd   :  { %v4255_v15 = vpop.xlane.xlu1 %4254 }
0x25df   :  { %v4252_v52 = vpop.xlane.xlu0 %4251 }
0x25e0   :  { %5588 = vrcp.f32 %v4252_v52 }
0x25e1   :  { %5590 = vrcp.f32 %v4255_v15  ;;  %v4286_v3 = vpop.permute.xlu1 %4285 }
0x25e2   :  { %5592 = vpow2.f32 %v4472_v62  ;;  %v4319_v41 = vmul.f32 %v4286_v3, %v4265_v0  ;;  %v4365_v62 = vsub.f32 0.0, %v4357_v14  ;;  %v4341_v3 = vsub.f32 0.0, %v4717_v16 }
0x25e3   :  { %5594 = vpow2.f32 %v4470_v26 }
0x25e4   :  { %4512 = vrot.lane.b32.xlu0 %v4319_v41, %s5631_s1  ;;  %5596 = vpow2.f32 %v4476_v7  ;;  %v4380_v25 = vmul.f32 1.442695, %v4365_v62 }
0x25e5   :  { %v4291_v32 = vpop.permute.xlu1 %4290  ;;  %5598 = vpow2.f32 %v4474_v12 }
0x25e6   :  { %5600 = vpow2.f32 %v4480_v51  ;;  %v4320_v56 = vmul.f32 %v4291_v32, %v4267_v36  ;;  %v4340_v51 = vsub.f32 0.0, %v4716_v17 }
0x25e7   :  { %v4281_v53 = vpop.permute.xlu0 %4280  ;;  %5602 = vpow2.f32 %v4478_v4  ;;  %v4349_v4 = vmax.f32 %v4341_v3, 0.0 }
0x25e8   :  { %v4318_v33 = vmul.f32 %v4281_v53, %v4263_v63  ;;  %5604 = vpow2.f32 %v4380_v25  ;;  %v4348_v32 = vmax.f32 %v4340_v51, 0.0 }
0x25e9   :  { %v4301_v60 = vpop.permute.xlu1 %4300  ;;  %5606 = vpow2.f32 %v4378_v61 }
0x25ea   :  { %v5589_v23 = vpop.eup %5588  ;;  %4510 = vrot.lane.b32.xlu1 %v4318_v33, %s5631_s1 }
0x25eb   :  { %v5591_v19 = vpop.eup %5590  ;;  %v4296_v1 = vpop.permute.xlu0 %4295  ;;  %v4271_v21 = vmul.f32 %v5589_v23, %v7185_v43 }
0x25ec   :  { %v5593_v44 = vpop.eup %5592  ;;  %v4321_v6 = vmul.f32 %v4296_v1, %v4269_v49  ;;  %v4273_v28 = vmul.f32 %v5591_v19, %v7178_v18 }
0x25ed   :  { %v5595_v11 = vpop.eup %5594  ;;  %v4322_v20 = vmul.f32 %v4301_v60, %v4271_v21  ;;  %v4487_v46 = vmul.f32 2.0, %v5593_v44 }
0x25ee   :  { %4516 = vrot.lane.b32.xlu0 %v4321_v6, %s5631_s1  ;;  %4514 = vrot.lane.b32.xlu1 %v4320_v56, %s5631_s1  ;;  %v5597_v37 = vpop.eup %5596  ;;  %v4486_v22 = vmul.f32 2.0, %v5595_v11 }
0x25ef   :  { %v4306_v5 = vpop.permute.xlu0 %4305  ;;  %v5599_v57 = vpop.eup %5598  ;;  %v4495_v48 = vadd.f32 1e-07, %v4487_v46  ;;  %v4489_v38 = vmul.f32 2.0, %v5597_v37 }
0x25f0   :  { %v4323_v13 = vmul.f32 %v4306_v5, %v4273_v28  ;;  %v5601_v43 = vpop.eup %5600  ;;  %v4494_v10 = vadd.f32 1e-07, %v4486_v22  ;;  %v4488_v30 = vmul.f32 2.0, %v5599_v57 }
0x25f1   :  { %v5603_v39 = vpop.eup %5602  ;;  %v4497_v18 = vadd.f32 1e-07, %v4489_v38  ;;  %v4491_v58 = vmul.f32 2.0, %v5601_v43 }
0x25f2   :  { %4520 = vrot.lane.b32.xlu0 %v4323_v13, %s5631_s1  ;;  %4518 = vrot.lane.b32.xlu1 %v4322_v20, %s5631_s1  ;;  %v4496_v8 = vadd.f32 1e-07, %v4488_v30  ;;  %v4490_v50 = vmul.f32 2.0, %v5603_v39  ;;  %v5605_v26 = vpop.eup %5604 }
0x25f3   :  { %v4499_v2 = vadd.f32 1e-07, %v4491_v58  ;;  %v5607_v24 = vpop.eup %5606  ;;  %v4445_v59 = vadd.f32 1.0, %v5605_v26  ;;  %v4448_v47 = vmul.f32 -0.5, %v5605_v26  ;;  %v4451_v0 = vand.u32 2147483647, %v5605_v26 }
0x25f4   :  { %v4498_v45 = vadd.f32 1e-07, %v4490_v50  ;;  %v4436_v35 = vadd.f32 1.0, %v5607_v24  ;;  %v4439_v52 = vmul.f32 -0.5, %v5607_v24  ;;  %v4442_v55 = vand.u32 2147483647, %v5607_v24 }
0x25f5   :  { %5608 = vlog2.f32 %v4445_v59  ;;  %v4449_v54 = vadd.f32 1.0, %v4448_v47  ;;  %vm4452_vm7 = vcmp.lt.f32.partialorder %v4451_v0, 0.0004427343 }
0x25f6   :  { %4552 = vrot.lane.b32.xlu0 %v4495_v48, %s5631_s1  ;;  %4550 = vrot.lane.b32.xlu1 %v4494_v10, %s5631_s1  ;;  %5610 = vlog2.f32 %v4436_v35  ;;  %v4440_v42 = vadd.f32 1.0, %v4439_v52  ;;  %vm4443_vm0 = vcmp.lt.f32.partialorder %v4442_v55, 0.0004427343 }
0x25f7   :  { %v4450_v29 = vmul.f32 %v5605_v26, %v4449_v54 }
0x25f8   :  { %v4441_v63 = vmul.f32 %v5607_v24, %v4440_v42 }
0x25fa   :  { %4556 = vrot.lane.b32.xlu0 %v4497_v18, %s5631_s1  ;;  %4554 = vrot.lane.b32.xlu1 %v4496_v8, %s5631_s1 }
0x25fe   :  { %4560 = vrot.lane.b32.xlu0 %v4499_v2, %s5631_s1  ;;  %4558 = vrot.lane.b32.xlu1 %v4498_v45, %s5631_s1 }
0x25ff   :  { %v5609_v15 = vpop.eup %5608 }
0x2600   :  { %v5611_v7 = vpop.eup %5610  ;;  %v4447_v12 = vmul.f32 0.6931472, %v5609_v15 }
0x2601   :  { %v4438_v41 = vmul.f32 0.6931472, %v5611_v7 }
0x2602   :  { %v4453_v34 = vsel %vm4452_vm7, %v4450_v29, %v4447_v12 }
0x2603   :  { %v4444_v53 = vsel %vm4443_vm0, %v4441_v63, %v4438_v41  ;;  %v4461_v33 = vadd.f32 %v4453_v34, %v4349_v4 }
0x2604   :  { %v4460_v23 = vadd.f32 %v4444_v53, %v4348_v32 }
0x2605   :  { %v4469_v36 = vmul.f32 -2.3025851, %v4461_v33 }
0x2606   :  { %v4468_v49 = vmul.f32 -2.3025851, %v4460_v23 }
0x2607   :  { %v4484_v19 = vmul.f32 1.442695, %v4469_v36 }
0x2608   :  { %v4482_v1 = vmul.f32 1.442695, %v4468_v49 }
0x2609   :  { %5612 = vpow2.f32 %v4484_v19 }
0x260a   :  { %5614 = vpow2.f32 %v4482_v1 }
0x2613   :  { %v5613_v6 = vpop.eup %5612 }
0x2614   :  { %v5615_v21 = vpop.eup %5614  ;;  %v4493_v57 = vmul.f32 2.0, %v5613_v6 }
0x2615   :  { %v4492_v46 = vmul.f32 2.0, %v5615_v21 }
0x2616   :  { %v4501_v48 = vadd.f32 1e-07, %v4493_v57 }
0x2617   :  { %v4500_v43 = vadd.f32 1e-07, %v4492_v46 }
0x263b   :  { %v4258_v44 = vpop.xlane.xlu0 %4257 }
0x263c   :  { %5616 = vrcp.f32 %v4258_v44 }
0x263d   :  { %v4261_v56 = vpop.xlane.xlu1 %4260 }
0x263e   :  { %5618 = vrcp.f32 %v4261_v56 }
0x2641   :  { %v4311_v5 = vpop.permute.xlu1 %4310 }
0x2643   :  { %v4316_v13 = vpop.permute.xlu0 %4315 }
0x2646   :  { %v5617_v11 = vpop.eup %5616 }
0x2647   :  { %v4275_v28 = vmul.f32 %v5617_v11, %v7208_v27 }
0x2648   :  { %v5619_v60 = vpop.eup %5618 }
0x2649   :  { %v4277_v37 = vmul.f32 %v5619_v60, %v7215_v31  ;;  %v4324_v20 = vmul.f32 %v4311_v5, %v4275_v28 }
0x264b   :  { %v4325_v22 = vmul.f32 %v4316_v13, %v4277_v37  ;;  %4522 = vrot.lane.b32.xlu1 %v4324_v20, %s5631_s1 }
0x264d   :  { %4524 = vrot.lane.b32.xlu0 %v4325_v22, %s5631_s1 }
0x264f   :  { %4562 = vrot.lane.b32.xlu1 %v4500_v43, %s5631_s1 }
0x2651   :  { %4564 = vrot.lane.b32.xlu0 %v4501_v48, %s5631_s1 }
0x2656   :  { %v4513_v10 = vpop.permute.xlu0 %4512 }
0x2657   :  { %4535 = vst.msk [vmem:[%s7401_s2 + $0x8] sm:$0xff] %vm4237_vm15, %v4513_v10 }
0x265c   :  { %v4511_v27 = vpop.permute.xlu1 %4510 }
0x265d   :  { %4534 = vst.msk [vmem:[%s7401_s2] sm:$0xff] %vm4237_vm15, %v4511_v27 }
0x2660   :  { %v4517_v31 = vpop.permute.xlu0 %4516  ;;  %v4515_v38 = vpop.permute.xlu1 %4514 }
0x2661   :  { %4537 = vst.msk [vmem:[%s7401_s2 + $0x18] sm:$0xff] %vm4237_vm15, %v4517_v31  ;;  %4536 = vst.msk [vmem:[%s7401_s2 + $0x10] sm:$0xff] %vm4237_vm15, %v4515_v38 }
0x2664   :  { %v4521_v30 = vpop.permute.xlu0 %4520  ;;  %v4519_v39 = vpop.permute.xlu1 %4518 }
0x2665   :  { %4539 = vst.msk [vmem:[%s7401_s2 + $0x28] sm:$0xff] %vm4237_vm15, %v4521_v30  ;;  %4538 = vst.msk [vmem:[%s7401_s2 + $0x20] sm:$0xff] %vm4237_vm15, %v4519_v39 }
0x2668   :  { %v4553_v18 = vpop.permute.xlu0 %4552  ;;  %v4551_v8 = vpop.permute.xlu1 %4550 }
0x2669   :  { %4576 = vst.msk [vmem:[%s7401_s2 + $0x8] sm:$0xff] %vm4574_vm8, %v4553_v18  ;;  %4575 = vst.msk [vmem:[%s7401_s2] sm:$0xff] %vm4574_vm8, %v4551_v8 }
0x266c   :  { %v4557_v58 = vpop.permute.xlu0 %4556  ;;  %v4555_v50 = vpop.permute.xlu1 %4554 }
0x266d   :  { %4578 = vst.msk [vmem:[%s7401_s2 + $0x18] sm:$0xff] %vm4574_vm8, %v4557_v58  ;;  %4577 = vst.msk [vmem:[%s7401_s2 + $0x10] sm:$0xff] %vm4574_vm8, %v4555_v50 }
0x2670   :  { %v4561_v16 = vpop.permute.xlu0 %4560  ;;  %v4559_v17 = vpop.permute.xlu1 %4558 }
0x2671   :  { %4580 = vst.msk [vmem:[%s7401_s2 + $0x28] sm:$0xff] %vm4574_vm8, %v4561_v16  ;;  %4579 = vst.msk [vmem:[%s7401_s2 + $0x20] sm:$0xff] %vm4574_vm8, %v4559_v17 }
0x26bd   :  { %v4523_v2 = vpop.permute.xlu1 %4522 }
0x26be   :  { %4540 = vst.msk [vmem:[%s7401_s2 + $0x30] sm:$0xff] %vm4237_vm15, %v4523_v2 }
0x26bf   :  { %v4525_v45 = vpop.permute.xlu0 %4524 }
0x26c0   :  { %4541 = vst.msk [vmem:[%s7401_s2 + $0x38] sm:$0xff] %vm4237_vm15, %v4525_v45 }
0x26c1   :  { %v4563_v14 = vpop.permute.xlu1 %4562 }
0x26c2   :  { %4581 = vst.msk [vmem:[%s7401_s2 + $0x30] sm:$0xff] %vm4574_vm8, %v4563_v14 }
0x26c3   :  { %v4565_v40 = vpop.permute.xlu0 %4564 }
0x26c4   :  { %4582 = vst.msk [vmem:[%s7401_s2 + $0x38] sm:$0xff] %vm4574_vm8, %v4565_v40 }

</bundles_post_ra>
